<compile_context>
chip_gen: v7x
topology: tpu7x:2x2x1
jax: 0.10.0
libtpu: 0.0.40
codegen_flags: <defaults>
</compile_context>

<pallas_src>
import functools
import math

import jax
import jax.numpy as jnp
from jax import lax
from jax.experimental import pallas as pl
from jax.experimental.pallas import tpu as pltpu


_VMEM_LIMIT = 64 * 1024 * 1024     # fits v7x physical VMEM, raises v5e/v6e default
NEG_INF = -1e30                    # large finite negative (no inf-inf NaN risk)


# ----------------------------- in-kernel helpers -----------------------------

def _layernorm(x, scale, shift, eps=1e-5):
    # matches the custom LayerNorm: mean/var over last dim, unbiased=False
    mean = jnp.mean(x, axis=-1, keepdims=True)
    var = jnp.mean((x - mean) ** 2, axis=-1, keepdims=True)
    return scale * ((x - mean) * lax.rsqrt(var + eps)) + shift


def _gelu_tanh(x):
    # matches GELU module: 0.5*x*(1+tanh(sqrt(2/pi)*(x+0.044715*x^3)))
    c = math.sqrt(2.0 / math.pi)
    return 0.5 * x * (1.0 + jnp.tanh(c * (x + 0.044715 * x * x * x)))


def _seq_tile(S):
    # 256/128 are good defaults; sweep toward 512 on v6e/v7x if VMEM allows.
    for t in (256, 128):
        if S % t == 0:
            return t
    return S  # small / odd sequence: single tile (equal-to-full-dim is legal)


# --------------------- kernel 1: LN1 + fused QKV projection -------------------

def _qkv_kernel(x_ref, ln_s_ref, ln_b_ref, wqkv_ref, q_ref, k_ref, v_ref):
    x = x_ref[0].astype(jnp.float32)                          # (TS, E)
    E = x.shape[-1]
    xn = _layernorm(x, ln_s_ref[...], ln_b_ref[...])
    qkv = jnp.dot(xn.astype(jnp.bfloat16), wqkv_ref[...],
                  preferred_element_type=jnp.float32)         # (TS, 3E) f32
    qkv = qkv.astype(jnp.bfloat16)
    # aligned (multiple-of-E, hence multiple-of-128 for real sizes) lane slices;
    # each store is a single lane-dense (TS, E) block.
    q_ref[0] = qkv[:, :E]
    k_ref[0] = qkv[:, E:2 * E]
    v_ref[0] = qkv[:, 2 * E:]


def qkv_project(x, ln_s, ln_b, w_qkv, ts):
    B, S, E = x.shape
    nS = S // ts
    out = jax.ShapeDtypeStruct((B, S, E), jnp.bfloat16)
    act_spec = pl.BlockSpec((1, ts, E), lambda b, si: (b, si, 0))
    return pl.pallas_call(
        _qkv_kernel,
        out_shape=(out, out, out),
        grid=(B, nS),
        in_specs=[
            act_spec,                                          # x (bf16 residual)
            pl.BlockSpec((1, E), lambda b, si: (0, 0)),        # ln1 scale
            pl.BlockSpec((1, E), lambda b, si: (0, 0)),        # ln1 shift
            pl.BlockSpec((E, 3 * E), lambda b, si: (0, 0)),    # fused Wqkv (bf16)
        ],
        out_specs=(act_spec, act_spec, act_spec),
        compiler_params=pltpu.CompilerParams(
            dimension_semantics=("parallel", "parallel"),
            vmem_limit_bytes=_VMEM_LIMIT),
    )(x, ln_s, ln_b, w_qkv)


# --------------------- kernel 2: flash-style causal attention -----------------
# Grid = (B, head-groups, lower-triangle steps). The (qi, ki) schedule only
# enumerates ki <= qi, so upper-triangle K/V tiles are never DMA'd.

def _attn_kernel(qtab_ref, ktab_ref, q_ref, k_ref, v_ref, o_ref,
                 m_sc, l_sc, acc_sc, *, scale, heads_per_blk, hd):
    t = pl.program_id(2)
    qi = qtab_ref[t]
    ki = ktab_ref[t]

    @pl.when(ki == 0)                       # first kv tile for this q row
    def _():
        m_sc[...] = jnp.full_like(m_sc, NEG_INF)
        l_sc[...] = jnp.zeros_like(l_sc)
        acc_sc[...] = jnp.zeros_like(acc_sc)

    q = q_ref[0]                            # (TSq, L) bf16, L = heads_per_blk*hd
    k = k_ref[0]                            # (TSk, L) bf16
    v = v_ref[0]                            # (TSk, L) bf16

    def step(masked):
        for p in range(heads_per_blk):      # static loop: heads back-to-back
            lo = p * hd
            qh = q[:, lo:lo + hd]
            kh = k[:, lo:lo + hd]
            vh = v[:, lo:lo + hd]
            s = lax.dot_general(qh, kh, (((1,), (1,)), ((), ())),
                                preferred_element_type=jnp.float32) * scale
            if masked:                      # causal mask only on diagonal tiles
                tsq, tsk = s.shape
                row = lax.broadcasted_iota(jnp.int32, (tsq, tsk), 0)
                col = lax.broadcasted_iota(jnp.int32, (tsq, tsk), 1)
                s = jnp.where(col > row, NEG_INF, s)
            m_prev = m_sc[p]
            m_new = jnp.maximum(m_prev, jnp.max(s, axis=-1, keepdims=True))
            alpha = jnp.exp(m_prev - m_new)
            pmat = jnp.exp(s - m_new)
            l_sc[p] = alpha * l_sc[p] + jnp.sum(pmat, axis=-1, keepdims=True)
            acc_sc[p] = alpha * acc_sc[p] + jnp.dot(
                pmat.astype(vh.dtype), vh, preferred_element_type=jnp.float32)
            m_sc[p] = m_new

    @pl.when(ki < qi)                       # interior tile: fully unmasked
    def _():
        step(masked=False)

    @pl.when(ki == qi)                      # diagonal tile: mask + finalize
    def _():
        step(masked=True)
        out = jnp.concatenate(
            [acc_sc[p] * pl.reciprocal(l_sc[p], approx=True)
             for p in range(heads_per_blk)], axis=-1)
        o_ref[0] = out.astype(o_ref.dtype)


def causal_attention(q, k, v, n_heads, ts):
    B, S, E = q.shape
    hd = E // n_heads
    # pack heads so each block's lane width is a multiple of 128 (or full E):
    # lane-dense, BlockSpec-legal, and 2+ heads/step at hd=64 (GPT-2).
    if hd % 128 == 0:
        hpb = 1
    elif (128 % hd == 0) and (128 // hd) <= n_heads and n_heads % (128 // hd) == 0:
        hpb = 128 // hd
    else:
        hpb = n_heads
    L = hpb * hd
    if L % 128 != 0 and L != E:
        hpb, L = n_heads, E                  # fallback: full-width blocks
    HP = n_heads // hpb
    nS = S // ts

    # lower-triangular (qi, ki) schedule, ki ascending within each qi
    pairs = [(qi, ki) for qi in range(nS) for ki in range(qi + 1)]
    nT = len(pairs)
    qtab = jnp.asarray([p[0] for p in pairs], dtype=jnp.int32)
    ktab = jnp.asarray([p[1] for p in pairs], dtype=jnp.int32)
    scale = 1.0 / math.sqrt(hd)

    q_spec = pl.BlockSpec((1, ts, L), lambda b, g, t, qt, kt: (b, qt[t], g))
    kv_spec = pl.BlockSpec((1, ts, L), lambda b, g, t, qt, kt: (b, kt[t], g))

    return pl.pallas_call(
        functools.partial(_attn_kernel, scale=scale, heads_per_blk=hpb, hd=hd),
        out_shape=jax.ShapeDtypeStruct((B, S, E), jnp.bfloat16),
        grid_spec=pltpu.PrefetchScalarGridSpec(
            num_scalar_prefetch=2,
            grid=(B, HP, nT),
            in_specs=[q_spec, kv_spec, kv_spec],
            out_specs=q_spec,                # ctx written straight into (B,S,E)
            scratch_shapes=[pltpu.VMEM((hpb, ts, 1), jnp.float32),
                            pltpu.VMEM((hpb, ts, 1), jnp.float32),
                            pltpu.VMEM((hpb, ts, hd), jnp.float32)]),
        compiler_params=pltpu.CompilerParams(
            dimension_semantics=("parallel", "parallel", "arbitrary"),
            vmem_limit_bytes=_VMEM_LIMIT),
    )(qtab, ktab, q, k, v)


# ------ kernel 3: out-proj + residual + LN2 + GELU MLP + residual (+final LN) --

def _proj_mlp_kernel(x_ref, ctx_ref, wo_ref, bo_ref, ln2s_ref, ln2b_ref,
                     w1_ref, b1_ref, w2_ref, b2_ref, lnfs_ref, lnfb_ref,
                     o_ref, *, apply_final_ln):
    x = x_ref[0].astype(jnp.float32)                          # (TS, E)
    ctx = ctx_ref[0]                                          # (TS, E) bf16
    attn = jnp.dot(ctx, wo_ref[...],
                   preferred_element_type=jnp.float32) + bo_ref[...]
    x1 = x + attn                                             # residual

    xn2 = _layernorm(x1, ln2s_ref[...], ln2b_ref[...])
    h1 = jnp.dot(xn2.astype(jnp.bfloat16), w1_ref[...],
                 preferred_element_type=jnp.float32) + b1_ref[...]
    g = _gelu_tanh(h1)                                        # f32 elementwise
    ff = jnp.dot(g.astype(jnp.bfloat16), w2_ref[...],
                 preferred_element_type=jnp.float32) + b2_ref[...]
    out = x1 + ff                                             # residual
    if apply_final_ln:                                        # fused final LN
        out = _layernorm(out, lnfs_ref[...], lnfb_ref[...])
    o_ref[0] = out.astype(o_ref.dtype)


def attn_out_and_mlp(x, ctx, p, ln_f, ts, apply_final_ln):
    B, S, E = x.shape
    Hff = p["w1"].shape[1]
    nS = S // ts
    inv = lambda shape: pl.BlockSpec(shape, lambda b, si: (0, 0))
    act_spec = pl.BlockSpec((1, ts, E), lambda b, si: (b, si, 0))
    return pl.pallas_call(
        functools.partial(_proj_mlp_kernel, apply_final_ln=apply_final_ln),
        out_shape=jax.ShapeDtypeStruct((B, S, E), jnp.bfloat16),
        grid=(B, nS),
        in_specs=[
            act_spec,                                          # x (residual)
            act_spec,                                          # ctx (no concat)
            inv((E, E)), inv((1, E)),                          # Wo, bo
            inv((1, E)), inv((1, E)),                          # ln2 s/b
            inv((E, Hff)), inv((1, Hff)),                      # W1, b1
            inv((Hff, E)), inv((1, E)),                        # W2, b2
            inv((1, E)), inv((1, E)),                          # final LN s/b
        ],
        out_specs=act_spec,
        input_output_aliases={0: 0},       # residual stream updated in place
        compiler_params=pltpu.CompilerParams(
            dimension_semantics=("parallel", "parallel"),
            vmem_limit_bytes=_VMEM_LIMIT),
    )(x, ctx, p["wo"], p["bo"], p["ln2_s"], p["ln2_b"],
      p["w1"], p["b1"], p["w2"], p["b2"], ln_f[0], ln_f[1])


# --------------------- kernel 4: vocab-tiled LM head (vocab OUTER) -------------

def _head_kernel(xn_ref, wout_ref, o_ref):
    o_ref[0] = jnp.dot(xn_ref[0], wout_ref[...],
                       preferred_element_type=jnp.float32).astype(o_ref.dtype)


def lm_head(xn, w_out, vocab_size, ts):
    """xn: already final-layernormed bf16 activations (B, S, E)."""
    B, S, E = xn.shape
    V_pad = w_out.shape[1]
    tv = max(t for t in (512, 256, 128) if V_pad % t == 0)
    nV = V_pad // tv
    nS = S // ts
    logits = pl.pallas_call(
        _head_kernel,
        out_shape=jax.ShapeDtypeStruct((B, S, V_pad), jnp.bfloat16),
        # vocab axis OUTER: each (E, tv) weight slab is DMA'd once; only the
        # much smaller bf16 activation tiles are re-streamed per vocab tile.
        grid=(nV, B, nS),
        in_specs=[
            pl.BlockSpec((1, ts, E), lambda vi, b, si: (b, si, 0)),
            pl.BlockSpec((E, tv), lambda vi, b, si: (0, vi)),
        ],
        out_specs=pl.BlockSpec((1, ts, tv), lambda vi, b, si: (b, si, vi)),
        compiler_params=pltpu.CompilerParams(
            dimension_semantics=("parallel", "parallel", "parallel"),
            vmem_limit_bytes=_VMEM_LIMIT),
    )(xn, w_out)
    if V_pad != vocab_size:
        # only taken for vocab sizes that are not multiples of 128
        logits = logits[:, :, :vocab_size]
    return logits


# ------------------------------ parameters ------------------------------------

def init_params(cfg, key):
    """f32 master parameters (used by the pure-JAX reference)."""
    V, C, E = cfg["vocab_size"], cfg["context_length"], cfg["emb_dim"]
    H = 4 * E
    keys = iter(jax.random.split(key, 64))
    std = 0.02
    nrm = lambda shape: (std * jax.random.normal(next(keys), shape)).astype(jnp.float32)

    params = {
        "tok_emb": nrm((V, E)),
        "pos_emb": nrm((C, E)),
        "final_ln_s": jnp.ones((1, E), jnp.float32),
        "final_ln_b": jnp.zeros((1, E), jnp.float32),
        "w_out": nrm((E, V)),                                  # lm head, no bias
        "blocks": [],
    }
    for _ in range(cfg["n_layers"]):
        params["blocks"].append({
            "ln1_s": jnp.ones((1, E), jnp.float32),
            "ln1_b": jnp.zeros((1, E), jnp.float32),
            "wq": nrm((E, E)), "wk": nrm((E, E)), "wv": nrm((E, E)),
            "wo": nrm((E, E)), "bo": jnp.zeros((1, E), jnp.float32),
            "ln2_s": jnp.ones((1, E), jnp.float32),
            "ln2_b": jnp.zeros((1, E), jnp.float32),
            "w1": nrm((E, H)), "b1": jnp.zeros((1, H), jnp.float32),
            "w2": nrm((H, E)), "b2": jnp.zeros((1, E), jnp.float32),
        })
    return params


def prepare_kernel_params(p):
    """Kernel-ready layout: bf16 weights, fused QKV, (optionally) padded vocab."""
    bf = lambda a: a.astype(jnp.bfloat16)
    E, V = p["w_out"].shape
    if V % 128 == 0:
        w_out_k = bf(p["w_out"])
    else:
        V_pad = ((V + 127) // 128) * 128
        w_out_k = bf(jnp.zeros((E, V_pad), jnp.float32).at[:, :V].set(p["w_out"]))
    kp = {
        "tok_emb": p["tok_emb"],
        "pos_emb": p["pos_emb"],
        "final_ln_s": p["final_ln_s"],
        "final_ln_b": p["final_ln_b"],
        "w_out": w_out_k,
        "blocks": [],
    }
    for b in p["blocks"]:
        kp["blocks"].append({
            "ln1_s": b["ln1_s"], "ln1_b": b["ln1_b"],
            "w_qkv": bf(jnp.concatenate([b["wq"], b["wk"], b["wv"]], axis=1)),
            "wo": bf(b["wo"]), "bo": b["bo"],
            "ln2_s": b["ln2_s"], "ln2_b": b["ln2_b"],
            "w1": bf(b["w1"]), "b1": b["b1"],
            "w2": bf(b["w2"]), "b2": b["b2"],
        })
    return kp


# ------------------------------ model wrapper --------------------------------

def gpt_forward(kparams, in_idx, cfg, seq_tile=None):
    B, S = in_idx.shape
    nh = cfg["n_heads"]
    ts = seq_tile if seq_tile is not None else _seq_tile(S)
    assert S % ts == 0
    # embedding lookup + positional embedding (plain-JAX gather glue)
    tok = jnp.take(kparams["tok_emb"], in_idx, axis=0)         # (B, S, E) f32
    pos = kparams["pos_emb"][:S][None, :, :]                   # (1, S, E)
    x = (tok + pos).astype(jnp.bfloat16)   # residual stream kept bf16 in HBM
    # drop_emb: identity (eval mode / drop_rate == 0.0)
    n_layers = len(kparams["blocks"])
    ln_f = (kparams["final_ln_s"], kparams["final_ln_b"])
    for li, blk in enumerate(kparams["blocks"]):
        q, k, v = qkv_project(x, blk["ln1_s"], blk["ln1_b"], blk["w_qkv"], ts)
        ctx = causal_attention(q, k, v, nh, ts)
        x = attn_out_and_mlp(x, ctx, blk, ln_f, ts,
                             apply_final_ln=(li == n_layers - 1))
    return lm_head(x, kparams["w_out"], cfg["vocab_size"], ts)


# ------------------------------ pure-JAX reference ----------------------------

def _ref_forward(params, in_idx, cfg):
    def ln(x, s, b, eps=1e-5):
        m = jnp.mean(x, -1, keepdims=True)
        v = jnp.mean((x - m) ** 2, -1, keepdims=True)
        return s * ((x - m) / jnp.sqrt(v + eps)) + b

    B, S = in_idx.shape
    E = cfg["emb_dim"]
    nh = cfg["n_heads"]
    hd = E // nh
    x = jnp.take(params["tok_emb"], in_idx, axis=0) + params["pos_emb"][:S][None]
    row = jnp.arange(S)[:, None]
    col = jnp.arange(S)[None, :]
    mask = col > row
    for p in params["blocks"]:
        xn = ln(x, p["ln1_s"], p["ln1_b"])
        q = xn @ p["wq"]; k = xn @ p["wk"]; v = xn @ p["wv"]
        q = q.reshape(B, S, nh, hd).transpose(0, 2, 1, 3)
        k = k.reshape(B, S, nh, hd).transpose(0, 2, 1, 3)
        v = v.reshape(B, S, nh, hd).transpose(0, 2, 1, 3)
        s = jnp.einsum("bhqd,bhkd->bhqk", q, k) / math.sqrt(hd)
        s = jnp.where(mask, -jnp.inf, s)
        a = jax.nn.softmax(s, axis=-1)
        ctx = jnp.einsum("bhqk,bhkd->bhqd", a, v).transpose(0, 2, 1, 3).reshape(B, S, E)
        x = x + (ctx @ p["wo"] + p["bo"])
        xn2 = ln(x, p["ln2_s"], p["ln2_b"])
        h1 = xn2 @ p["w1"] + p["b1"]
        c = math.sqrt(2.0 / math.pi)
        g = 0.5 * h1 * (1.0 + jnp.tanh(c * (h1 + 0.044715 * h1 ** 3)))
        x = x + (g @ p["w2"] + p["b2"])
    x = ln(x, params["final_ln_s"], params["final_ln_b"])
    return x @ params["w_out"]


# ----------------------------------- main -------------------------------------

if __name__ == "__main__":
    cfg = {
        "vocab_size": 128,       # multiple of 128 -> no vocab padding / slicing
        "context_length": 16,
        "emb_dim": 32,
        "n_heads": 4,
        "n_layers": 2,
        "drop_rate": 0.0,
        "qkv_bias": False,
    }
    key = jax.random.PRNGKey(0)
    pkey, ikey = jax.random.split(key)
    params = init_params(cfg, pkey)               # f32 master (reference)
    kparams = prepare_kernel_params(params)       # bf16 / fused / padded layout

    B, S = 2, 16
    in_idx = jax.random.randint(ikey, (B, S), 0, cfg["vocab_size"], dtype=jnp.int32)

    # seq_tile=8 exercises the multi-tile lower-triangle attention schedule
    fwd = jax.jit(lambda kp, idx: gpt_forward(kp, idx, cfg, seq_tile=8))
    logits = jax.block_until_ready(fwd(kparams, in_idx))
    assert logits.shape == (B, S, cfg["vocab_size"]), logits.shape

    ref = jax.block_until_ready(_ref_forward(params, in_idx, cfg))
    assert jnp.allclose(logits.astype(jnp.float32), ref, rtol=2e-2, atol=2e-2), \
        "mismatch vs JAX reference"

    print("KERNEL_OK")
</pallas_src>

<mosaic_0001>
module attributes {stable_mosaic.version = 11 : i64} {
  func.func @_qkv_kernel(%arg0: i32, %arg1: i32, %arg2: memref<1x8x32xbf16, #tpu.memory_space<vmem>>, %arg3: memref<1x32xf32, #tpu.memory_space<vmem>>, %arg4: memref<1x32xf32, #tpu.memory_space<vmem>>, %arg5: memref<32x96xbf16, #tpu.memory_space<vmem>>, %arg6: memref<1x8x32xbf16, #tpu.memory_space<vmem>>, %arg7: memref<1x8x32xbf16, #tpu.memory_space<vmem>>, %arg8: memref<1x8x32xbf16, #tpu.memory_space<vmem>>) attributes {dimension_semantics = [#tpu.dimension_semantics<parallel>, #tpu.dimension_semantics<parallel>], iteration_bounds = array<i64: 2, 2>, scalar_prefetch = 0 : i64, scratch_operands = 0 : i64, tpu.core_type = #tpu.core_type<tc>, window_params = [{transform_indices = @transform_0, window_bounds = array<i64: 1, 8, 32>}, {pipeline_mode = #tpu.pipeline_mode<synchronous>, transform_indices = @transform_1, window_bounds = array<i64: 1, 32>}, {pipeline_mode = #tpu.pipeline_mode<synchronous>, transform_indices = @transform_2, window_bounds = array<i64: 1, 32>}, {pipeline_mode = #tpu.pipeline_mode<synchronous>, transform_indices = @transform_3, window_bounds = array<i64: 32, 96>}, {transform_indices = @transform_4, window_bounds = array<i64: 1, 8, 32>}, {transform_indices = @transform_5, window_bounds = array<i64: 1, 8, 32>}, {transform_indices = @transform_6, window_bounds = array<i64: 1, 8, 32>}]} {
    %c0 = arith.constant 0 : index
    %c0_0 = arith.constant 0 : index
    %c0_1 = arith.constant 0 : index
    %0 = vector.load %arg2[%c0, %c0_0, %c0_1] : memref<1x8x32xbf16, #tpu.memory_space<vmem>>, vector<1x8x32xbf16>
    %1 = vector.shape_cast %0 : vector<1x8x32xbf16> to vector<8x32xbf16>
    %2 = arith.extf %1 : vector<8x32xbf16> to vector<8x32xf32>
    %c0_2 = arith.constant 0 : index
    %c0_3 = arith.constant 0 : index
    %3 = vector.load %arg3[%c0_2, %c0_3] : memref<1x32xf32, #tpu.memory_space<vmem>>, vector<1x32xf32>
    %c0_4 = arith.constant 0 : index
    %c0_5 = arith.constant 0 : index
    %4 = vector.load %arg4[%c0_4, %c0_5] : memref<1x32xf32, #tpu.memory_space<vmem>>, vector<1x32xf32>
    %cst = arith.constant dense<0.000000e+00> : vector<8xf32>
    %5 = vector.multi_reduction <add>, %2, %cst [1] : vector<8x32xf32> to vector<8xf32>
    %6 = vector.shape_cast %5 : vector<8xf32> to vector<8x1xf32>
    %cst_6 = arith.constant 3.200000e+01 : f32
    %7 = vector.broadcast %cst_6 : f32 to vector<8x1xf32>
    %8 = arith.divf %6, %7 : vector<8x1xf32>
    %9 = vector.broadcast %8 : vector<8x1xf32> to vector<8x32xf32>
    %10 = arith.subf %2, %9 : vector<8x32xf32>
    %11 = arith.mulf %10, %10 : vector<8x32xf32>
    %cst_7 = arith.constant dense<0.000000e+00> : vector<8xf32>
    %12 = vector.multi_reduction <add>, %11, %cst_7 [1] : vector<8x32xf32> to vector<8xf32>
    %13 = vector.shape_cast %12 : vector<8xf32> to vector<8x1xf32>
    %cst_8 = arith.constant 3.200000e+01 : f32
    %14 = vector.broadcast %cst_8 : f32 to vector<8x1xf32>
    %15 = arith.divf %13, %14 : vector<8x1xf32>
    %16 = vector.broadcast %8 : vector<8x1xf32> to vector<8x32xf32>
    %17 = arith.subf %2, %16 : vector<8x32xf32>
    %cst_9 = arith.constant 9.99999974E-6 : f32
    %18 = vector.broadcast %cst_9 : f32 to vector<8x1xf32>
    %19 = arith.addf %15, %18 : vector<8x1xf32>
    %20 = math.rsqrt %19 : vector<8x1xf32>
    %21 = vector.broadcast %20 : vector<8x1xf32> to vector<8x32xf32>
    %22 = arith.mulf %17, %21 : vector<8x32xf32>
    %23 = vector.broadcast %3 : vector<1x32xf32> to vector<8x32xf32>
    %24 = arith.mulf %23, %22 : vector<8x32xf32>
    %25 = vector.broadcast %4 : vector<1x32xf32> to vector<8x32xf32>
    %26 = arith.addf %24, %25 : vector<8x32xf32>
    %27 = arith.truncf %26 : vector<8x32xf32> to vector<8x32xbf16>
    %c0_10 = arith.constant 0 : index
    %c0_11 = arith.constant 0 : index
    %28 = vector.load %arg5[%c0_10, %c0_11] : memref<32x96xbf16, #tpu.memory_space<vmem>>, vector<32x96xbf16>
    %cst_12 = arith.constant dense<0.000000e+00> : vector<8x96xf32>
    %29 = tpu.matmul %27, %28, %cst_12 {dimension_numbers = #tpu.dot_dimension_numbers<[1], [0], [0], [1], [0, 0, 1, 1], [], []>} : vector<8x32xbf16>, vector<32x96xbf16>, vector<8x96xf32> -> vector<8x96xf32>
    %30 = arith.truncf %29 : vector<8x96xf32> to vector<8x96xbf16>
    %31 = vector.extract_strided_slice %30 {offsets = [0, 0], sizes = [8, 32], strides = [1, 1]} : vector<8x96xbf16> to vector<8x32xbf16>
    %c0_13 = arith.constant 0 : index
    %c0_14 = arith.constant 0 : index
    %c0_15 = arith.constant 0 : index
    %32 = vector.load %arg6[%c0_13, %c0_14, %c0_15] : memref<1x8x32xbf16, #tpu.memory_space<vmem>>, vector<1x8x32xbf16>
    %33 = vector.shape_cast %32 : vector<1x8x32xbf16> to vector<8x32xbf16>
    %34 = vector.shape_cast %31 : vector<8x32xbf16> to vector<1x8x32xbf16>
    tpu.vector_store %arg6[%c0_13, %c0_14, %c0_15], %34 {strides = array<i32>} : memref<1x8x32xbf16, #tpu.memory_space<vmem>>, vector<1x8x32xbf16>,
    %35 = vector.extract_strided_slice %30 {offsets = [0, 32], sizes = [8, 32], strides = [1, 1]} : vector<8x96xbf16> to vector<8x32xbf16>
    %c0_16 = arith.constant 0 : index
    %c0_17 = arith.constant 0 : index
    %c0_18 = arith.constant 0 : index
    %36 = vector.load %arg7[%c0_16, %c0_17, %c0_18] : memref<1x8x32xbf16, #tpu.memory_space<vmem>>, vector<1x8x32xbf16>
    %37 = vector.shape_cast %36 : vector<1x8x32xbf16> to vector<8x32xbf16>
    %38 = vector.shape_cast %35 : vector<8x32xbf16> to vector<1x8x32xbf16>
    tpu.vector_store %arg7[%c0_16, %c0_17, %c0_18], %38 {strides = array<i32>} : memref<1x8x32xbf16, #tpu.memory_space<vmem>>, vector<1x8x32xbf16>,
    %39 = vector.extract_strided_slice %30 {offsets = [0, 64], sizes = [8, 32], strides = [1, 1]} : vector<8x96xbf16> to vector<8x32xbf16>
    %c0_19 = arith.constant 0 : index
    %c0_20 = arith.constant 0 : index
    %c0_21 = arith.constant 0 : index
    %40 = vector.load %arg8[%c0_19, %c0_20, %c0_21] : memref<1x8x32xbf16, #tpu.memory_space<vmem>>, vector<1x8x32xbf16>
    %41 = vector.shape_cast %40 : vector<1x8x32xbf16> to vector<8x32xbf16>
    %42 = vector.shape_cast %39 : vector<8x32xbf16> to vector<1x8x32xbf16>
    tpu.vector_store %arg8[%c0_19, %c0_20, %c0_21], %42 {strides = array<i32>} : memref<1x8x32xbf16, #tpu.memory_space<vmem>>, vector<1x8x32xbf16>,
    return
  }
  func.func @transform_0(%arg0: i32, %arg1: i32) -> (i32, i32, i32) {
    %c0_i32 = arith.constant 0 : i32
    %c0_i32_0 = arith.constant 0 : i32
    return %arg0, %arg1, %c0_i32 : i32, i32, i32
  }
  func.func @transform_1(%arg0: i32, %arg1: i32) -> (i32, i32) {
    %c0_i32 = arith.constant 0 : i32
    %c0_i32_0 = arith.constant 0 : i32
    %c0_i32_1 = arith.constant 0 : i32
    return %c0_i32, %c0_i32_0 : i32, i32
  }
  func.func @transform_2(%arg0: i32, %arg1: i32) -> (i32, i32) {
    %c0_i32 = arith.constant 0 : i32
    %c0_i32_0 = arith.constant 0 : i32
    %c0_i32_1 = arith.constant 0 : i32
    return %c0_i32, %c0_i32_0 : i32, i32
  }
  func.func @transform_3(%arg0: i32, %arg1: i32) -> (i32, i32) {
    %c0_i32 = arith.constant 0 : i32
    %c0_i32_0 = arith.constant 0 : i32
    %c0_i32_1 = arith.constant 0 : i32
    return %c0_i32, %c0_i32_0 : i32, i32
  }
  func.func @transform_4(%arg0: i32, %arg1: i32) -> (i32, i32, i32) {
    %c0_i32 = arith.constant 0 : i32
    %c0_i32_0 = arith.constant 0 : i32
    return %arg0, %arg1, %c0_i32 : i32, i32, i32
  }
  func.func @transform_5(%arg0: i32, %arg1: i32) -> (i32, i32, i32) {
    %c0_i32 = arith.constant 0 : i32
    %c0_i32_0 = arith.constant 0 : i32
    return %arg0, %arg1, %c0_i32 : i32, i32, i32
  }
  func.func @transform_6(%arg0: i32, %arg1: i32) -> (i32, i32, i32) {
    %c0_i32 = arith.constant 0 : i32
    %c0_i32_0 = arith.constant 0 : i32
    return %arg0, %arg1, %c0_i32 : i32, i32, i32
  }
}

module attributes {stable_mosaic.version = 11 : i64} {
  func.func @_attn_kernel(%arg0: i32, %arg1: i32, %arg2: i32, %arg3: memref<3xi32, #tpu.memory_space<smem>>, %arg4: memref<3xi32, #tpu.memory_space<smem>>, %arg5: memref<1x8x32xbf16, #tpu.memory_space<vmem>>, %arg6: memref<1x8x32xbf16, #tpu.memory_space<vmem>>, %arg7: memref<1x8x32xbf16, #tpu.memory_space<vmem>>, %arg8: memref<1x8x32xbf16, #tpu.memory_space<vmem>>, %arg9: memref<4x8x1xf32, #tpu.memory_space<vmem>>, %arg10: memref<4x8x1xf32, #tpu.memory_space<vmem>>, %arg11: memref<4x8x8xf32, #tpu.memory_space<vmem>>) attributes {dimension_semantics = [#tpu.dimension_semantics<parallel>, #tpu.dimension_semantics<parallel>, #tpu.dimension_semantics<arbitrary>], iteration_bounds = array<i64: 2, 1, 3>, scalar_prefetch = 2 : i64, scratch_operands = 3 : i64, tpu.core_type = #tpu.core_type<tc>, window_params = [{transform_indices = @transform_0, window_bounds = array<i64: 1, 8, 32>}, {transform_indices = @transform_1, window_bounds = array<i64: 1, 8, 32>}, {transform_indices = @transform_2, window_bounds = array<i64: 1, 8, 32>}, {transform_indices = @transform_3, window_bounds = array<i64: 1, 8, 32>}]} {
    %0 = arith.index_cast %arg2 : i32 to index
    %1 = memref.load %arg3[%0] : memref<3xi32, #tpu.memory_space<smem>>
    %2 = arith.index_cast %arg2 : i32 to index
    %3 = memref.load %arg4[%2] : memref<3xi32, #tpu.memory_space<smem>>
    %c0_i32 = arith.constant 0 : i32
    %4 = arith.cmpi eq, %3, %c0_i32 : i32
    %5 = arith.extui %4 : i1 to i32
    %c0_i32_0 = arith.constant 0 : i32
    %6 = arith.cmpi ne, %5, %c0_i32_0 : i32
    scf.if %6 {
      %cst = arith.constant -1.000000e+30 : f32
      %19 = vector.broadcast %cst : f32 to vector<4x8x1xf32>
      %c0_11 = arith.constant 0 : index
      %c0_12 = arith.constant 0 : index
      %c0_13 = arith.constant 0 : index
      %20 = vector.load %arg9[%c0_11, %c0_12, %c0_13] : memref<4x8x1xf32, #tpu.memory_space<vmem>>, vector<4x8x1xf32>
      tpu.vector_store %arg9[%c0_11, %c0_12, %c0_13], %19 {strides = array<i32>} : memref<4x8x1xf32, #tpu.memory_space<vmem>>, vector<4x8x1xf32>,
      %cst_14 = arith.constant 0.000000e+00 : f32
      %21 = vector.broadcast %cst_14 : f32 to vector<4x8x1xf32>
      %c0_15 = arith.constant 0 : index
      %c0_16 = arith.constant 0 : index
      %c0_17 = arith.constant 0 : index
      %22 = vector.load %arg10[%c0_15, %c0_16, %c0_17] : memref<4x8x1xf32, #tpu.memory_space<vmem>>, vector<4x8x1xf32>
      tpu.vector_store %arg10[%c0_15, %c0_16, %c0_17], %21 {strides = array<i32>} : memref<4x8x1xf32, #tpu.memory_space<vmem>>, vector<4x8x1xf32>,
      %cst_18 = arith.constant 0.000000e+00 : f32
      %23 = vector.broadcast %cst_18 : f32 to vector<4x8x8xf32>
      %c0_19 = arith.constant 0 : index
      %c0_20 = arith.constant 0 : index
      %c0_21 = arith.constant 0 : index
      %24 = vector.load %arg11[%c0_19, %c0_20, %c0_21] : memref<4x8x8xf32, #tpu.memory_space<vmem>>, vector<4x8x8xf32>
      tpu.vector_store %arg11[%c0_19, %c0_20, %c0_21], %23 {strides = array<i32>} : memref<4x8x8xf32, #tpu.memory_space<vmem>>, vector<4x8x8xf32>,
    } else {
    }
    %c0 = arith.constant 0 : index
    %c0_1 = arith.constant 0 : index
    %c0_2 = arith.constant 0 : index
    %7 = vector.load %arg5[%c0, %c0_1, %c0_2] : memref<1x8x32xbf16, #tpu.memory_space<vmem>>, vector<1x8x32xbf16>
    %8 = vector.shape_cast %7 : vector<1x8x32xbf16> to vector<8x32xbf16>
    %c0_3 = arith.constant 0 : index
    %c0_4 = arith.constant 0 : index
    %c0_5 = arith.constant 0 : index
    %9 = vector.load %arg6[%c0_3, %c0_4, %c0_5] : memref<1x8x32xbf16, #tpu.memory_space<vmem>>, vector<1x8x32xbf16>
    %10 = vector.shape_cast %9 : vector<1x8x32xbf16> to vector<8x32xbf16>
    %c0_6 = arith.constant 0 : index
    %c0_7 = arith.constant 0 : index
    %c0_8 = arith.constant 0 : index
    %11 = vector.load %arg7[%c0_6, %c0_7, %c0_8] : memref<1x8x32xbf16, #tpu.memory_space<vmem>>, vector<1x8x32xbf16>
    %12 = vector.shape_cast %11 : vector<1x8x32xbf16> to vector<8x32xbf16>
    %13 = arith.cmpi slt, %3, %1 : i32
    %14 = arith.extui %13 : i1 to i32
    %c0_i32_9 = arith.constant 0 : i32
    %15 = arith.cmpi ne, %14, %c0_i32_9 : i32
    scf.if %15 {
      %19 = vector.extract_strided_slice %8 {offsets = [0, 0], sizes = [8, 8], strides = [1, 1]} : vector<8x32xbf16> to vector<8x8xbf16>
      %20 = vector.extract_strided_slice %10 {offsets = [0, 0], sizes = [8, 8], strides = [1, 1]} : vector<8x32xbf16> to vector<8x8xbf16>
      %21 = vector.extract_strided_slice %12 {offsets = [0, 0], sizes = [8, 8], strides = [1, 1]} : vector<8x32xbf16> to vector<8x8xbf16>
      %cst = arith.constant dense<0.000000e+00> : vector<8x8xf32>
      %22 = tpu.matmul %19, %20, %cst {dimension_numbers = #tpu.dot_dimension_numbers<[1], [1], [0], [0], [0, 0, 1, 0], [], []>} : vector<8x8xbf16>, vector<8x8xbf16>, vector<8x8xf32> -> vector<8x8xf32>
      %cst_11 = arith.constant 0.353553385 : f32
      %23 = vector.broadcast %cst_11 : f32 to vector<8x8xf32>
      %24 = arith.mulf %22, %23 : vector<8x8xf32>
      %c0_12 = arith.constant 0 : index
      %c0_13 = arith.constant 0 : index
      %c0_14 = arith.constant 0 : index
      %25 = vector.load %arg9[%c0_12, %c0_13, %c0_14] : memref<4x8x1xf32, #tpu.memory_space<vmem>>, vector<1x8x1xf32>
      %26 = vector.shape_cast %25 : vector<1x8x1xf32> to vector<8x1xf32>
      %cst_15 = arith.constant dense<0xFF800000> : vector<8xf32>
      %27 = vector.multi_reduction <maximumf>, %24, %cst_15 [1] : vector<8x8xf32> to vector<8xf32>
      %28 = vector.shape_cast %27 : vector<8xf32> to vector<8x1xf32>
      %29 = arith.maximumf %26, %28 : vector<8x1xf32>
      %30 = arith.subf %26, %29 : vector<8x1xf32>
      %31 = math.exp %30 : vector<8x1xf32>
      %32 = vector.broadcast %29 : vector<8x1xf32> to vector<8x8xf32>
      %33 = arith.subf %24, %32 : vector<8x8xf32>
      %34 = math.exp %33 : vector<8x8xf32>
      %c0_16 = arith.constant 0 : index
      %c0_17 = arith.constant 0 : index
      %c0_18 = arith.constant 0 : index
      %35 = vector.load %arg10[%c0_16, %c0_17, %c0_18] : memref<4x8x1xf32, #tpu.memory_space<vmem>>, vector<1x8x1xf32>
      %36 = vector.shape_cast %35 : vector<1x8x1xf32> to vector<8x1xf32>
      %37 = arith.mulf %31, %36 : vector<8x1xf32>
      %cst_19 = arith.constant dense<0.000000e+00> : vector<8xf32>
      %38 = vector.multi_reduction <add>, %34, %cst_19 [1] : vector<8x8xf32> to vector<8xf32>
      %39 = vector.shape_cast %38 : vector<8xf32> to vector<8x1xf32>
      %40 = arith.addf %37, %39 : vector<8x1xf32>
      %c0_20 = arith.constant 0 : index
      %c0_21 = arith.constant 0 : index
      %c0_22 = arith.constant 0 : index
      %41 = vector.load %arg10[%c0_20, %c0_21, %c0_22] : memref<4x8x1xf32, #tpu.memory_space<vmem>>, vector<1x8x1xf32>
      %42 = vector.shape_cast %41 : vector<1x8x1xf32> to vector<8x1xf32>
      %43 = vector.shape_cast %40 : vector<8x1xf32> to vector<1x8x1xf32>
      tpu.vector_store %arg10[%c0_20, %c0_21, %c0_22], %43 {strides = array<i32>} : memref<4x8x1xf32, #tpu.memory_space<vmem>>, vector<1x8x1xf32>,
      %c0_23 = arith.constant 0 : index
      %c0_24 = arith.constant 0 : index
      %c0_25 = arith.constant 0 : index
      %44 = vector.load %arg11[%c0_23, %c0_24, %c0_25] : memref<4x8x8xf32, #tpu.memory_space<vmem>>, vector<1x8x8xf32>
      %45 = vector.shape_cast %44 : vector<1x8x8xf32> to vector<8x8xf32>
      %46 = vector.broadcast %31 : vector<8x1xf32> to vector<8x8xf32>
      %47 = arith.mulf %46, %45 : vector<8x8xf32>
      %48 = arith.truncf %34 : vector<8x8xf32> to vector<8x8xbf16>
      %cst_26 = arith.constant dense<0.000000e+00> : vector<8x8xf32>
      %49 = tpu.matmul %48, %21, %cst_26 {dimension_numbers = #tpu.dot_dimension_numbers<[1], [0], [0], [1], [0, 0, 1, 1], [], []>} : vector<8x8xbf16>, vector<8x8xbf16>, vector<8x8xf32> -> vector<8x8xf32>
      %50 = arith.addf %47, %49 : vector<8x8xf32>
      %c0_27 = arith.constant 0 : index
      %c0_28 = arith.constant 0 : index
      %c0_29 = arith.constant 0 : index
      %51 = vector.load %arg11[%c0_27, %c0_28, %c0_29] : memref<4x8x8xf32, #tpu.memory_space<vmem>>, vector<1x8x8xf32>
      %52 = vector.shape_cast %51 : vector<1x8x8xf32> to vector<8x8xf32>
      %53 = vector.shape_cast %50 : vector<8x8xf32> to vector<1x8x8xf32>
      tpu.vector_store %arg11[%c0_27, %c0_28, %c0_29], %53 {strides = array<i32>} : memref<4x8x8xf32, #tpu.memory_space<vmem>>, vector<1x8x8xf32>,
      %c0_30 = arith.constant 0 : index
      %c0_31 = arith.constant 0 : index
      %c0_32 = arith.constant 0 : index
      %54 = vector.load %arg9[%c0_30, %c0_31, %c0_32] : memref<4x8x1xf32, #tpu.memory_space<vmem>>, vector<1x8x1xf32>
      %55 = vector.shape_cast %54 : vector<1x8x1xf32> to vector<8x1xf32>
      %56 = vector.shape_cast %29 : vector<8x1xf32> to vector<1x8x1xf32>
      tpu.vector_store %arg9[%c0_30, %c0_31, %c0_32], %56 {strides = array<i32>} : memref<4x8x1xf32, #tpu.memory_space<vmem>>, vector<1x8x1xf32>,
      %57 = vector.extract_strided_slice %8 {offsets = [0, 8], sizes = [8, 8], strides = [1, 1]} : vector<8x32xbf16> to vector<8x8xbf16>
      %58 = vector.extract_strided_slice %10 {offsets = [0, 8], sizes = [8, 8], strides = [1, 1]} : vector<8x32xbf16> to vector<8x8xbf16>
      %59 = vector.extract_strided_slice %12 {offsets = [0, 8], sizes = [8, 8], strides = [1, 1]} : vector<8x32xbf16> to vector<8x8xbf16>
      %cst_33 = arith.constant dense<0.000000e+00> : vector<8x8xf32>
      %60 = tpu.matmul %57, %58, %cst_33 {dimension_numbers = #tpu.dot_dimension_numbers<[1], [1], [0], [0], [0, 0, 1, 0], [], []>} : vector<8x8xbf16>, vector<8x8xbf16>, vector<8x8xf32> -> vector<8x8xf32>
      %cst_34 = arith.constant 0.353553385 : f32
      %61 = vector.broadcast %cst_34 : f32 to vector<8x8xf32>
      %62 = arith.mulf %60, %61 : vector<8x8xf32>
      %c1 = arith.constant 1 : index
      %c0_35 = arith.constant 0 : index
      %c0_36 = arith.constant 0 : index
      %63 = vector.load %arg9[%c1, %c0_35, %c0_36] : memref<4x8x1xf32, #tpu.memory_space<vmem>>, vector<1x8x1xf32>
      %64 = vector.shape_cast %63 : vector<1x8x1xf32> to vector<8x1xf32>
      %cst_37 = arith.constant dense<0xFF800000> : vector<8xf32>
      %65 = vector.multi_reduction <maximumf>, %62, %cst_37 [1] : vector<8x8xf32> to vector<8xf32>
      %66 = vector.shape_cast %65 : vector<8xf32> to vector<8x1xf32>
      %67 = arith.maximumf %64, %66 : vector<8x1xf32>
      %68 = arith.subf %64, %67 : vector<8x1xf32>
      %69 = math.exp %68 : vector<8x1xf32>
      %70 = vector.broadcast %67 : vector<8x1xf32> to vector<8x8xf32>
      %71 = arith.subf %62, %70 : vector<8x8xf32>
      %72 = math.exp %71 : vector<8x8xf32>
      %c1_38 = arith.constant 1 : index
      %c0_39 = arith.constant 0 : index
      %c0_40 = arith.constant 0 : index
      %73 = vector.load %arg10[%c1_38, %c0_39, %c0_40] : memref<4x8x1xf32, #tpu.memory_space<vmem>>, vector<1x8x1xf32>
      %74 = vector.shape_cast %73 : vector<1x8x1xf32> to vector<8x1xf32>
      %75 = arith.mulf %69, %74 : vector<8x1xf32>
      %cst_41 = arith.constant dense<0.000000e+00> : vector<8xf32>
      %76 = vector.multi_reduction <add>, %72, %cst_41 [1] : vector<8x8xf32> to vector<8xf32>
      %77 = vector.shape_cast %76 : vector<8xf32> to vector<8x1xf32>
      %78 = arith.addf %75, %77 : vector<8x1xf32>
      %c1_42 = arith.constant 1 : index
      %c0_43 = arith.constant 0 : index
      %c0_44 = arith.constant 0 : index
      %79 = vector.load %arg10[%c1_42, %c0_43, %c0_44] : memref<4x8x1xf32, #tpu.memory_space<vmem>>, vector<1x8x1xf32>
      %80 = vector.shape_cast %79 : vector<1x8x1xf32> to vector<8x1xf32>
      %81 = vector.shape_cast %78 : vector<8x1xf32> to vector<1x8x1xf32>
      tpu.vector_store %arg10[%c1_42, %c0_43, %c0_44], %81 {strides = array<i32>} : memref<4x8x1xf32, #tpu.memory_space<vmem>>, vector<1x8x1xf32>,
      %c1_45 = arith.constant 1 : index
      %c0_46 = arith.constant 0 : index
      %c0_47 = arith.constant 0 : index
      %82 = vector.load %arg11[%c1_45, %c0_46, %c0_47] : memref<4x8x8xf32, #tpu.memory_space<vmem>>, vector<1x8x8xf32>
      %83 = vector.shape_cast %82 : vector<1x8x8xf32> to vector<8x8xf32>
      %84 = vector.broadcast %69 : vector<8x1xf32> to vector<8x8xf32>
      %85 = arith.mulf %84, %83 : vector<8x8xf32>
      %86 = arith.truncf %72 : vector<8x8xf32> to vector<8x8xbf16>
      %cst_48 = arith.constant dense<0.000000e+00> : vector<8x8xf32>
      %87 = tpu.matmul %86, %59, %cst_48 {dimension_numbers = #tpu.dot_dimension_numbers<[1], [0], [0], [1], [0, 0, 1, 1], [], []>} : vector<8x8xbf16>, vector<8x8xbf16>, vector<8x8xf32> -> vector<8x8xf32>
      %88 = arith.addf %85, %87 : vector<8x8xf32>
      %c1_49 = arith.constant 1 : index
      %c0_50 = arith.constant 0 : index
      %c0_51 = arith.constant 0 : index
      %89 = vector.load %arg11[%c1_49, %c0_50, %c0_51] : memref<4x8x8xf32, #tpu.memory_space<vmem>>, vector<1x8x8xf32>
      %90 = vector.shape_cast %89 : vector<1x8x8xf32> to vector<8x8xf32>
      %91 = vector.shape_cast %88 : vector<8x8xf32> to vector<1x8x8xf32>
      tpu.vector_store %arg11[%c1_49, %c0_50, %c0_51], %91 {strides = array<i32>} : memref<4x8x8xf32, #tpu.memory_space<vmem>>, vector<1x8x8xf32>,
      %c1_52 = arith.constant 1 : index
      %c0_53 = arith.constant 0 : index
      %c0_54 = arith.constant 0 : index
      %92 = vector.load %arg9[%c1_52, %c0_53, %c0_54] : memref<4x8x1xf32, #tpu.memory_space<vmem>>, vector<1x8x1xf32>
      %93 = vector.shape_cast %92 : vector<1x8x1xf32> to vector<8x1xf32>
      %94 = vector.shape_cast %67 : vector<8x1xf32> to vector<1x8x1xf32>
      tpu.vector_store %arg9[%c1_52, %c0_53, %c0_54], %94 {strides = array<i32>} : memref<4x8x1xf32, #tpu.memory_space<vmem>>, vector<1x8x1xf32>,
      %95 = vector.extract_strided_slice %8 {offsets = [0, 16], sizes = [8, 8], strides = [1, 1]} : vector<8x32xbf16> to vector<8x8xbf16>
      %96 = vector.extract_strided_slice %10 {offsets = [0, 16], sizes = [8, 8], strides = [1, 1]} : vector<8x32xbf16> to vector<8x8xbf16>
      %97 = vector.extract_strided_slice %12 {offsets = [0, 16], sizes = [8, 8], strides = [1, 1]} : vector<8x32xbf16> to vector<8x8xbf16>
      %cst_55 = arith.constant dense<0.000000e+00> : vector<8x8xf32>
      %98 = tpu.matmul %95, %96, %cst_55 {dimension_numbers = #tpu.dot_dimension_numbers<[1], [1], [0], [0], [0, 0, 1, 0], [], []>} : vector<8x8xbf16>, vector<8x8xbf16>, vector<8x8xf32> -> vector<8x8xf32>
      %cst_56 = arith.constant 0.353553385 : f32
      %99 = vector.broadcast %cst_56 : f32 to vector<8x8xf32>
      %100 = arith.mulf %98, %99 : vector<8x8xf32>
      %c2 = arith.constant 2 : index
      %c0_57 = arith.constant 0 : index
      %c0_58 = arith.constant 0 : index
      %101 = vector.load %arg9[%c2, %c0_57, %c0_58] : memref<4x8x1xf32, #tpu.memory_space<vmem>>, vector<1x8x1xf32>
      %102 = vector.shape_cast %101 : vector<1x8x1xf32> to vector<8x1xf32>
      %cst_59 = arith.constant dense<0xFF800000> : vector<8xf32>
      %103 = vector.multi_reduction <maximumf>, %100, %cst_59 [1] : vector<8x8xf32> to vector<8xf32>
      %104 = vector.shape_cast %103 : vector<8xf32> to vector<8x1xf32>
      %105 = arith.maximumf %102, %104 : vector<8x1xf32>
      %106 = arith.subf %102, %105 : vector<8x1xf32>
      %107 = math.exp %106 : vector<8x1xf32>
      %108 = vector.broadcast %105 : vector<8x1xf32> to vector<8x8xf32>
      %109 = arith.subf %100, %108 : vector<8x8xf32>
      %110 = math.exp %109 : vector<8x8xf32>
      %c2_60 = arith.constant 2 : index
      %c0_61 = arith.constant 0 : index
      %c0_62 = arith.constant 0 : index
      %111 = vector.load %arg10[%c2_60, %c0_61, %c0_62] : memref<4x8x1xf32, #tpu.memory_space<vmem>>, vector<1x8x1xf32>
      %112 = vector.shape_cast %111 : vector<1x8x1xf32> to vector<8x1xf32>
      %113 = arith.mulf %107, %112 : vector<8x1xf32>
      %cst_63 = arith.constant dense<0.000000e+00> : vector<8xf32>
      %114 = vector.multi_reduction <add>, %110, %cst_63 [1] : vector<8x8xf32> to vector<8xf32>
      %115 = vector.shape_cast %114 : vector<8xf32> to vector<8x1xf32>
      %116 = arith.addf %113, %115 : vector<8x1xf32>
      %c2_64 = arith.constant 2 : index
      %c0_65 = arith.constant 0 : index
      %c0_66 = arith.constant 0 : index
      %117 = vector.load %arg10[%c2_64, %c0_65, %c0_66] : memref<4x8x1xf32, #tpu.memory_space<vmem>>, vector<1x8x1xf32>
      %118 = vector.shape_cast %117 : vector<1x8x1xf32> to vector<8x1xf32>
      %119 = vector.shape_cast %116 : vector<8x1xf32> to vector<1x8x1xf32>
      tpu.vector_store %arg10[%c2_64, %c0_65, %c0_66], %119 {strides = array<i32>} : memref<4x8x1xf32, #tpu.memory_space<vmem>>, vector<1x8x1xf32>,
      %c2_67 = arith.constant 2 : index
      %c0_68 = arith.constant 0 : index
      %c0_69 = arith.constant 0 : index
      %120 = vector.load %arg11[%c2_67, %c0_68, %c0_69] : memref<4x8x8xf32, #tpu.memory_space<vmem>>, vector<1x8x8xf32>
      %121 = vector.shape_cast %120 : vector<1x8x8xf32> to vector<8x8xf32>
      %122 = vector.broadcast %107 : vector<8x1xf32> to vector<8x8xf32>
      %123 = arith.mulf %122, %121 : vector<8x8xf32>
      %124 = arith.truncf %110 : vector<8x8xf32> to vector<8x8xbf16>
      %cst_70 = arith.constant dense<0.000000e+00> : vector<8x8xf32>
      %125 = tpu.matmul %124, %97, %cst_70 {dimension_numbers = #tpu.dot_dimension_numbers<[1], [0], [0], [1], [0, 0, 1, 1], [], []>} : vector<8x8xbf16>, vector<8x8xbf16>, vector<8x8xf32> -> vector<8x8xf32>
      %126 = arith.addf %123, %125 : vector<8x8xf32>
      %c2_71 = arith.constant 2 : index
      %c0_72 = arith.constant 0 : index
      %c0_73 = arith.constant 0 : index
      %127 = vector.load %arg11[%c2_71, %c0_72, %c0_73] : memref<4x8x8xf32, #tpu.memory_space<vmem>>, vector<1x8x8xf32>
      %128 = vector.shape_cast %127 : vector<1x8x8xf32> to vector<8x8xf32>
      %129 = vector.shape_cast %126 : vector<8x8xf32> to vector<1x8x8xf32>
      tpu.vector_store %arg11[%c2_71, %c0_72, %c0_73], %129 {strides = array<i32>} : memref<4x8x8xf32, #tpu.memory_space<vmem>>, vector<1x8x8xf32>,
      %c2_74 = arith.constant 2 : index
      %c0_75 = arith.constant 0 : index
      %c0_76 = arith.constant 0 : index
      %130 = vector.load %arg9[%c2_74, %c0_75, %c0_76] : memref<4x8x1xf32, #tpu.memory_space<vmem>>, vector<1x8x1xf32>
      %131 = vector.shape_cast %130 : vector<1x8x1xf32> to vector<8x1xf32>
      %132 = vector.shape_cast %105 : vector<8x1xf32> to vector<1x8x1xf32>
      tpu.vector_store %arg9[%c2_74, %c0_75, %c0_76], %132 {strides = array<i32>} : memref<4x8x1xf32, #tpu.memory_space<vmem>>, vector<1x8x1xf32>,
      %133 = vector.extract_strided_slice %8 {offsets = [0, 24], sizes = [8, 8], strides = [1, 1]} : vector<8x32xbf16> to vector<8x8xbf16>
      %134 = vector.extract_strided_slice %10 {offsets = [0, 24], sizes = [8, 8], strides = [1, 1]} : vector<8x32xbf16> to vector<8x8xbf16>
      %135 = vector.extract_strided_slice %12 {offsets = [0, 24], sizes = [8, 8], strides = [1, 1]} : vector<8x32xbf16> to vector<8x8xbf16>
      %cst_77 = arith.constant dense<0.000000e+00> : vector<8x8xf32>
      %136 = tpu.matmul %133, %134, %cst_77 {dimension_numbers = #tpu.dot_dimension_numbers<[1], [1], [0], [0], [0, 0, 1, 0], [], []>} : vector<8x8xbf16>, vector<8x8xbf16>, vector<8x8xf32> -> vector<8x8xf32>
      %cst_78 = arith.constant 0.353553385 : f32
      %137 = vector.broadcast %cst_78 : f32 to vector<8x8xf32>
      %138 = arith.mulf %136, %137 : vector<8x8xf32>
      %c3 = arith.constant 3 : index
      %c0_79 = arith.constant 0 : index
      %c0_80 = arith.constant 0 : index
      %139 = vector.load %arg9[%c3, %c0_79, %c0_80] : memref<4x8x1xf32, #tpu.memory_space<vmem>>, vector<1x8x1xf32>
      %140 = vector.shape_cast %139 : vector<1x8x1xf32> to vector<8x1xf32>
      %cst_81 = arith.constant dense<0xFF800000> : vector<8xf32>
      %141 = vector.multi_reduction <maximumf>, %138, %cst_81 [1] : vector<8x8xf32> to vector<8xf32>
      %142 = vector.shape_cast %141 : vector<8xf32> to vector<8x1xf32>
      %143 = arith.maximumf %140, %142 : vector<8x1xf32>
      %144 = arith.subf %140, %143 : vector<8x1xf32>
      %145 = math.exp %144 : vector<8x1xf32>
      %146 = vector.broadcast %143 : vector<8x1xf32> to vector<8x8xf32>
      %147 = arith.subf %138, %146 : vector<8x8xf32>
      %148 = math.exp %147 : vector<8x8xf32>
      %c3_82 = arith.constant 3 : index
      %c0_83 = arith.constant 0 : index
      %c0_84 = arith.constant 0 : index
      %149 = vector.load %arg10[%c3_82, %c0_83, %c0_84] : memref<4x8x1xf32, #tpu.memory_space<vmem>>, vector<1x8x1xf32>
      %150 = vector.shape_cast %149 : vector<1x8x1xf32> to vector<8x1xf32>
      %151 = arith.mulf %145, %150 : vector<8x1xf32>
      %cst_85 = arith.constant dense<0.000000e+00> : vector<8xf32>
      %152 = vector.multi_reduction <add>, %148, %cst_85 [1] : vector<8x8xf32> to vector<8xf32>
      %153 = vector.shape_cast %152 : vector<8xf32> to vector<8x1xf32>
      %154 = arith.addf %151, %153 : vector<8x1xf32>
      %c3_86 = arith.constant 3 : index
      %c0_87 = arith.constant 0 : index
      %c0_88 = arith.constant 0 : index
      %155 = vector.load %arg10[%c3_86, %c0_87, %c0_88] : memref<4x8x1xf32, #tpu.memory_space<vmem>>, vector<1x8x1xf32>
      %156 = vector.shape_cast %155 : vector<1x8x1xf32> to vector<8x1xf32>
      %157 = vector.shape_cast %154 : vector<8x1xf32> to vector<1x8x1xf32>
      tpu.vector_store %arg10[%c3_86, %c0_87, %c0_88], %157 {strides = array<i32>} : memref<4x8x1xf32, #tpu.memory_space<vmem>>, vector<1x8x1xf32>,
      %c3_89 = arith.constant 3 : index
      %c0_90 = arith.constant 0 : index
      %c0_91 = arith.constant 0 : index
      %158 = vector.load %arg11[%c3_89, %c0_90, %c0_91] : memref<4x8x8xf32, #tpu.memory_space<vmem>>, vector<1x8x8xf32>
      %159 = vector.shape_cast %158 : vector<1x8x8xf32> to vector<8x8xf32>
      %160 = vector.broadcast %145 : vector<8x1xf32> to vector<8x8xf32>
      %161 = arith.mulf %160, %159 : vector<8x8xf32>
      %162 = arith.truncf %148 : vector<8x8xf32> to vector<8x8xbf16>
      %cst_92 = arith.constant dense<0.000000e+00> : vector<8x8xf32>
      %163 = tpu.matmul %162, %135, %cst_92 {dimension_numbers = #tpu.dot_dimension_numbers<[1], [0], [0], [1], [0, 0, 1, 1], [], []>} : vector<8x8xbf16>, vector<8x8xbf16>, vector<8x8xf32> -> vector<8x8xf32>
      %164 = arith.addf %161, %163 : vector<8x8xf32>
      %c3_93 = arith.constant 3 : index
      %c0_94 = arith.constant 0 : index
      %c0_95 = arith.constant 0 : index
      %165 = vector.load %arg11[%c3_93, %c0_94, %c0_95] : memref<4x8x8xf32, #tpu.memory_space<vmem>>, vector<1x8x8xf32>
      %166 = vector.shape_cast %165 : vector<1x8x8xf32> to vector<8x8xf32>
      %167 = vector.shape_cast %164 : vector<8x8xf32> to vector<1x8x8xf32>
      tpu.vector_store %arg11[%c3_93, %c0_94, %c0_95], %167 {strides = array<i32>} : memref<4x8x8xf32, #tpu.memory_space<vmem>>, vector<1x8x8xf32>,
      %c3_96 = arith.constant 3 : index
      %c0_97 = arith.constant 0 : index
      %c0_98 = arith.constant 0 : index
      %168 = vector.load %arg9[%c3_96, %c0_97, %c0_98] : memref<4x8x1xf32, #tpu.memory_space<vmem>>, vector<1x8x1xf32>
      %169 = vector.shape_cast %168 : vector<1x8x1xf32> to vector<8x1xf32>
      %170 = vector.shape_cast %143 : vector<8x1xf32> to vector<1x8x1xf32>
      tpu.vector_store %arg9[%c3_96, %c0_97, %c0_98], %170 {strides = array<i32>} : memref<4x8x1xf32, #tpu.memory_space<vmem>>, vector<1x8x1xf32>,
    } else {
    }
    %16 = arith.cmpi eq, %3, %1 : i32
    %17 = arith.extui %16 : i1 to i32
    %c0_i32_10 = arith.constant 0 : i32
    %18 = arith.cmpi ne, %17, %c0_i32_10 : i32
    scf.if %18 {
      %19 = vector.extract_strided_slice %8 {offsets = [0, 0], sizes = [8, 8], strides = [1, 1]} : vector<8x32xbf16> to vector<8x8xbf16>
      %20 = vector.extract_strided_slice %10 {offsets = [0, 0], sizes = [8, 8], strides = [1, 1]} : vector<8x32xbf16> to vector<8x8xbf16>
      %21 = vector.extract_strided_slice %12 {offsets = [0, 0], sizes = [8, 8], strides = [1, 1]} : vector<8x32xbf16> to vector<8x8xbf16>
      %cst = arith.constant dense<0.000000e+00> : vector<8x8xf32>
      %22 = tpu.matmul %19, %20, %cst {dimension_numbers = #tpu.dot_dimension_numbers<[1], [1], [0], [0], [0, 0, 1, 0], [], []>} : vector<8x8xbf16>, vector<8x8xbf16>, vector<8x8xf32> -> vector<8x8xf32>
      %cst_11 = arith.constant 0.353553385 : f32
      %23 = vector.broadcast %cst_11 : f32 to vector<8x8xf32>
      %24 = arith.mulf %22, %23 : vector<8x8xf32>
      %25 = tpu.iota {dimensions = array<i32: 0>} : vector<8x8xi32>
      %26 = tpu.iota {dimensions = array<i32: 1>} : vector<8x8xi32>
      %27 = arith.cmpi sgt, %26, %25 : vector<8x8xi32>
      %cst_12 = arith.constant -1.000000e+30 : f32
      %28 = vector.broadcast %cst_12 : f32 to vector<8x8xf32>
      %29 = arith.select %27, %28, %24 : vector<8x8xi1>, vector<8x8xf32>
      %c0_13 = arith.constant 0 : index
      %c0_14 = arith.constant 0 : index
      %c0_15 = arith.constant 0 : index
      %30 = vector.load %arg9[%c0_13, %c0_14, %c0_15] : memref<4x8x1xf32, #tpu.memory_space<vmem>>, vector<1x8x1xf32>
      %31 = vector.shape_cast %30 : vector<1x8x1xf32> to vector<8x1xf32>
      %cst_16 = arith.constant dense<0xFF800000> : vector<8xf32>
      %32 = vector.multi_reduction <maximumf>, %29, %cst_16 [1] : vector<8x8xf32> to vector<8xf32>
      %33 = vector.shape_cast %32 : vector<8xf32> to vector<8x1xf32>
      %34 = arith.maximumf %31, %33 : vector<8x1xf32>
      %35 = arith.subf %31, %34 : vector<8x1xf32>
      %36 = math.exp %35 : vector<8x1xf32>
      %37 = vector.broadcast %34 : vector<8x1xf32> to vector<8x8xf32>
      %38 = arith.subf %29, %37 : vector<8x8xf32>
      %39 = math.exp %38 : vector<8x8xf32>
      %c0_17 = arith.constant 0 : index
      %c0_18 = arith.constant 0 : index
      %c0_19 = arith.constant 0 : index
      %40 = vector.load %arg10[%c0_17, %c0_18, %c0_19] : memref<4x8x1xf32, #tpu.memory_space<vmem>>, vector<1x8x1xf32>
      %41 = vector.shape_cast %40 : vector<1x8x1xf32> to vector<8x1xf32>
      %42 = arith.mulf %36, %41 : vector<8x1xf32>
      %cst_20 = arith.constant dense<0.000000e+00> : vector<8xf32>
      %43 = vector.multi_reduction <add>, %39, %cst_20 [1] : vector<8x8xf32> to vector<8xf32>
      %44 = vector.shape_cast %43 : vector<8xf32> to vector<8x1xf32>
      %45 = arith.addf %42, %44 : vector<8x1xf32>
      %c0_21 = arith.constant 0 : index
      %c0_22 = arith.constant 0 : index
      %c0_23 = arith.constant 0 : index
      %46 = vector.load %arg10[%c0_21, %c0_22, %c0_23] : memref<4x8x1xf32, #tpu.memory_space<vmem>>, vector<1x8x1xf32>
      %47 = vector.shape_cast %46 : vector<1x8x1xf32> to vector<8x1xf32>
      %48 = vector.shape_cast %45 : vector<8x1xf32> to vector<1x8x1xf32>
      tpu.vector_store %arg10[%c0_21, %c0_22, %c0_23], %48 {strides = array<i32>} : memref<4x8x1xf32, #tpu.memory_space<vmem>>, vector<1x8x1xf32>,
      %c0_24 = arith.constant 0 : index
      %c0_25 = arith.constant 0 : index
      %c0_26 = arith.constant 0 : index
      %49 = vector.load %arg11[%c0_24, %c0_25, %c0_26] : memref<4x8x8xf32, #tpu.memory_space<vmem>>, vector<1x8x8xf32>
      %50 = vector.shape_cast %49 : vector<1x8x8xf32> to vector<8x8xf32>
      %51 = vector.broadcast %36 : vector<8x1xf32> to vector<8x8xf32>
      %52 = arith.mulf %51, %50 : vector<8x8xf32>
      %53 = arith.truncf %39 : vector<8x8xf32> to vector<8x8xbf16>
      %cst_27 = arith.constant dense<0.000000e+00> : vector<8x8xf32>
      %54 = tpu.matmul %53, %21, %cst_27 {dimension_numbers = #tpu.dot_dimension_numbers<[1], [0], [0], [1], [0, 0, 1, 1], [], []>} : vector<8x8xbf16>, vector<8x8xbf16>, vector<8x8xf32> -> vector<8x8xf32>
      %55 = arith.addf %52, %54 : vector<8x8xf32>
      %c0_28 = arith.constant 0 : index
      %c0_29 = arith.constant 0 : index
      %c0_30 = arith.constant 0 : index
      %56 = vector.load %arg11[%c0_28, %c0_29, %c0_30] : memref<4x8x8xf32, #tpu.memory_space<vmem>>, vector<1x8x8xf32>
      %57 = vector.shape_cast %56 : vector<1x8x8xf32> to vector<8x8xf32>
      %58 = vector.shape_cast %55 : vector<8x8xf32> to vector<1x8x8xf32>
      tpu.vector_store %arg11[%c0_28, %c0_29, %c0_30], %58 {strides = array<i32>} : memref<4x8x8xf32, #tpu.memory_space<vmem>>, vector<1x8x8xf32>,
      %c0_31 = arith.constant 0 : index
      %c0_32 = arith.constant 0 : index
      %c0_33 = arith.constant 0 : index
      %59 = vector.load %arg9[%c0_31, %c0_32, %c0_33] : memref<4x8x1xf32, #tpu.memory_space<vmem>>, vector<1x8x1xf32>
      %60 = vector.shape_cast %59 : vector<1x8x1xf32> to vector<8x1xf32>
      %61 = vector.shape_cast %34 : vector<8x1xf32> to vector<1x8x1xf32>
      tpu.vector_store %arg9[%c0_31, %c0_32, %c0_33], %61 {strides = array<i32>} : memref<4x8x1xf32, #tpu.memory_space<vmem>>, vector<1x8x1xf32>,
      %62 = vector.extract_strided_slice %8 {offsets = [0, 8], sizes = [8, 8], strides = [1, 1]} : vector<8x32xbf16> to vector<8x8xbf16>
      %63 = vector.extract_strided_slice %10 {offsets = [0, 8], sizes = [8, 8], strides = [1, 1]} : vector<8x32xbf16> to vector<8x8xbf16>
      %64 = vector.extract_strided_slice %12 {offsets = [0, 8], sizes = [8, 8], strides = [1, 1]} : vector<8x32xbf16> to vector<8x8xbf16>
      %cst_34 = arith.constant dense<0.000000e+00> : vector<8x8xf32>
      %65 = tpu.matmul %62, %63, %cst_34 {dimension_numbers = #tpu.dot_dimension_numbers<[1], [1], [0], [0], [0, 0, 1, 0], [], []>} : vector<8x8xbf16>, vector<8x8xbf16>, vector<8x8xf32> -> vector<8x8xf32>
      %cst_35 = arith.constant 0.353553385 : f32
      %66 = vector.broadcast %cst_35 : f32 to vector<8x8xf32>
      %67 = arith.mulf %65, %66 : vector<8x8xf32>
      %68 = tpu.iota {dimensions = array<i32: 0>} : vector<8x8xi32>
      %69 = tpu.iota {dimensions = array<i32: 1>} : vector<8x8xi32>
      %70 = arith.cmpi sgt, %69, %68 : vector<8x8xi32>
      %cst_36 = arith.constant -1.000000e+30 : f32
      %71 = vector.broadcast %cst_36 : f32 to vector<8x8xf32>
      %72 = arith.select %70, %71, %67 : vector<8x8xi1>, vector<8x8xf32>
      %c1 = arith.constant 1 : index
      %c0_37 = arith.constant 0 : index
      %c0_38 = arith.constant 0 : index
      %73 = vector.load %arg9[%c1, %c0_37, %c0_38] : memref<4x8x1xf32, #tpu.memory_space<vmem>>, vector<1x8x1xf32>
      %74 = vector.shape_cast %73 : vector<1x8x1xf32> to vector<8x1xf32>
      %cst_39 = arith.constant dense<0xFF800000> : vector<8xf32>
      %75 = vector.multi_reduction <maximumf>, %72, %cst_39 [1] : vector<8x8xf32> to vector<8xf32>
      %76 = vector.shape_cast %75 : vector<8xf32> to vector<8x1xf32>
      %77 = arith.maximumf %74, %76 : vector<8x1xf32>
      %78 = arith.subf %74, %77 : vector<8x1xf32>
      %79 = math.exp %78 : vector<8x1xf32>
      %80 = vector.broadcast %77 : vector<8x1xf32> to vector<8x8xf32>
      %81 = arith.subf %72, %80 : vector<8x8xf32>
      %82 = math.exp %81 : vector<8x8xf32>
      %c1_40 = arith.constant 1 : index
      %c0_41 = arith.constant 0 : index
      %c0_42 = arith.constant 0 : index
      %83 = vector.load %arg10[%c1_40, %c0_41, %c0_42] : memref<4x8x1xf32, #tpu.memory_space<vmem>>, vector<1x8x1xf32>
      %84 = vector.shape_cast %83 : vector<1x8x1xf32> to vector<8x1xf32>
      %85 = arith.mulf %79, %84 : vector<8x1xf32>
      %cst_43 = arith.constant dense<0.000000e+00> : vector<8xf32>
      %86 = vector.multi_reduction <add>, %82, %cst_43 [1] : vector<8x8xf32> to vector<8xf32>
      %87 = vector.shape_cast %86 : vector<8xf32> to vector<8x1xf32>
      %88 = arith.addf %85, %87 : vector<8x1xf32>
      %c1_44 = arith.constant 1 : index
      %c0_45 = arith.constant 0 : index
      %c0_46 = arith.constant 0 : index
      %89 = vector.load %arg10[%c1_44, %c0_45, %c0_46] : memref<4x8x1xf32, #tpu.memory_space<vmem>>, vector<1x8x1xf32>
      %90 = vector.shape_cast %89 : vector<1x8x1xf32> to vector<8x1xf32>
      %91 = vector.shape_cast %88 : vector<8x1xf32> to vector<1x8x1xf32>
      tpu.vector_store %arg10[%c1_44, %c0_45, %c0_46], %91 {strides = array<i32>} : memref<4x8x1xf32, #tpu.memory_space<vmem>>, vector<1x8x1xf32>,
      %c1_47 = arith.constant 1 : index
      %c0_48 = arith.constant 0 : index
      %c0_49 = arith.constant 0 : index
      %92 = vector.load %arg11[%c1_47, %c0_48, %c0_49] : memref<4x8x8xf32, #tpu.memory_space<vmem>>, vector<1x8x8xf32>
      %93 = vector.shape_cast %92 : vector<1x8x8xf32> to vector<8x8xf32>
      %94 = vector.broadcast %79 : vector<8x1xf32> to vector<8x8xf32>
      %95 = arith.mulf %94, %93 : vector<8x8xf32>
      %96 = arith.truncf %82 : vector<8x8xf32> to vector<8x8xbf16>
      %cst_50 = arith.constant dense<0.000000e+00> : vector<8x8xf32>
      %97 = tpu.matmul %96, %64, %cst_50 {dimension_numbers = #tpu.dot_dimension_numbers<[1], [0], [0], [1], [0, 0, 1, 1], [], []>} : vector<8x8xbf16>, vector<8x8xbf16>, vector<8x8xf32> -> vector<8x8xf32>
      %98 = arith.addf %95, %97 : vector<8x8xf32>
      %c1_51 = arith.constant 1 : index
      %c0_52 = arith.constant 0 : index
      %c0_53 = arith.constant 0 : index
      %99 = vector.load %arg11[%c1_51, %c0_52, %c0_53] : memref<4x8x8xf32, #tpu.memory_space<vmem>>, vector<1x8x8xf32>
      %100 = vector.shape_cast %99 : vector<1x8x8xf32> to vector<8x8xf32>
      %101 = vector.shape_cast %98 : vector<8x8xf32> to vector<1x8x8xf32>
      tpu.vector_store %arg11[%c1_51, %c0_52, %c0_53], %101 {strides = array<i32>} : memref<4x8x8xf32, #tpu.memory_space<vmem>>, vector<1x8x8xf32>,
      %c1_54 = arith.constant 1 : index
      %c0_55 = arith.constant 0 : index
      %c0_56 = arith.constant 0 : index
      %102 = vector.load %arg9[%c1_54, %c0_55, %c0_56] : memref<4x8x1xf32, #tpu.memory_space<vmem>>, vector<1x8x1xf32>
      %103 = vector.shape_cast %102 : vector<1x8x1xf32> to vector<8x1xf32>
      %104 = vector.shape_cast %77 : vector<8x1xf32> to vector<1x8x1xf32>
      tpu.vector_store %arg9[%c1_54, %c0_55, %c0_56], %104 {strides = array<i32>} : memref<4x8x1xf32, #tpu.memory_space<vmem>>, vector<1x8x1xf32>,
      %105 = vector.extract_strided_slice %8 {offsets = [0, 16], sizes = [8, 8], strides = [1, 1]} : vector<8x32xbf16> to vector<8x8xbf16>
      %106 = vector.extract_strided_slice %10 {offsets = [0, 16], sizes = [8, 8], strides = [1, 1]} : vector<8x32xbf16> to vector<8x8xbf16>
      %107 = vector.extract_strided_slice %12 {offsets = [0, 16], sizes = [8, 8], strides = [1, 1]} : vector<8x32xbf16> to vector<8x8xbf16>
      %cst_57 = arith.constant dense<0.000000e+00> : vector<8x8xf32>
      %108 = tpu.matmul %105, %106, %cst_57 {dimension_numbers = #tpu.dot_dimension_numbers<[1], [1], [0], [0], [0, 0, 1, 0], [], []>} : vector<8x8xbf16>, vector<8x8xbf16>, vector<8x8xf32> -> vector<8x8xf32>
      %cst_58 = arith.constant 0.353553385 : f32
      %109 = vector.broadcast %cst_58 : f32 to vector<8x8xf32>
      %110 = arith.mulf %108, %109 : vector<8x8xf32>
      %111 = tpu.iota {dimensions = array<i32: 0>} : vector<8x8xi32>
      %112 = tpu.iota {dimensions = array<i32: 1>} : vector<8x8xi32>
      %113 = arith.cmpi sgt, %112, %111 : vector<8x8xi32>
      %cst_59 = arith.constant -1.000000e+30 : f32
      %114 = vector.broadcast %cst_59 : f32 to vector<8x8xf32>
      %115 = arith.select %113, %114, %110 : vector<8x8xi1>, vector<8x8xf32>
      %c2 = arith.constant 2 : index
      %c0_60 = arith.constant 0 : index
      %c0_61 = arith.constant 0 : index
      %116 = vector.load %arg9[%c2, %c0_60, %c0_61] : memref<4x8x1xf32, #tpu.memory_space<vmem>>, vector<1x8x1xf32>
      %117 = vector.shape_cast %116 : vector<1x8x1xf32> to vector<8x1xf32>
      %cst_62 = arith.constant dense<0xFF800000> : vector<8xf32>
      %118 = vector.multi_reduction <maximumf>, %115, %cst_62 [1] : vector<8x8xf32> to vector<8xf32>
      %119 = vector.shape_cast %118 : vector<8xf32> to vector<8x1xf32>
      %120 = arith.maximumf %117, %119 : vector<8x1xf32>
      %121 = arith.subf %117, %120 : vector<8x1xf32>
      %122 = math.exp %121 : vector<8x1xf32>
      %123 = vector.broadcast %120 : vector<8x1xf32> to vector<8x8xf32>
      %124 = arith.subf %115, %123 : vector<8x8xf32>
      %125 = math.exp %124 : vector<8x8xf32>
      %c2_63 = arith.constant 2 : index
      %c0_64 = arith.constant 0 : index
      %c0_65 = arith.constant 0 : index
      %126 = vector.load %arg10[%c2_63, %c0_64, %c0_65] : memref<4x8x1xf32, #tpu.memory_space<vmem>>, vector<1x8x1xf32>
      %127 = vector.shape_cast %126 : vector<1x8x1xf32> to vector<8x1xf32>
      %128 = arith.mulf %122, %127 : vector<8x1xf32>
      %cst_66 = arith.constant dense<0.000000e+00> : vector<8xf32>
      %129 = vector.multi_reduction <add>, %125, %cst_66 [1] : vector<8x8xf32> to vector<8xf32>
      %130 = vector.shape_cast %129 : vector<8xf32> to vector<8x1xf32>
      %131 = arith.addf %128, %130 : vector<8x1xf32>
      %c2_67 = arith.constant 2 : index
      %c0_68 = arith.constant 0 : index
      %c0_69 = arith.constant 0 : index
      %132 = vector.load %arg10[%c2_67, %c0_68, %c0_69] : memref<4x8x1xf32, #tpu.memory_space<vmem>>, vector<1x8x1xf32>
      %133 = vector.shape_cast %132 : vector<1x8x1xf32> to vector<8x1xf32>
      %134 = vector.shape_cast %131 : vector<8x1xf32> to vector<1x8x1xf32>
      tpu.vector_store %arg10[%c2_67, %c0_68, %c0_69], %134 {strides = array<i32>} : memref<4x8x1xf32, #tpu.memory_space<vmem>>, vector<1x8x1xf32>,
      %c2_70 = arith.constant 2 : index
      %c0_71 = arith.constant 0 : index
      %c0_72 = arith.constant 0 : index
      %135 = vector.load %arg11[%c2_70, %c0_71, %c0_72] : memref<4x8x8xf32, #tpu.memory_space<vmem>>, vector<1x8x8xf32>
      %136 = vector.shape_cast %135 : vector<1x8x8xf32> to vector<8x8xf32>
      %137 = vector.broadcast %122 : vector<8x1xf32> to vector<8x8xf32>
      %138 = arith.mulf %137, %136 : vector<8x8xf32>
      %139 = arith.truncf %125 : vector<8x8xf32> to vector<8x8xbf16>
      %cst_73 = arith.constant dense<0.000000e+00> : vector<8x8xf32>
      %140 = tpu.matmul %139, %107, %cst_73 {dimension_numbers = #tpu.dot_dimension_numbers<[1], [0], [0], [1], [0, 0, 1, 1], [], []>} : vector<8x8xbf16>, vector<8x8xbf16>, vector<8x8xf32> -> vector<8x8xf32>
      %141 = arith.addf %138, %140 : vector<8x8xf32>
      %c2_74 = arith.constant 2 : index
      %c0_75 = arith.constant 0 : index
      %c0_76 = arith.constant 0 : index
      %142 = vector.load %arg11[%c2_74, %c0_75, %c0_76] : memref<4x8x8xf32, #tpu.memory_space<vmem>>, vector<1x8x8xf32>
      %143 = vector.shape_cast %142 : vector<1x8x8xf32> to vector<8x8xf32>
      %144 = vector.shape_cast %141 : vector<8x8xf32> to vector<1x8x8xf32>
      tpu.vector_store %arg11[%c2_74, %c0_75, %c0_76], %144 {strides = array<i32>} : memref<4x8x8xf32, #tpu.memory_space<vmem>>, vector<1x8x8xf32>,
      %c2_77 = arith.constant 2 : index
      %c0_78 = arith.constant 0 : index
      %c0_79 = arith.constant 0 : index
      %145 = vector.load %arg9[%c2_77, %c0_78, %c0_79] : memref<4x8x1xf32, #tpu.memory_space<vmem>>, vector<1x8x1xf32>
      %146 = vector.shape_cast %145 : vector<1x8x1xf32> to vector<8x1xf32>
      %147 = vector.shape_cast %120 : vector<8x1xf32> to vector<1x8x1xf32>
      tpu.vector_store %arg9[%c2_77, %c0_78, %c0_79], %147 {strides = array<i32>} : memref<4x8x1xf32, #tpu.memory_space<vmem>>, vector<1x8x1xf32>,
      %148 = vector.extract_strided_slice %8 {offsets = [0, 24], sizes = [8, 8], strides = [1, 1]} : vector<8x32xbf16> to vector<8x8xbf16>
      %149 = vector.extract_strided_slice %10 {offsets = [0, 24], sizes = [8, 8], strides = [1, 1]} : vector<8x32xbf16> to vector<8x8xbf16>
      %150 = vector.extract_strided_slice %12 {offsets = [0, 24], sizes = [8, 8], strides = [1, 1]} : vector<8x32xbf16> to vector<8x8xbf16>
      %cst_80 = arith.constant dense<0.000000e+00> : vector<8x8xf32>
      %151 = tpu.matmul %148, %149, %cst_80 {dimension_numbers = #tpu.dot_dimension_numbers<[1], [1], [0], [0], [0, 0, 1, 0], [], []>} : vector<8x8xbf16>, vector<8x8xbf16>, vector<8x8xf32> -> vector<8x8xf32>
      %cst_81 = arith.constant 0.353553385 : f32
      %152 = vector.broadcast %cst_81 : f32 to vector<8x8xf32>
      %153 = arith.mulf %151, %152 : vector<8x8xf32>
      %154 = tpu.iota {dimensions = array<i32: 0>} : vector<8x8xi32>
      %155 = tpu.iota {dimensions = array<i32: 1>} : vector<8x8xi32>
      %156 = arith.cmpi sgt, %155, %154 : vector<8x8xi32>
      %cst_82 = arith.constant -1.000000e+30 : f32
      %157 = vector.broadcast %cst_82 : f32 to vector<8x8xf32>
      %158 = arith.select %156, %157, %153 : vector<8x8xi1>, vector<8x8xf32>
      %c3 = arith.constant 3 : index
      %c0_83 = arith.constant 0 : index
      %c0_84 = arith.constant 0 : index
      %159 = vector.load %arg9[%c3, %c0_83, %c0_84] : memref<4x8x1xf32, #tpu.memory_space<vmem>>, vector<1x8x1xf32>
      %160 = vector.shape_cast %159 : vector<1x8x1xf32> to vector<8x1xf32>
      %cst_85 = arith.constant dense<0xFF800000> : vector<8xf32>
      %161 = vector.multi_reduction <maximumf>, %158, %cst_85 [1] : vector<8x8xf32> to vector<8xf32>
      %162 = vector.shape_cast %161 : vector<8xf32> to vector<8x1xf32>
      %163 = arith.maximumf %160, %162 : vector<8x1xf32>
      %164 = arith.subf %160, %163 : vector<8x1xf32>
      %165 = math.exp %164 : vector<8x1xf32>
      %166 = vector.broadcast %163 : vector<8x1xf32> to vector<8x8xf32>
      %167 = arith.subf %158, %166 : vector<8x8xf32>
      %168 = math.exp %167 : vector<8x8xf32>
      %c3_86 = arith.constant 3 : index
      %c0_87 = arith.constant 0 : index
      %c0_88 = arith.constant 0 : index
      %169 = vector.load %arg10[%c3_86, %c0_87, %c0_88] : memref<4x8x1xf32, #tpu.memory_space<vmem>>, vector<1x8x1xf32>
      %170 = vector.shape_cast %169 : vector<1x8x1xf32> to vector<8x1xf32>
      %171 = arith.mulf %165, %170 : vector<8x1xf32>
      %cst_89 = arith.constant dense<0.000000e+00> : vector<8xf32>
      %172 = vector.multi_reduction <add>, %168, %cst_89 [1] : vector<8x8xf32> to vector<8xf32>
      %173 = vector.shape_cast %172 : vector<8xf32> to vector<8x1xf32>
      %174 = arith.addf %171, %173 : vector<8x1xf32>
      %c3_90 = arith.constant 3 : index
      %c0_91 = arith.constant 0 : index
      %c0_92 = arith.constant 0 : index
      %175 = vector.load %arg10[%c3_90, %c0_91, %c0_92] : memref<4x8x1xf32, #tpu.memory_space<vmem>>, vector<1x8x1xf32>
      %176 = vector.shape_cast %175 : vector<1x8x1xf32> to vector<8x1xf32>
      %177 = vector.shape_cast %174 : vector<8x1xf32> to vector<1x8x1xf32>
      tpu.vector_store %arg10[%c3_90, %c0_91, %c0_92], %177 {strides = array<i32>} : memref<4x8x1xf32, #tpu.memory_space<vmem>>, vector<1x8x1xf32>,
      %c3_93 = arith.constant 3 : index
      %c0_94 = arith.constant 0 : index
      %c0_95 = arith.constant 0 : index
      %178 = vector.load %arg11[%c3_93, %c0_94, %c0_95] : memref<4x8x8xf32, #tpu.memory_space<vmem>>, vector<1x8x8xf32>
      %179 = vector.shape_cast %178 : vector<1x8x8xf32> to vector<8x8xf32>
      %180 = vector.broadcast %165 : vector<8x1xf32> to vector<8x8xf32>
      %181 = arith.mulf %180, %179 : vector<8x8xf32>
      %182 = arith.truncf %168 : vector<8x8xf32> to vector<8x8xbf16>
      %cst_96 = arith.constant dense<0.000000e+00> : vector<8x8xf32>
      %183 = tpu.matmul %182, %150, %cst_96 {dimension_numbers = #tpu.dot_dimension_numbers<[1], [0], [0], [1], [0, 0, 1, 1], [], []>} : vector<8x8xbf16>, vector<8x8xbf16>, vector<8x8xf32> -> vector<8x8xf32>
      %184 = arith.addf %181, %183 : vector<8x8xf32>
      %c3_97 = arith.constant 3 : index
      %c0_98 = arith.constant 0 : index
      %c0_99 = arith.constant 0 : index
      %185 = vector.load %arg11[%c3_97, %c0_98, %c0_99] : memref<4x8x8xf32, #tpu.memory_space<vmem>>, vector<1x8x8xf32>
      %186 = vector.shape_cast %185 : vector<1x8x8xf32> to vector<8x8xf32>
      %187 = vector.shape_cast %184 : vector<8x8xf32> to vector<1x8x8xf32>
      tpu.vector_store %arg11[%c3_97, %c0_98, %c0_99], %187 {strides = array<i32>} : memref<4x8x8xf32, #tpu.memory_space<vmem>>, vector<1x8x8xf32>,
      %c3_100 = arith.constant 3 : index
      %c0_101 = arith.constant 0 : index
      %c0_102 = arith.constant 0 : index
      %188 = vector.load %arg9[%c3_100, %c0_101, %c0_102] : memref<4x8x1xf32, #tpu.memory_space<vmem>>, vector<1x8x1xf32>
      %189 = vector.shape_cast %188 : vector<1x8x1xf32> to vector<8x1xf32>
      %190 = vector.shape_cast %163 : vector<8x1xf32> to vector<1x8x1xf32>
      tpu.vector_store %arg9[%c3_100, %c0_101, %c0_102], %190 {strides = array<i32>} : memref<4x8x1xf32, #tpu.memory_space<vmem>>, vector<1x8x1xf32>,
      %c0_103 = arith.constant 0 : index
      %c0_104 = arith.constant 0 : index
      %c0_105 = arith.constant 0 : index
      %191 = vector.load %arg11[%c0_103, %c0_104, %c0_105] : memref<4x8x8xf32, #tpu.memory_space<vmem>>, vector<1x8x8xf32>
      %192 = vector.shape_cast %191 : vector<1x8x8xf32> to vector<8x8xf32>
      %c0_106 = arith.constant 0 : index
      %c0_107 = arith.constant 0 : index
      %c0_108 = arith.constant 0 : index
      %193 = vector.load %arg10[%c0_106, %c0_107, %c0_108] : memref<4x8x1xf32, #tpu.memory_space<vmem>>, vector<1x8x1xf32>
      %194 = vector.shape_cast %193 : vector<1x8x1xf32> to vector<8x1xf32>
      %195 = tpu.reciprocal %194 {approx = true} : vector<8x1xf32> -> vector<8x1xf32>
      %196 = vector.broadcast %195 : vector<8x1xf32> to vector<8x8xf32>
      %197 = arith.mulf %192, %196 : vector<8x8xf32>
      %c1_109 = arith.constant 1 : index
      %c0_110 = arith.constant 0 : index
      %c0_111 = arith.constant 0 : index
      %198 = vector.load %arg11[%c1_109, %c0_110, %c0_111] : memref<4x8x8xf32, #tpu.memory_space<vmem>>, vector<1x8x8xf32>
      %199 = vector.shape_cast %198 : vector<1x8x8xf32> to vector<8x8xf32>
      %c1_112 = arith.constant 1 : index
      %c0_113 = arith.constant 0 : index
      %c0_114 = arith.constant 0 : index
      %200 = vector.load %arg10[%c1_112, %c0_113, %c0_114] : memref<4x8x1xf32, #tpu.memory_space<vmem>>, vector<1x8x1xf32>
      %201 = vector.shape_cast %200 : vector<1x8x1xf32> to vector<8x1xf32>
      %202 = tpu.reciprocal %201 {approx = true} : vector<8x1xf32> -> vector<8x1xf32>
      %203 = vector.broadcast %202 : vector<8x1xf32> to vector<8x8xf32>
      %204 = arith.mulf %199, %203 : vector<8x8xf32>
      %c2_115 = arith.constant 2 : index
      %c0_116 = arith.constant 0 : index
      %c0_117 = arith.constant 0 : index
      %205 = vector.load %arg11[%c2_115, %c0_116, %c0_117] : memref<4x8x8xf32, #tpu.memory_space<vmem>>, vector<1x8x8xf32>
      %206 = vector.shape_cast %205 : vector<1x8x8xf32> to vector<8x8xf32>
      %c2_118 = arith.constant 2 : index
      %c0_119 = arith.constant 0 : index
      %c0_120 = arith.constant 0 : index
      %207 = vector.load %arg10[%c2_118, %c0_119, %c0_120] : memref<4x8x1xf32, #tpu.memory_space<vmem>>, vector<1x8x1xf32>
      %208 = vector.shape_cast %207 : vector<1x8x1xf32> to vector<8x1xf32>
      %209 = tpu.reciprocal %208 {approx = true} : vector<8x1xf32> -> vector<8x1xf32>
      %210 = vector.broadcast %209 : vector<8x1xf32> to vector<8x8xf32>
      %211 = arith.mulf %206, %210 : vector<8x8xf32>
      %c3_121 = arith.constant 3 : index
      %c0_122 = arith.constant 0 : index
      %c0_123 = arith.constant 0 : index
      %212 = vector.load %arg11[%c3_121, %c0_122, %c0_123] : memref<4x8x8xf32, #tpu.memory_space<vmem>>, vector<1x8x8xf32>
      %213 = vector.shape_cast %212 : vector<1x8x8xf32> to vector<8x8xf32>
      %c3_124 = arith.constant 3 : index
      %c0_125 = arith.constant 0 : index
      %c0_126 = arith.constant 0 : index
      %214 = vector.load %arg10[%c3_124, %c0_125, %c0_126] : memref<4x8x1xf32, #tpu.memory_space<vmem>>, vector<1x8x1xf32>
      %215 = vector.shape_cast %214 : vector<1x8x1xf32> to vector<8x1xf32>
      %216 = tpu.reciprocal %215 {approx = true} : vector<8x1xf32> -> vector<8x1xf32>
      %217 = vector.broadcast %216 : vector<8x1xf32> to vector<8x8xf32>
      %218 = arith.mulf %213, %217 : vector<8x8xf32>
      %219 = tpu.concatenate %197, %204, %211, %218 in 1 : vector<8x8xf32>, vector<8x8xf32>, vector<8x8xf32>, vector<8x8xf32> -> vector<8x32xf32>
      %220 = arith.truncf %219 : vector<8x32xf32> to vector<8x32xbf16>
      %c0_127 = arith.constant 0 : index
      %c0_128 = arith.constant 0 : index
      %c0_129 = arith.constant 0 : index
      %221 = vector.load %arg8[%c0_127, %c0_128, %c0_129] : memref<1x8x32xbf16, #tpu.memory_space<vmem>>, vector<1x8x32xbf16>
      %222 = vector.shape_cast %221 : vector<1x8x32xbf16> to vector<8x32xbf16>
      %223 = vector.shape_cast %220 : vector<8x32xbf16> to vector<1x8x32xbf16>
      tpu.vector_store %arg8[%c0_127, %c0_128, %c0_129], %223 {strides = array<i32>} : memref<1x8x32xbf16, #tpu.memory_space<vmem>>, vector<1x8x32xbf16>,
    } else {
    }
    return
  }
  func.func @transform_0(%arg0: i32, %arg1: i32, %arg2: i32, %arg3: memref<3xi32, #tpu.memory_space<smem>>, %arg4: memref<3xi32, #tpu.memory_space<smem>>) -> (i32, i32, i32) {
    %0 = arith.index_cast %arg2 : i32 to index
    %1 = memref.load %arg3[%0] : memref<3xi32, #tpu.memory_space<smem>>
    %c0_i32 = arith.constant 0 : i32
    return %arg0, %1, %arg1 : i32, i32, i32
  }
  func.func @transform_1(%arg0: i32, %arg1: i32, %arg2: i32, %arg3: memref<3xi32, #tpu.memory_space<smem>>, %arg4: memref<3xi32, #tpu.memory_space<smem>>) -> (i32, i32, i32) {
    %0 = arith.index_cast %arg2 : i32 to index
    %1 = memref.load %arg4[%0] : memref<3xi32, #tpu.memory_space<smem>>
    %c0_i32 = arith.constant 0 : i32
    return %arg0, %1, %arg1 : i32, i32, i32
  }
  func.func @transform_2(%arg0: i32, %arg1: i32, %arg2: i32, %arg3: memref<3xi32, #tpu.memory_space<smem>>, %arg4: memref<3xi32, #tpu.memory_space<smem>>) -> (i32, i32, i32) {
    %0 = arith.index_cast %arg2 : i32 to index
    %1 = memref.load %arg4[%0] : memref<3xi32, #tpu.memory_space<smem>>
    %c0_i32 = arith.constant 0 : i32
    return %arg0, %1, %arg1 : i32, i32, i32
  }
  func.func @transform_3(%arg0: i32, %arg1: i32, %arg2: i32, %arg3: memref<3xi32, #tpu.memory_space<smem>>, %arg4: memref<3xi32, #tpu.memory_space<smem>>) -> (i32, i32, i32) {
    %0 = arith.index_cast %arg2 : i32 to index
    %1 = memref.load %arg3[%0] : memref<3xi32, #tpu.memory_space<smem>>
    %c0_i32 = arith.constant 0 : i32
    return %arg0, %1, %arg1 : i32, i32, i32
  }
}

module attributes {stable_mosaic.version = 11 : i64} {
  func.func @_proj_mlp_kernel(%arg0: i32, %arg1: i32, %arg2: memref<1x8x32xbf16, #tpu.memory_space<vmem>>, %arg3: memref<1x8x32xbf16, #tpu.memory_space<vmem>>, %arg4: memref<32x32xbf16, #tpu.memory_space<vmem>>, %arg5: memref<1x32xf32, #tpu.memory_space<vmem>>, %arg6: memref<1x32xf32, #tpu.memory_space<vmem>>, %arg7: memref<1x32xf32, #tpu.memory_space<vmem>>, %arg8: memref<32x128xbf16, #tpu.memory_space<vmem>>, %arg9: memref<1x128xf32, #tpu.memory_space<vmem>>, %arg10: memref<128x32xbf16, #tpu.memory_space<vmem>>, %arg11: memref<1x32xf32, #tpu.memory_space<vmem>>, %arg12: memref<1x32xf32, #tpu.memory_space<vmem>>, %arg13: memref<1x32xf32, #tpu.memory_space<vmem>>, %arg14: memref<1x8x32xbf16, #tpu.memory_space<vmem>>) attributes {dimension_semantics = [#tpu.dimension_semantics<parallel>, #tpu.dimension_semantics<parallel>], iteration_bounds = array<i64: 2, 2>, scalar_prefetch = 0 : i64, scratch_operands = 0 : i64, tpu.core_type = #tpu.core_type<tc>, window_params = [{transform_indices = @transform_0, window_bounds = array<i64: 1, 8, 32>}, {transform_indices = @transform_1, window_bounds = array<i64: 1, 8, 32>}, {pipeline_mode = #tpu.pipeline_mode<synchronous>, transform_indices = @transform_2, window_bounds = array<i64: 32, 32>}, {pipeline_mode = #tpu.pipeline_mode<synchronous>, transform_indices = @transform_3, window_bounds = array<i64: 1, 32>}, {pipeline_mode = #tpu.pipeline_mode<synchronous>, transform_indices = @transform_4, window_bounds = array<i64: 1, 32>}, {pipeline_mode = #tpu.pipeline_mode<synchronous>, transform_indices = @transform_5, window_bounds = array<i64: 1, 32>}, {pipeline_mode = #tpu.pipeline_mode<synchronous>, transform_indices = @transform_6, window_bounds = array<i64: 32, 128>}, {pipeline_mode = #tpu.pipeline_mode<synchronous>, transform_indices = @transform_7, window_bounds = array<i64: 1, 128>}, {pipeline_mode = #tpu.pipeline_mode<synchronous>, transform_indices = @transform_8, window_bounds = array<i64: 128, 32>}, {pipeline_mode = #tpu.pipeline_mode<synchronous>, transform_indices = @transform_9, window_bounds = array<i64: 1, 32>}, {pipeline_mode = #tpu.pipeline_mode<synchronous>, transform_indices = @transform_10, window_bounds = array<i64: 1, 32>}, {pipeline_mode = #tpu.pipeline_mode<synchronous>, transform_indices = @transform_11, window_bounds = array<i64: 1, 32>}, {transform_indices = @transform_12, window_bounds = array<i64: 1, 8, 32>}]} {
    %c0 = arith.constant 0 : index
    %c0_0 = arith.constant 0 : index
    %c0_1 = arith.constant 0 : index
    %0 = vector.load %arg2[%c0, %c0_0, %c0_1] : memref<1x8x32xbf16, #tpu.memory_space<vmem>>, vector<1x8x32xbf16>
    %1 = vector.shape_cast %0 : vector<1x8x32xbf16> to vector<8x32xbf16>
    %2 = arith.extf %1 : vector<8x32xbf16> to vector<8x32xf32>
    %c0_2 = arith.constant 0 : index
    %c0_3 = arith.constant 0 : index
    %c0_4 = arith.constant 0 : index
    %3 = vector.load %arg3[%c0_2, %c0_3, %c0_4] : memref<1x8x32xbf16, #tpu.memory_space<vmem>>, vector<1x8x32xbf16>
    %4 = vector.shape_cast %3 : vector<1x8x32xbf16> to vector<8x32xbf16>
    %c0_5 = arith.constant 0 : index
    %c0_6 = arith.constant 0 : index
    %5 = vector.load %arg4[%c0_5, %c0_6] : memref<32x32xbf16, #tpu.memory_space<vmem>>, vector<32x32xbf16>
    %cst = arith.constant dense<0.000000e+00> : vector<8x32xf32>
    %6 = tpu.matmul %4, %5, %cst {dimension_numbers = #tpu.dot_dimension_numbers<[1], [0], [0], [1], [0, 0, 1, 1], [], []>} : vector<8x32xbf16>, vector<32x32xbf16>, vector<8x32xf32> -> vector<8x32xf32>
    %c0_7 = arith.constant 0 : index
    %c0_8 = arith.constant 0 : index
    %7 = vector.load %arg5[%c0_7, %c0_8] : memref<1x32xf32, #tpu.memory_space<vmem>>, vector<1x32xf32>
    %8 = vector.broadcast %7 : vector<1x32xf32> to vector<8x32xf32>
    %9 = arith.addf %6, %8 : vector<8x32xf32>
    %10 = arith.addf %2, %9 : vector<8x32xf32>
    %c0_9 = arith.constant 0 : index
    %c0_10 = arith.constant 0 : index
    %11 = vector.load %arg6[%c0_9, %c0_10] : memref<1x32xf32, #tpu.memory_space<vmem>>, vector<1x32xf32>
    %c0_11 = arith.constant 0 : index
    %c0_12 = arith.constant 0 : index
    %12 = vector.load %arg7[%c0_11, %c0_12] : memref<1x32xf32, #tpu.memory_space<vmem>>, vector<1x32xf32>
    %cst_13 = arith.constant dense<0.000000e+00> : vector<8xf32>
    %13 = vector.multi_reduction <add>, %10, %cst_13 [1] : vector<8x32xf32> to vector<8xf32>
    %14 = vector.shape_cast %13 : vector<8xf32> to vector<8x1xf32>
    %cst_14 = arith.constant 3.200000e+01 : f32
    %15 = vector.broadcast %cst_14 : f32 to vector<8x1xf32>
    %16 = arith.divf %14, %15 : vector<8x1xf32>
    %17 = vector.broadcast %16 : vector<8x1xf32> to vector<8x32xf32>
    %18 = arith.subf %10, %17 : vector<8x32xf32>
    %19 = arith.mulf %18, %18 : vector<8x32xf32>
    %cst_15 = arith.constant dense<0.000000e+00> : vector<8xf32>
    %20 = vector.multi_reduction <add>, %19, %cst_15 [1] : vector<8x32xf32> to vector<8xf32>
    %21 = vector.shape_cast %20 : vector<8xf32> to vector<8x1xf32>
    %cst_16 = arith.constant 3.200000e+01 : f32
    %22 = vector.broadcast %cst_16 : f32 to vector<8x1xf32>
    %23 = arith.divf %21, %22 : vector<8x1xf32>
    %24 = vector.broadcast %16 : vector<8x1xf32> to vector<8x32xf32>
    %25 = arith.subf %10, %24 : vector<8x32xf32>
    %cst_17 = arith.constant 9.99999974E-6 : f32
    %26 = vector.broadcast %cst_17 : f32 to vector<8x1xf32>
    %27 = arith.addf %23, %26 : vector<8x1xf32>
    %28 = math.rsqrt %27 : vector<8x1xf32>
    %29 = vector.broadcast %28 : vector<8x1xf32> to vector<8x32xf32>
    %30 = arith.mulf %25, %29 : vector<8x32xf32>
    %31 = vector.broadcast %11 : vector<1x32xf32> to vector<8x32xf32>
    %32 = arith.mulf %31, %30 : vector<8x32xf32>
    %33 = vector.broadcast %12 : vector<1x32xf32> to vector<8x32xf32>
    %34 = arith.addf %32, %33 : vector<8x32xf32>
    %35 = arith.truncf %34 : vector<8x32xf32> to vector<8x32xbf16>
    %c0_18 = arith.constant 0 : index
    %c0_19 = arith.constant 0 : index
    %36 = vector.load %arg8[%c0_18, %c0_19] : memref<32x128xbf16, #tpu.memory_space<vmem>>, vector<32x128xbf16>
    %cst_20 = arith.constant dense<0.000000e+00> : vector<8x128xf32>
    %37 = tpu.matmul %35, %36, %cst_20 {dimension_numbers = #tpu.dot_dimension_numbers<[1], [0], [0], [1], [0, 0, 1, 1], [], []>} : vector<8x32xbf16>, vector<32x128xbf16>, vector<8x128xf32> -> vector<8x128xf32>
    %c0_21 = arith.constant 0 : index
    %c0_22 = arith.constant 0 : index
    %38 = vector.load %arg9[%c0_21, %c0_22] : memref<1x128xf32, #tpu.memory_space<vmem>>, vector<1x128xf32>
    %39 = vector.broadcast %38 : vector<1x128xf32> to vector<8x128xf32>
    %40 = arith.addf %37, %39 : vector<8x128xf32>
    %cst_23 = arith.constant 5.000000e-01 : f32
    %41 = vector.broadcast %cst_23 : f32 to vector<8x128xf32>
    %42 = arith.mulf %41, %40 : vector<8x128xf32>
    %cst_24 = arith.constant 4.471500e-02 : f32
    %43 = vector.broadcast %cst_24 : f32 to vector<8x128xf32>
    %44 = arith.mulf %43, %40 : vector<8x128xf32>
    %45 = arith.mulf %44, %40 : vector<8x128xf32>
    %46 = arith.mulf %45, %40 : vector<8x128xf32>
    %47 = arith.addf %40, %46 : vector<8x128xf32>
    %cst_25 = arith.constant 0.797884583 : f32
    %48 = vector.broadcast %cst_25 : f32 to vector<8x128xf32>
    %49 = arith.mulf %48, %47 : vector<8x128xf32>
    %50 = math.tanh %49 : vector<8x128xf32>
    %cst_26 = arith.constant 1.000000e+00 : f32
    %51 = vector.broadcast %cst_26 : f32 to vector<8x128xf32>
    %52 = arith.addf %51, %50 : vector<8x128xf32>
    %53 = arith.mulf %42, %52 : vector<8x128xf32>
    %54 = arith.truncf %53 : vector<8x128xf32> to vector<8x128xbf16>
    %c0_27 = arith.constant 0 : index
    %c0_28 = arith.constant 0 : index
    %55 = vector.load %arg10[%c0_27, %c0_28] : memref<128x32xbf16, #tpu.memory_space<vmem>>, vector<128x32xbf16>
    %cst_29 = arith.constant dense<0.000000e+00> : vector<8x32xf32>
    %56 = tpu.matmul %54, %55, %cst_29 {dimension_numbers = #tpu.dot_dimension_numbers<[1], [0], [0], [1], [0, 0, 1, 1], [], []>} : vector<8x128xbf16>, vector<128x32xbf16>, vector<8x32xf32> -> vector<8x32xf32>
    %c0_30 = arith.constant 0 : index
    %c0_31 = arith.constant 0 : index
    %57 = vector.load %arg11[%c0_30, %c0_31] : memref<1x32xf32, #tpu.memory_space<vmem>>, vector<1x32xf32>
    %58 = vector.broadcast %57 : vector<1x32xf32> to vector<8x32xf32>
    %59 = arith.addf %56, %58 : vector<8x32xf32>
    %60 = arith.addf %10, %59 : vector<8x32xf32>
    %61 = arith.truncf %60 : vector<8x32xf32> to vector<8x32xbf16>
    %c0_32 = arith.constant 0 : index
    %c0_33 = arith.constant 0 : index
    %c0_34 = arith.constant 0 : index
    %62 = vector.load %arg14[%c0_32, %c0_33, %c0_34] : memref<1x8x32xbf16, #tpu.memory_space<vmem>>, vector<1x8x32xbf16>
    %63 = vector.shape_cast %62 : vector<1x8x32xbf16> to vector<8x32xbf16>
    %64 = vector.shape_cast %61 : vector<8x32xbf16> to vector<1x8x32xbf16>
    tpu.vector_store %arg14[%c0_32, %c0_33, %c0_34], %64 {strides = array<i32>} : memref<1x8x32xbf16, #tpu.memory_space<vmem>>, vector<1x8x32xbf16>,
    return
  }
  func.func @transform_0(%arg0: i32, %arg1: i32) -> (i32, i32, i32) {
    %c0_i32 = arith.constant 0 : i32
    %c0_i32_0 = arith.constant 0 : i32
    return %arg0, %arg1, %c0_i32 : i32, i32, i32
  }
  func.func @transform_1(%arg0: i32, %arg1: i32) -> (i32, i32, i32) {
    %c0_i32 = arith.constant 0 : i32
    %c0_i32_0 = arith.constant 0 : i32
    return %arg0, %arg1, %c0_i32 : i32, i32, i32
  }
  func.func @transform_2(%arg0: i32, %arg1: i32) -> (i32, i32) {
    %c0_i32 = arith.constant 0 : i32
    %c0_i32_0 = arith.constant 0 : i32
    %c0_i32_1 = arith.constant 0 : i32
    return %c0_i32, %c0_i32_0 : i32, i32
  }
  func.func @transform_3(%arg0: i32, %arg1: i32) -> (i32, i32) {
    %c0_i32 = arith.constant 0 : i32
    %c0_i32_0 = arith.constant 0 : i32
    %c0_i32_1 = arith.constant 0 : i32
    return %c0_i32, %c0_i32_0 : i32, i32
  }
  func.func @transform_4(%arg0: i32, %arg1: i32) -> (i32, i32) {
    %c0_i32 = arith.constant 0 : i32
    %c0_i32_0 = arith.constant 0 : i32
    %c0_i32_1 = arith.constant 0 : i32
    return %c0_i32, %c0_i32_0 : i32, i32
  }
  func.func @transform_5(%arg0: i32, %arg1: i32) -> (i32, i32) {
    %c0_i32 = arith.constant 0 : i32
    %c0_i32_0 = arith.constant 0 : i32
    %c0_i32_1 = arith.constant 0 : i32
    return %c0_i32, %c0_i32_0 : i32, i32
  }
  func.func @transform_6(%arg0: i32, %arg1: i32) -> (i32, i32) {
    %c0_i32 = arith.constant 0 : i32
    %c0_i32_0 = arith.constant 0 : i32
    %c0_i32_1 = arith.constant 0 : i32
    return %c0_i32, %c0_i32_0 : i32, i32
  }
  func.func @transform_7(%arg0: i32, %arg1: i32) -> (i32, i32) {
    %c0_i32 = arith.constant 0 : i32
    %c0_i32_0 = arith.constant 0 : i32
    %c0_i32_1 = arith.constant 0 : i32
    return %c0_i32, %c0_i32_0 : i32, i32
  }
  func.func @transform_8(%arg0: i32, %arg1: i32) -> (i32, i32) {
    %c0_i32 = arith.constant 0 : i32
    %c0_i32_0 = arith.constant 0 : i32
    %c0_i32_1 = arith.constant 0 : i32
    return %c0_i32, %c0_i32_0 : i32, i32
  }
  func.func @transform_9(%arg0: i32, %arg1: i32) -> (i32, i32) {
    %c0_i32 = arith.constant 0 : i32
    %c0_i32_0 = arith.constant 0 : i32
    %c0_i32_1 = arith.constant 0 : i32
    return %c0_i32, %c0_i32_0 : i32, i32
  }
  func.func @transform_10(%arg0: i32, %arg1: i32) -> (i32, i32) {
    %c0_i32 = arith.constant 0 : i32
    %c0_i32_0 = arith.constant 0 : i32
    %c0_i32_1 = arith.constant 0 : i32
    return %c0_i32, %c0_i32_0 : i32, i32
  }
  func.func @transform_11(%arg0: i32, %arg1: i32) -> (i32, i32) {
    %c0_i32 = arith.constant 0 : i32
    %c0_i32_0 = arith.constant 0 : i32
    %c0_i32_1 = arith.constant 0 : i32
    return %c0_i32, %c0_i32_0 : i32, i32
  }
  func.func @transform_12(%arg0: i32, %arg1: i32) -> (i32, i32, i32) {
    %c0_i32 = arith.constant 0 : i32
    %c0_i32_0 = arith.constant 0 : i32
    return %arg0, %arg1, %c0_i32 : i32, i32, i32
  }
}

module attributes {stable_mosaic.version = 11 : i64} {
  func.func @_proj_mlp_kernel(%arg0: i32, %arg1: i32, %arg2: memref<1x8x32xbf16, #tpu.memory_space<vmem>>, %arg3: memref<1x8x32xbf16, #tpu.memory_space<vmem>>, %arg4: memref<32x32xbf16, #tpu.memory_space<vmem>>, %arg5: memref<1x32xf32, #tpu.memory_space<vmem>>, %arg6: memref<1x32xf32, #tpu.memory_space<vmem>>, %arg7: memref<1x32xf32, #tpu.memory_space<vmem>>, %arg8: memref<32x128xbf16, #tpu.memory_space<vmem>>, %arg9: memref<1x128xf32, #tpu.memory_space<vmem>>, %arg10: memref<128x32xbf16, #tpu.memory_space<vmem>>, %arg11: memref<1x32xf32, #tpu.memory_space<vmem>>, %arg12: memref<1x32xf32, #tpu.memory_space<vmem>>, %arg13: memref<1x32xf32, #tpu.memory_space<vmem>>, %arg14: memref<1x8x32xbf16, #tpu.memory_space<vmem>>) attributes {dimension_semantics = [#tpu.dimension_semantics<parallel>, #tpu.dimension_semantics<parallel>], iteration_bounds = array<i64: 2, 2>, scalar_prefetch = 0 : i64, scratch_operands = 0 : i64, tpu.core_type = #tpu.core_type<tc>, window_params = [{transform_indices = @transform_0, window_bounds = array<i64: 1, 8, 32>}, {transform_indices = @transform_1, window_bounds = array<i64: 1, 8, 32>}, {pipeline_mode = #tpu.pipeline_mode<synchronous>, transform_indices = @transform_2, window_bounds = array<i64: 32, 32>}, {pipeline_mode = #tpu.pipeline_mode<synchronous>, transform_indices = @transform_3, window_bounds = array<i64: 1, 32>}, {pipeline_mode = #tpu.pipeline_mode<synchronous>, transform_indices = @transform_4, window_bounds = array<i64: 1, 32>}, {pipeline_mode = #tpu.pipeline_mode<synchronous>, transform_indices = @transform_5, window_bounds = array<i64: 1, 32>}, {pipeline_mode = #tpu.pipeline_mode<synchronous>, transform_indices = @transform_6, window_bounds = array<i64: 32, 128>}, {pipeline_mode = #tpu.pipeline_mode<synchronous>, transform_indices = @transform_7, window_bounds = array<i64: 1, 128>}, {pipeline_mode = #tpu.pipeline_mode<synchronous>, transform_indices = @transform_8, window_bounds = array<i64: 128, 32>}, {pipeline_mode = #tpu.pipeline_mode<synchronous>, transform_indices = @transform_9, window_bounds = array<i64: 1, 32>}, {pipeline_mode = #tpu.pipeline_mode<synchronous>, transform_indices = @transform_10, window_bounds = array<i64: 1, 32>}, {pipeline_mode = #tpu.pipeline_mode<synchronous>, transform_indices = @transform_11, window_bounds = array<i64: 1, 32>}, {transform_indices = @transform_12, window_bounds = array<i64: 1, 8, 32>}]} {
    %c0 = arith.constant 0 : index
    %c0_0 = arith.constant 0 : index
    %c0_1 = arith.constant 0 : index
    %0 = vector.load %arg2[%c0, %c0_0, %c0_1] : memref<1x8x32xbf16, #tpu.memory_space<vmem>>, vector<1x8x32xbf16>
    %1 = vector.shape_cast %0 : vector<1x8x32xbf16> to vector<8x32xbf16>
    %2 = arith.extf %1 : vector<8x32xbf16> to vector<8x32xf32>
    %c0_2 = arith.constant 0 : index
    %c0_3 = arith.constant 0 : index
    %c0_4 = arith.constant 0 : index
    %3 = vector.load %arg3[%c0_2, %c0_3, %c0_4] : memref<1x8x32xbf16, #tpu.memory_space<vmem>>, vector<1x8x32xbf16>
    %4 = vector.shape_cast %3 : vector<1x8x32xbf16> to vector<8x32xbf16>
    %c0_5 = arith.constant 0 : index
    %c0_6 = arith.constant 0 : index
    %5 = vector.load %arg4[%c0_5, %c0_6] : memref<32x32xbf16, #tpu.memory_space<vmem>>, vector<32x32xbf16>
    %cst = arith.constant dense<0.000000e+00> : vector<8x32xf32>
    %6 = tpu.matmul %4, %5, %cst {dimension_numbers = #tpu.dot_dimension_numbers<[1], [0], [0], [1], [0, 0, 1, 1], [], []>} : vector<8x32xbf16>, vector<32x32xbf16>, vector<8x32xf32> -> vector<8x32xf32>
    %c0_7 = arith.constant 0 : index
    %c0_8 = arith.constant 0 : index
    %7 = vector.load %arg5[%c0_7, %c0_8] : memref<1x32xf32, #tpu.memory_space<vmem>>, vector<1x32xf32>
    %8 = vector.broadcast %7 : vector<1x32xf32> to vector<8x32xf32>
    %9 = arith.addf %6, %8 : vector<8x32xf32>
    %10 = arith.addf %2, %9 : vector<8x32xf32>
    %c0_9 = arith.constant 0 : index
    %c0_10 = arith.constant 0 : index
    %11 = vector.load %arg6[%c0_9, %c0_10] : memref<1x32xf32, #tpu.memory_space<vmem>>, vector<1x32xf32>
    %c0_11 = arith.constant 0 : index
    %c0_12 = arith.constant 0 : index
    %12 = vector.load %arg7[%c0_11, %c0_12] : memref<1x32xf32, #tpu.memory_space<vmem>>, vector<1x32xf32>
    %cst_13 = arith.constant dense<0.000000e+00> : vector<8xf32>
    %13 = vector.multi_reduction <add>, %10, %cst_13 [1] : vector<8x32xf32> to vector<8xf32>
    %14 = vector.shape_cast %13 : vector<8xf32> to vector<8x1xf32>
    %cst_14 = arith.constant 3.200000e+01 : f32
    %15 = vector.broadcast %cst_14 : f32 to vector<8x1xf32>
    %16 = arith.divf %14, %15 : vector<8x1xf32>
    %17 = vector.broadcast %16 : vector<8x1xf32> to vector<8x32xf32>
    %18 = arith.subf %10, %17 : vector<8x32xf32>
    %19 = arith.mulf %18, %18 : vector<8x32xf32>
    %cst_15 = arith.constant dense<0.000000e+00> : vector<8xf32>
    %20 = vector.multi_reduction <add>, %19, %cst_15 [1] : vector<8x32xf32> to vector<8xf32>
    %21 = vector.shape_cast %20 : vector<8xf32> to vector<8x1xf32>
    %cst_16 = arith.constant 3.200000e+01 : f32
    %22 = vector.broadcast %cst_16 : f32 to vector<8x1xf32>
    %23 = arith.divf %21, %22 : vector<8x1xf32>
    %24 = vector.broadcast %16 : vector<8x1xf32> to vector<8x32xf32>
    %25 = arith.subf %10, %24 : vector<8x32xf32>
    %cst_17 = arith.constant 9.99999974E-6 : f32
    %26 = vector.broadcast %cst_17 : f32 to vector<8x1xf32>
    %27 = arith.addf %23, %26 : vector<8x1xf32>
    %28 = math.rsqrt %27 : vector<8x1xf32>
    %29 = vector.broadcast %28 : vector<8x1xf32> to vector<8x32xf32>
    %30 = arith.mulf %25, %29 : vector<8x32xf32>
    %31 = vector.broadcast %11 : vector<1x32xf32> to vector<8x32xf32>
    %32 = arith.mulf %31, %30 : vector<8x32xf32>
    %33 = vector.broadcast %12 : vector<1x32xf32> to vector<8x32xf32>
    %34 = arith.addf %32, %33 : vector<8x32xf32>
    %35 = arith.truncf %34 : vector<8x32xf32> to vector<8x32xbf16>
    %c0_18 = arith.constant 0 : index
    %c0_19 = arith.constant 0 : index
    %36 = vector.load %arg8[%c0_18, %c0_19] : memref<32x128xbf16, #tpu.memory_space<vmem>>, vector<32x128xbf16>
    %cst_20 = arith.constant dense<0.000000e+00> : vector<8x128xf32>
    %37 = tpu.matmul %35, %36, %cst_20 {dimension_numbers = #tpu.dot_dimension_numbers<[1], [0], [0], [1], [0, 0, 1, 1], [], []>} : vector<8x32xbf16>, vector<32x128xbf16>, vector<8x128xf32> -> vector<8x128xf32>
    %c0_21 = arith.constant 0 : index
    %c0_22 = arith.constant 0 : index
    %38 = vector.load %arg9[%c0_21, %c0_22] : memref<1x128xf32, #tpu.memory_space<vmem>>, vector<1x128xf32>
    %39 = vector.broadcast %38 : vector<1x128xf32> to vector<8x128xf32>
    %40 = arith.addf %37, %39 : vector<8x128xf32>
    %cst_23 = arith.constant 5.000000e-01 : f32
    %41 = vector.broadcast %cst_23 : f32 to vector<8x128xf32>
    %42 = arith.mulf %41, %40 : vector<8x128xf32>
    %cst_24 = arith.constant 4.471500e-02 : f32
    %43 = vector.broadcast %cst_24 : f32 to vector<8x128xf32>
    %44 = arith.mulf %43, %40 : vector<8x128xf32>
    %45 = arith.mulf %44, %40 : vector<8x128xf32>
    %46 = arith.mulf %45, %40 : vector<8x128xf32>
    %47 = arith.addf %40, %46 : vector<8x128xf32>
    %cst_25 = arith.constant 0.797884583 : f32
    %48 = vector.broadcast %cst_25 : f32 to vector<8x128xf32>
    %49 = arith.mulf %48, %47 : vector<8x128xf32>
    %50 = math.tanh %49 : vector<8x128xf32>
    %cst_26 = arith.constant 1.000000e+00 : f32
    %51 = vector.broadcast %cst_26 : f32 to vector<8x128xf32>
    %52 = arith.addf %51, %50 : vector<8x128xf32>
    %53 = arith.mulf %42, %52 : vector<8x128xf32>
    %54 = arith.truncf %53 : vector<8x128xf32> to vector<8x128xbf16>
    %c0_27 = arith.constant 0 : index
    %c0_28 = arith.constant 0 : index
    %55 = vector.load %arg10[%c0_27, %c0_28] : memref<128x32xbf16, #tpu.memory_space<vmem>>, vector<128x32xbf16>
    %cst_29 = arith.constant dense<0.000000e+00> : vector<8x32xf32>
    %56 = tpu.matmul %54, %55, %cst_29 {dimension_numbers = #tpu.dot_dimension_numbers<[1], [0], [0], [1], [0, 0, 1, 1], [], []>} : vector<8x128xbf16>, vector<128x32xbf16>, vector<8x32xf32> -> vector<8x32xf32>
    %c0_30 = arith.constant 0 : index
    %c0_31 = arith.constant 0 : index
    %57 = vector.load %arg11[%c0_30, %c0_31] : memref<1x32xf32, #tpu.memory_space<vmem>>, vector<1x32xf32>
    %58 = vector.broadcast %57 : vector<1x32xf32> to vector<8x32xf32>
    %59 = arith.addf %56, %58 : vector<8x32xf32>
    %60 = arith.addf %10, %59 : vector<8x32xf32>
    %c0_32 = arith.constant 0 : index
    %c0_33 = arith.constant 0 : index
    %61 = vector.load %arg12[%c0_32, %c0_33] : memref<1x32xf32, #tpu.memory_space<vmem>>, vector<1x32xf32>
    %c0_34 = arith.constant 0 : index
    %c0_35 = arith.constant 0 : index
    %62 = vector.load %arg13[%c0_34, %c0_35] : memref<1x32xf32, #tpu.memory_space<vmem>>, vector<1x32xf32>
    %cst_36 = arith.constant dense<0.000000e+00> : vector<8xf32>
    %63 = vector.multi_reduction <add>, %60, %cst_36 [1] : vector<8x32xf32> to vector<8xf32>
    %64 = vector.shape_cast %63 : vector<8xf32> to vector<8x1xf32>
    %cst_37 = arith.constant 3.200000e+01 : f32
    %65 = vector.broadcast %cst_37 : f32 to vector<8x1xf32>
    %66 = arith.divf %64, %65 : vector<8x1xf32>
    %67 = vector.broadcast %66 : vector<8x1xf32> to vector<8x32xf32>
    %68 = arith.subf %60, %67 : vector<8x32xf32>
    %69 = arith.mulf %68, %68 : vector<8x32xf32>
    %cst_38 = arith.constant dense<0.000000e+00> : vector<8xf32>
    %70 = vector.multi_reduction <add>, %69, %cst_38 [1] : vector<8x32xf32> to vector<8xf32>
    %71 = vector.shape_cast %70 : vector<8xf32> to vector<8x1xf32>
    %cst_39 = arith.constant 3.200000e+01 : f32
    %72 = vector.broadcast %cst_39 : f32 to vector<8x1xf32>
    %73 = arith.divf %71, %72 : vector<8x1xf32>
    %74 = vector.broadcast %66 : vector<8x1xf32> to vector<8x32xf32>
    %75 = arith.subf %60, %74 : vector<8x32xf32>
    %cst_40 = arith.constant 9.99999974E-6 : f32
    %76 = vector.broadcast %cst_40 : f32 to vector<8x1xf32>
    %77 = arith.addf %73, %76 : vector<8x1xf32>
    %78 = math.rsqrt %77 : vector<8x1xf32>
    %79 = vector.broadcast %78 : vector<8x1xf32> to vector<8x32xf32>
    %80 = arith.mulf %75, %79 : vector<8x32xf32>
    %81 = vector.broadcast %61 : vector<1x32xf32> to vector<8x32xf32>
    %82 = arith.mulf %81, %80 : vector<8x32xf32>
    %83 = vector.broadcast %62 : vector<1x32xf32> to vector<8x32xf32>
    %84 = arith.addf %82, %83 : vector<8x32xf32>
    %85 = arith.truncf %84 : vector<8x32xf32> to vector<8x32xbf16>
    %c0_41 = arith.constant 0 : index
    %c0_42 = arith.constant 0 : index
    %c0_43 = arith.constant 0 : index
    %86 = vector.load %arg14[%c0_41, %c0_42, %c0_43] : memref<1x8x32xbf16, #tpu.memory_space<vmem>>, vector<1x8x32xbf16>
    %87 = vector.shape_cast %86 : vector<1x8x32xbf16> to vector<8x32xbf16>
    %88 = vector.shape_cast %85 : vector<8x32xbf16> to vector<1x8x32xbf16>
    tpu.vector_store %arg14[%c0_41, %c0_42, %c0_43], %88 {strides = array<i32>} : memref<1x8x32xbf16, #tpu.memory_space<vmem>>, vector<1x8x32xbf16>,
    return
  }
  func.func @transform_0(%arg0: i32, %arg1: i32) -> (i32, i32, i32) {
    %c0_i32 = arith.constant 0 : i32
    %c0_i32_0 = arith.constant 0 : i32
    return %arg0, %arg1, %c0_i32 : i32, i32, i32
  }
  func.func @transform_1(%arg0: i32, %arg1: i32) -> (i32, i32, i32) {
    %c0_i32 = arith.constant 0 : i32
    %c0_i32_0 = arith.constant 0 : i32
    return %arg0, %arg1, %c0_i32 : i32, i32, i32
  }
  func.func @transform_2(%arg0: i32, %arg1: i32) -> (i32, i32) {
    %c0_i32 = arith.constant 0 : i32
    %c0_i32_0 = arith.constant 0 : i32
    %c0_i32_1 = arith.constant 0 : i32
    return %c0_i32, %c0_i32_0 : i32, i32
  }
  func.func @transform_3(%arg0: i32, %arg1: i32) -> (i32, i32) {
    %c0_i32 = arith.constant 0 : i32
    %c0_i32_0 = arith.constant 0 : i32
    %c0_i32_1 = arith.constant 0 : i32
    return %c0_i32, %c0_i32_0 : i32, i32
  }
  func.func @transform_4(%arg0: i32, %arg1: i32) -> (i32, i32) {
    %c0_i32 = arith.constant 0 : i32
    %c0_i32_0 = arith.constant 0 : i32
    %c0_i32_1 = arith.constant 0 : i32
    return %c0_i32, %c0_i32_0 : i32, i32
  }
  func.func @transform_5(%arg0: i32, %arg1: i32) -> (i32, i32) {
    %c0_i32 = arith.constant 0 : i32
    %c0_i32_0 = arith.constant 0 : i32
    %c0_i32_1 = arith.constant 0 : i32
    return %c0_i32, %c0_i32_0 : i32, i32
  }
  func.func @transform_6(%arg0: i32, %arg1: i32) -> (i32, i32) {
    %c0_i32 = arith.constant 0 : i32
    %c0_i32_0 = arith.constant 0 : i32
    %c0_i32_1 = arith.constant 0 : i32
    return %c0_i32, %c0_i32_0 : i32, i32
  }
  func.func @transform_7(%arg0: i32, %arg1: i32) -> (i32, i32) {
    %c0_i32 = arith.constant 0 : i32
    %c0_i32_0 = arith.constant 0 : i32
    %c0_i32_1 = arith.constant 0 : i32
    return %c0_i32, %c0_i32_0 : i32, i32
  }
  func.func @transform_8(%arg0: i32, %arg1: i32) -> (i32, i32) {
    %c0_i32 = arith.constant 0 : i32
    %c0_i32_0 = arith.constant 0 : i32
    %c0_i32_1 = arith.constant 0 : i32
    return %c0_i32, %c0_i32_0 : i32, i32
  }
  func.func @transform_9(%arg0: i32, %arg1: i32) -> (i32, i32) {
    %c0_i32 = arith.constant 0 : i32
    %c0_i32_0 = arith.constant 0 : i32
    %c0_i32_1 = arith.constant 0 : i32
    return %c0_i32, %c0_i32_0 : i32, i32
  }
  func.func @transform_10(%arg0: i32, %arg1: i32) -> (i32, i32) {
    %c0_i32 = arith.constant 0 : i32
    %c0_i32_0 = arith.constant 0 : i32
    %c0_i32_1 = arith.constant 0 : i32
    return %c0_i32, %c0_i32_0 : i32, i32
  }
  func.func @transform_11(%arg0: i32, %arg1: i32) -> (i32, i32) {
    %c0_i32 = arith.constant 0 : i32
    %c0_i32_0 = arith.constant 0 : i32
    %c0_i32_1 = arith.constant 0 : i32
    return %c0_i32, %c0_i32_0 : i32, i32
  }
  func.func @transform_12(%arg0: i32, %arg1: i32) -> (i32, i32, i32) {
    %c0_i32 = arith.constant 0 : i32
    %c0_i32_0 = arith.constant 0 : i32
    return %arg0, %arg1, %c0_i32 : i32, i32, i32
  }
}

module attributes {stable_mosaic.version = 11 : i64} {
  func.func @_head_kernel(%arg0: i32, %arg1: i32, %arg2: i32, %arg3: memref<1x8x32xbf16, #tpu.memory_space<vmem>>, %arg4: memref<32x128xbf16, #tpu.memory_space<vmem>>, %arg5: memref<1x8x128xbf16, #tpu.memory_space<vmem>>) attributes {dimension_semantics = [#tpu.dimension_semantics<parallel>, #tpu.dimension_semantics<parallel>, #tpu.dimension_semantics<parallel>], iteration_bounds = array<i64: 1, 2, 2>, scalar_prefetch = 0 : i64, scratch_operands = 0 : i64, tpu.core_type = #tpu.core_type<tc>, window_params = [{transform_indices = @transform_0, window_bounds = array<i64: 1, 8, 32>}, {transform_indices = @transform_1, window_bounds = array<i64: 32, 128>}, {transform_indices = @transform_2, window_bounds = array<i64: 1, 8, 128>}]} {
    %c0 = arith.constant 0 : index
    %c0_0 = arith.constant 0 : index
    %c0_1 = arith.constant 0 : index
    %0 = vector.load %arg3[%c0, %c0_0, %c0_1] : memref<1x8x32xbf16, #tpu.memory_space<vmem>>, vector<1x8x32xbf16>
    %1 = vector.shape_cast %0 : vector<1x8x32xbf16> to vector<8x32xbf16>
    %c0_2 = arith.constant 0 : index
    %c0_3 = arith.constant 0 : index
    %2 = vector.load %arg4[%c0_2, %c0_3] : memref<32x128xbf16, #tpu.memory_space<vmem>>, vector<32x128xbf16>
    %cst = arith.constant dense<0.000000e+00> : vector<8x128xf32>
    %3 = tpu.matmul %1, %2, %cst {dimension_numbers = #tpu.dot_dimension_numbers<[1], [0], [0], [1], [0, 0, 1, 1], [], []>} : vector<8x32xbf16>, vector<32x128xbf16>, vector<8x128xf32> -> vector<8x128xf32>
    %4 = arith.truncf %3 : vector<8x128xf32> to vector<8x128xbf16>
    %c0_4 = arith.constant 0 : index
    %c0_5 = arith.constant 0 : index
    %c0_6 = arith.constant 0 : index
    %5 = vector.load %arg5[%c0_4, %c0_5, %c0_6] : memref<1x8x128xbf16, #tpu.memory_space<vmem>>, vector<1x8x128xbf16>
    %6 = vector.shape_cast %5 : vector<1x8x128xbf16> to vector<8x128xbf16>
    %7 = vector.shape_cast %4 : vector<8x128xbf16> to vector<1x8x128xbf16>
    tpu.vector_store %arg5[%c0_4, %c0_5, %c0_6], %7 {strides = array<i32>} : memref<1x8x128xbf16, #tpu.memory_space<vmem>>, vector<1x8x128xbf16>,
    return
  }
  func.func @transform_0(%arg0: i32, %arg1: i32, %arg2: i32) -> (i32, i32, i32) {
    %c0_i32 = arith.constant 0 : i32
    %c0_i32_0 = arith.constant 0 : i32
    return %arg1, %arg2, %c0_i32 : i32, i32, i32
  }
  func.func @transform_1(%arg0: i32, %arg1: i32, %arg2: i32) -> (i32, i32) {
    %c0_i32 = arith.constant 0 : i32
    %c0_i32_0 = arith.constant 0 : i32
    return %c0_i32, %arg0 : i32, i32
  }
  func.func @transform_2(%arg0: i32, %arg1: i32, %arg2: i32) -> (i32, i32, i32) {
    %c0_i32 = arith.constant 0 : i32
    return %arg1, %arg2, %arg0 : i32, i32, i32
  }
}

</mosaic_0001>

<bundles_post_ra>
// kernel: _lambda_.7
= control target key start
LH: loop header
LB: loop body
LE: loop exit
PB: predicated region body
PF: predicated region fallthrough
CT: control target
= control target key end

     0   :  { %s1582_s0 = inlined_call_operand.hbm [shape: bf16[2,16,32], index: 0, kind: input, shape index: {}]   ;;  %s1583_s1 = inlined_call_operand.hbm [shape: f32[1,32], index: 1, kind: input, shape index: {}]   ;;  %s1584_s2 = inlined_call_operand.hbm [shape: f32[1,32], index: 2, kind: input, shape index: {}]   ;;  %s1585_s3 = inlined_call_operand.hbm [shape: bf16[32,96], index: 3, kind: input, shape index: {}]   ;;  %s1586_s4 = inlined_call_operand.hbm [shape: bf16[2,16,32], index: 4, kind: output, shape index: {0}]   ;;  %s1587_s5 = inlined_call_operand.hbm [shape: bf16[2,16,32], index: 5, kind: output, shape index: {1}]   ;;  %s1588_s6 = inlined_call_operand.hbm [shape: bf16[2,16,32], index: 6, kind: output, shape index: {2}]  }
   0x1   :  { %1597 = sst [smem:[#allocation22_spill]] %s1583_s1 }
   0x2   :  { %1598 = sst [smem:[#allocation23_spill]] %s1584_s2 }
   0x3   :  { %1599 = sst [smem:[#allocation24_spill]] %s1585_s3 }
   0x4   :  { %1600 = sst [smem:[#allocation25_spill]] %s1588_s6 }
   0x5   :  { %12 = vsyncpa [#allocation3], 0 }
   0x6   :  { %14 = vsyncpa [#allocation3 + $0x1], 0 }
   0x7   :  { %15 = vsyncpa [#allocation6], 0 }
   0x8   :  { %16 = vsyncpa [#allocation9], 0 }
   0x9   :  { %17 = vsyncpa [#allocation4], 0 }
   0xa   :  { %19 = vsyncpa [#allocation4 + $0x1], 0 }
   0xb   :  { %20 = vsyncpa [#allocation12], 0 }
   0xc   :  { %22 = vsyncpa [#allocation12 + $0x1], 0  ;;  %s1196_s21 = smov 0   ;;  %s1198_s22 = smov 0  }
   0xd   :  { %s1200_s23 = smov 0   ;;  %s1202_s24 = smov 0  }
   0xe   :  { %s1204_s25 = smov 0   ;;  %s1206_s26 = smov 0  }
   0xf   :  { %s1208_s27 = smov 0   ;;  %s1210_s28 = smov 0  }
  0x10 LB: > { %1601 = sst [smem:[#allocation19_spill]] %s1118_s21  ;;  %s1237_s29 = sadd.s32 4294967295, %s1146_s28   ;;  %s1146_s28 = sphi %s1210_s28, %s28_s28   ;;  %s1142_s27 = sphi %s1208_s27, %s1634_s27   ;;  %s1138_s26 = sphi %s1206_s26, %s1633_s26   ;;  %s1134_s25 = sphi %s1204_s25, %s1632_s25   ;;  %s1130_s24 = sphi %s1202_s24, %s1631_s24   ;;  %s1126_s23 = sphi %s1200_s23, %s1630_s23   ;;  %s1122_s22 = sphi %s1198_s22, %s1629_s22   ;;  %s1118_s21 = sphi %s1196_s21, %s1628_s21  }
  0x11   : > { %s1589_s30 = sadd.s32 4294967294, %s1146_s28   ;;  %p62_p0 = scmp.ne.s32.totalorder %s1122_s22, %s1118_s21 }
  0x12   : > { %p1590_p1 = scmp.eq.s32.totalorder %s1237_s29, 0  ;;  %p157_p3 = scmp.eq.s32.totalorder %s1589_s30, 3 }
  0x13   : > { %p692_p5 = scmp.ge.s32.totalorder %s1146_s28, 1  ;;  %p220_p7 = scmp.lt.s32.totalorder %s1146_s28, 5 }
  0x14   : > { %p1248_p4 = por %p1590_p1, %p62_p0  ;;  %p1253_p6 = por %p157_p3, %p62_p0 }
  0x15   : > { %p1258_p8 = pnand %p692_p5, %p220_p7  ;;  %s1148_s10 = smov [#allocation5]  }
  0x16   : > { %s1602_s7 = scalar_select %p1248_p4, 1, 0 }
  0x17   : > { %s1603_s8 = scalar_select %p1253_p6, 1, 0 }
  0x18   : > { %s1605_s9 = scalar_select %p1258_p8, 1, 0 }
  0x19   : > { %1604 = sst [smem:[#allocation20_spill]] %s1603_s8  ;;  %s233_s11 = sshll.u32 %s1148_s10, 4  ;;  %s234_s11 = int_to_ptr.vmem [resolvable:$true] %s233_s11 }
  0x1a   : > { %p757_p9 = pneg %p1258_p8  ;;  %s1149_s12 = smov [#allocation7]  }
  0x1b   : > { %s244_s13 = sshll.u32 %s1149_s12, 4  ;;  %s1150_s15 = smov [#allocation8]   ;;  %s1270_s13 = int_to_ptr.vmem [resolvable:$true] %s244_s13 }
  0x1c   : > { %p1266_p10 = pnand %p757_p9, %p1590_p1  ;;  %s254_s16 = sshll.u32 %s1150_s15, 4  ;;  %s1272_s16 = int_to_ptr.vmem [resolvable:$true] %s254_s16 }
  0x1d   : > { %s1607_s1 = sld [smem:[#allocation22_spill]] }
  0x1e   : > { %p1282_p12 = pneg %p1266_p10 }
  0x23   : > { %s866_s19 = scalar_lea.hbm %s1607_s1, 16 }
  0x24   : > { %p867_p11 = scmp.ne.s32.totalorder %s1607_s1, %s866_s19  ;;  %p873_p3 = scmp.lt.u32.totalorder %s866_s19, %s1607_s1 }
  0x26   : > { %p869_p13 = pnand %p1282_p12, %p867_p11 }
  0x28   : > { %p870_p0 = pneg %p869_p13 }
  0x2a   : > { %p875_p5 = pnand %p873_p3, %p870_p0 }
  0x2c   : > { %878 = shalt.err (!%p875_p5)
}
  0x2d   : > { %s879_s17 = scalar_lea.vmem %s234_s11, 16  ;;  %s886_s18 = scalar_lea.vmem %s234_s11, 32 }
  0x2e   : > { %p880_p7 = scmp.ne.s32.totalorder %s234_s11, %s879_s17  ;;  %p887_p2 = scmp.lt.s32.totalorder %s234_s11, %s234_s11 }
  0x2f   : > { %p888_p6 = scmp.lt.s32.totalorder %s886_s18, %s879_s17 }
  0x30   : > { %p882_p9 = pnand %p880_p7, %p1282_p12 }
  0x31   : > { %p889_p4 = por %p888_p6, %p887_p2 }
  0x32   : > { %p883_p1 = pneg %p882_p9 }
  0x34   : > { %p890_p8 = pnand %p889_p4, %p883_p1 }
  0x36   : > { %893 = shalt.err (!%p890_p8)
}
  0x37   : > { %760 = dma.hbm_to_vmem [thread:$0]  (!%p1266_p10), %s1607_s1, 16, %s234_s11, [#allocation6]  }
  0x38   : > { %s1609_s2 = sld [smem:[#allocation23_spill]] }
  0x3e   : > { %s894_s15 = scalar_lea.hbm %s1609_s2, 16 }
  0x3f   : > { %p895_p11 = scmp.ne.s32.totalorder %s1609_s2, %s894_s15  ;;  %p901_p1 = scmp.lt.u32.totalorder %s894_s15, %s1609_s2 }
  0x41   : > { %p897_p13 = pnand %p895_p11, %p1282_p12 }
  0x43   : > { %p898_p2 = pneg %p897_p13 }
  0x45   : > { %p903_p4 = pnand %p901_p1, %p898_p2 }
  0x47   : > { %906 = shalt.err (!%p903_p4)
}
  0x48   : > { %s907_s11 = scalar_lea.vmem %s1270_s13, 16  ;;  %s914_s21 = scalar_lea.vmem %s1270_s13, 32 }
  0x49   : > { %p908_p6 = scmp.ne.s32.totalorder %s1270_s13, %s907_s11  ;;  %p915_p3 = scmp.lt.s32.totalorder %s1270_s13, %s1270_s13 }
  0x4a   : > { %p916_p5 = scmp.lt.s32.totalorder %s914_s21, %s907_s11 }
  0x4b   : > { %p910_p8 = pnand %p908_p6, %p1282_p12 }
  0x4c   : > { %p917_p7 = por %p916_p5, %p915_p3 }
  0x4d   : > { %p911_p0 = pneg %p910_p8 }
  0x4f   : > { %p918_p9 = pnand %p917_p7, %p911_p0 }
  0x51   : > { %921 = shalt.err (!%p918_p9)
}
  0x52   : > { %763 = dma.hbm_to_vmem [thread:$0]  (!%p1266_p10), %s1609_s2, 16, %s1270_s13, [#allocation6]  }
  0x53   : > { %s1610_s3 = sld [smem:[#allocation24_spill]] }
  0x59   : > { %s922_s19 = scalar_lea.hbm %s1610_s3, 256 }
  0x5a   : > { %p923_p11 = scmp.ne.s32.totalorder %s1610_s3, %s922_s19  ;;  %p929_p1 = scmp.lt.u32.totalorder %s922_s19, %s1610_s3 }
  0x5c   : > { %p925_p13 = pnand %p923_p11, %p1282_p12 }
  0x5e   : > { %p926_p2 = pneg %p925_p13 }
  0x60   : > { %p931_p4 = pnand %p929_p1, %p926_p2 }
  0x62   : > { %934 = shalt.err (!%p931_p4)
}
  0x63   : > { %s935_s13 = scalar_lea.vmem %s1272_s16, 256  ;;  %p943_p3 = scmp.lt.s32.totalorder %s1272_s16, %s1272_s16 }
  0x64   : > { %p936_p6 = scmp.ne.s32.totalorder %s1272_s16, %s935_s13  ;;  %p944_p5 = scmp.lt.s32.totalorder %s935_s13, %s935_s13 }
  0x66   : > { %p938_p8 = pnand %p936_p6, %p1282_p12  ;;  %p945_p7 = por %p944_p5, %p943_p3 }
  0x68   : > { %p939_p0 = pneg %p938_p8 }
  0x6a   : > { %p946_p9 = pnand %p945_p7, %p939_p0 }
  0x6c   : > { %949 = shalt.err (!%p946_p9)
}
  0x6d   : > { %s1151_s21 = smov 64   ;;  %s1152_s12 = smov 4  }
  0x6e   : > { %766 = dma.hbm_to_vmem [thread:$0]  (!%p1266_p10), %s1610_s3, 256, %s1272_s16, [#allocation9], %s1151_s21, %s1151_s21, %s1152_s12  }
  0x6f   : > { %s37_s10 = sadd.s32 1, %s1138_s26  ;;  %s40_s30 = sadd.s32 1, %s1142_s27 }
  0x70   : > { %p38_p12 = scmp.ge.s32.totalorder %s37_s10, 2  ;;  %s49_s19 = sadd.s32 1, %s1126_s23 }
  0x71   : > { %p56_p11 = scmp.ne.s32.totalorder %s1126_s23, %s1122_s22  ;;  %p57_p13 = scmp.eq.s32.totalorder %s1146_s28, 0 }
  0x72   : > { %s1636_s10 = smov (%p38_p12, %s37_s10), 0  ;;  %s1638_s30 = smov (!%p38_p12, %s40_s30), %s1142_s27 }
  0x73   : > { %1611 = sst [smem:[#allocation21_spill]] %s1636_s10  ;;  %s45_s15 = ssub.s32 %s1138_s26, %s1636_s10 }
  0x74   : > { %p42_p2 = scmp.ge.s32.totalorder %s1638_s30, 2  ;;  %p1612_p1 = scmp.eq.s32.totalorder %s1237_s29, 3 }
  0x75   : > { %p1362_p10 = por %p57_p13, %p56_p11  ;;  %p784_p6 = scmp.lt.s32.totalorder %s1146_s28, 4 }
  0x76   : > { %p1358_p4 = por %p1612_p1, %p56_p11  ;;  %s1640_s30 = smov (%p42_p2, %s1638_s30), 0 }
  0x77   : > { %s268_s17 = sand.u32 1, %s1126_s23   ;;  %s698_s18 = sshll.u32 %s1142_s27, 1 }
  0x78   : > { %s44_s11 = ssub.s32 %s1142_s27, %s1640_s30  ;;  %s697_s21 = sshll.u32 %s268_s17, 2 }
  0x79   : > { %s46_s13 = sor.u32 %s45_s15, %s44_s11  ;;  %s277_s12 = sadd.s32 %s1138_s26, %s698_s18 }
  0x7a   : > { %p47_p8 = scmp.eq.s32.totalorder %s46_s13, 0  ;;  %s272_s8 = scalar_lea.vmem [#allocation2], %s697_s21 }
  0x7b   : > { %s281_s20 = sshll.u32 %s272_s8, 4  ;;  %s699_s2 = sshll.u32 %s277_s12, 6  ;;  %s1377_s20 = int_to_ptr.vmem [resolvable:$true] %s281_s20 }
  0x7c   : > { %s1375_s1 = scalar_select %p47_p8, %s1126_s23, %s49_s19  }
  0x7d   : > { %s1382_s6 = scalar_lea.hbm %s1582_s0, %s699_s2  ;;  %p1388_p0 = pnand %p784_p6, %p1362_p10 }
  0x7e   : > { %s269_s19 = scalar_lea.sflag [#allocation3], %s268_s17  ;;  %s950_s18 = scalar_lea.hbm %s1382_s6, 64 }
  0x7f   : > { %p951_p3 = scmp.ne.s32.totalorder %s1382_s6, %s950_s18  ;;  %p952_p5 = pneg %p1388_p0 }
  0x80   : > { %s955_s10 = scalar_lea.hbm %s1582_s0, 256  ;;  %p956_p12 = scmp.lt.u32.totalorder %s1382_s6, %s1582_s0 }
  0x81   : > { %p953_p7 = pnand %p952_p5, %p951_p3  ;;  %p957_p11 = scmp.lt.u32.totalorder %s955_s10, %s950_s18 }
  0x82   : > { %p959_p2 = scmp.lt.u32.totalorder %s950_s18, %s1382_s6 }
  0x83   : > { %p954_p9 = pneg %p953_p7  ;;  %p958_p13 = por %p957_p11, %p956_p12 }
  0x85   : > { %p960_p1 = por %p959_p2, %p958_p13 }
  0x87   : > { %p961_p10 = pnand %p960_p1, %p954_p9 }
  0x89   : > { %964 = shalt.err (!%p961_p10)
}
  0x8a   : > { %s965_s17 = scalar_lea.vmem %s1377_s20, 64  ;;  %s1153_s13 = smov [#allocation2]  }
  0x8b   : > { %p966_p6 = scmp.ne.s32.totalorder %s1377_s20, %s965_s17  ;;  %s970_s21 = sshll.u32 %s1153_s13, 4  ;;  %s971_s21 = int_to_ptr.vmem [resolvable:$false] %s970_s21 }
  0x8c   : > { %s972_s12 = scalar_lea.vmem %s971_s21, 128  ;;  %p973_p7 = scmp.lt.s32.totalorder %s1377_s20, %s971_s21 }
  0x8d   : > { %p968_p8 = pnand %p966_p6, %p952_p5  ;;  %p974_p12 = scmp.lt.s32.totalorder %s972_s12, %s965_s17 }
  0x8f   : > { %p969_p3 = pneg %p968_p8  ;;  %p975_p11 = por %p974_p12, %p973_p7 }
  0x91   : > { %p976_p13 = pnand %p975_p11, %p969_p3 }
  0x93   : > { %979 = shalt.err (!%p976_p13)
}
  0x94   : > { %770 = dma.hbm_to_vmem [thread:$0]  (!%p1388_p0), %s1382_s6, 64, %s1377_s20, %s269_s19  }
  0x95   : > { %p1616_p9 = scmp.ne.s32.totalorder %s1605_s9, 0 }
  0x96   : > { %s1420_s8 = sand.u32 (!%p1616_p9), 1, %s1122_s22   ;;  %p1617_p5 = scmp.ne.s32.totalorder (!%p1616_p9), %s1602_s7, 0 }
  0x97   : > { %290 = sbr.rel (%p1616_p9) target bundleno = 849 (0x351), region = 36  ;;  %s1423_s18 = sshll.u32 (!%p1616_p9), %s1420_s8, 2 }
  0x98   : > { %s293_s2 = scalar_lea.sflag (!%p1616_p9), [#allocation3], %s1420_s8  ;;  %s296_s3 = scalar_lea.vmem (!%p1616_p9), [#allocation2], %s1423_s18 }
  0x9e   : > { %1097 = dma.done.wait (%p1617_p5), %s293_s2, 64  }
  0x9f   : > { %1099 = vsyncadd (%p1617_p5), %s293_s2, 4294967232  ;;  %p1618_p0 = scmp.eq.s32.totalorder %s1237_s29, 0 }
  0xa1   : > { %1101 = dma.done.wait (%p1618_p0), [#allocation6], 32   ;;  %p1619_p2 = pmov %p1618_p0 }
  0xa2   : > { %p1620_p1 = pmov %p1618_p0 }
  0xa3   : > { %1103 = vsyncadd (%p1619_p2), [#allocation6], 4294967264 }
  0xa4   : > { %1105 = dma.done.wait (%p1620_p1), [#allocation9], 256   ;;  %p1621_p10 = pmov %p1618_p0 }
  0xa5   : > { %vm352_vm0 = vcmask 261120   ;;  %v348_v0 = vld [vmem:[%s296_s3] sm:$0xf]  ;;  %v862_v8 = vld [vmem:[#allocation8] sm:$0xff]   ;;  %v1154_v9 = vmov 0.0   ;;  %v863_v10 = vld [vmem:[#allocation8 + $0x8] sm:$0xff]  }
  0xa6   : > { %1107 = vsyncadd (%p1621_p10), [#allocation9], 4294967040  ;;  %v349_v1 = vunpack.c.l.bf16 %v348_v0  ;;  %729 = vmatprep.subr.bf16.mxu0 %v1154_v9  ;;  %vm1155_vm1 = vmmov 0   ;;  %v708_v15 = vld [vmem:[#allocation5] ss:$0 sm:$0xff]  ;;  %s717_s6 = sshll.u32 %s1134_s25, 1 }
  0xa7   : > { %730 = vmatpush3.bf16.msra.mxu0 %v862_v8  ;;  %733 = vmatprep.mubr.msk.bf16.mxu0 %vm1155_vm1, %v1154_v9  ;;  %v709_v17 = vld [vmem:[#allocation7] ss:$0 sm:$0xff]  ;;  %s477_s7 = sadd.s32 %s1130_s24, %s717_s6  ;;  %s332_s20 = scalar_lea.vmem [#allocation10], %s1423_s18  ;;  %vm442_vm2 = vcmask 257024  }
  0xa8   : > { %v353_v2 = vsel %vm352_vm0, %v349_v1, 0.0  ;;  %731 = vmatprep.subr.bf16.mxu0 %v1154_v9  ;;  %s1444_s9 = sshll.u32 %s477_s7, 6  ;;  %s481_s15 = sshll.u32 %s332_s20, 4  ;;  %s1453_s15 = int_to_ptr.vmem [resolvable:$true] %s481_s15 }
  0xa9   : > { %354 = vadd.xlane.f32.xlu0 %v353_v2  ;;  %s1451_s16 = scalar_lea.hbm %s1586_s4, %s1444_s9  ;;  %s1156_s24 = smov 96  }
  0xaa   : > { %s456_s25 = scalar_lea.sflag [#allocation4], %s1420_s8  ;;  %s980_s11 = scalar_lea.vmem %s1453_s15, 64 }
  0xab   : > { %732 = vmatpush3.bf16.msra.mxu0 %v863_v10  ;;  %p981_p6 = scmp.ne.s32.totalorder %s1453_s15, %s980_s11  ;;  %s1157_s17 = smov [#allocation10]  }
  0xac   : > { %s984_s13 = sshll.u32 %s1157_s17, 4  ;;  %s985_s13 = int_to_ptr.vmem [resolvable:$false] %s984_s13 }
  0xad   : > { %p982_p8 = pnand %p981_p6, %p1358_p4  ;;  %s986_s21 = scalar_lea.vmem %s985_s13, 128 }
  0xae   : > { %p987_p7 = scmp.lt.s32.totalorder %s1453_s15, %s985_s13  ;;  %p988_p12 = scmp.lt.s32.totalorder %s986_s21, %s980_s11 }
  0xaf   : > { %p983_p3 = pneg %p982_p8 }
  0xb0   : > { %p989_p11 = por %p988_p12, %p987_p7 }
  0xb2   : > { %p990_p13 = pnand %p989_p11, %p983_p3 }
 0x136   : > { %v355_v3 = vpop.xlane.xlu0 %354 }
 0x137   : > { %v357_v4 = vmul.f32 0.03125, %v355_v3 }
 0x139   : > { %v358_v5 = vsub.f32 %v349_v1, %v357_v4 }
 0x13b   : > { %v359_v6 = vmul.f32 %v358_v5, %v358_v5 }
 0x13d   : > { %v360_v7 = vsel %vm352_vm0, %v359_v6, 0.0 }
 0x13e   : > { %361 = vadd.xlane.f32.xlu0 %v360_v7 }
 0x1cb   : > { %v362_v11 = vpop.xlane.xlu0 %361 }
 0x1cc   : > { %v363_v12 = vmul.f32 0.03125, %v362_v11 }
 0x1ce   : > { %v364_v13 = vadd.f32 1e-05, %v363_v12 }
 0x1d0   : > { %864 = vrsqrt.f32 %v364_v13 }
 0x1da   : > { %v865_v14 = vpop.eup %864 }
 0x1db   : > { %v366_v16 = vmul.f32 %v865_v14, %v358_v5 }
 0x1dd   : > { %v373_v18 = vmul.f32 %v708_v15, %v366_v16 }
 0x1df   : > { %v380_v19 = vadd.f32 %v709_v17, %v373_v18 }
 0x1e1   : > { %v381_v20 = vpack.c.bf16 %v380_v19, %v380_v19 }
 0x1e3   : > { %734 = vmatmul.mubr.msk.bf16.vlgmr.msra.gmra.mrb[0].mxu0 %vm352_vm0, %v381_v20 }
 0x2b6   : > { %v435_v21 = vpop.f32.mrb[0].mxu0 }
 0x2b7   : > { %v441_v22 = vpack.c.bf16 %v435_v21, %v435_v21  ;;  %v735_v23 = vpop.f32.mrb[1].mxu0 }
 0x2b8   : > { %v438_v24 = vpop.f32.mrb[2].mxu0 }
 0x2b9   : > { %447 = vrot.lane.b32.xlu1 %v441_v22, %s1156_s24  ;;  %v736_v25 = vpop.f32.mrb[3].mxu0  ;;  %443 = vst.msk [vmem:[%s332_s20] sm:$0xf] %vm442_vm2, %v441_v22 }
 0x2ba   : > { %993 = shalt.err (!%p990_p13)
}
 0x2bb   : > { %s994_s12 = scalar_lea.hbm %s1451_s16, 64  ;;  %s998_s3 = scalar_lea.hbm %s1586_s4, 256 }
 0x2bc   : > { %p995_p9 = scmp.ne.s32.totalorder %s1451_s16, %s994_s12  ;;  %p999_p2 = scmp.lt.u32.totalorder %s1451_s16, %s1586_s4 }
 0x2bd   : > { %p1000_p1 = scmp.lt.u32.totalorder %s998_s3, %s994_s12  ;;  %p1002_p6 = scmp.lt.u32.totalorder %s994_s12, %s1451_s16 }
 0x2be   : > { %p996_p5 = pnand %p995_p9, %p1358_p4 }
 0x2bf   : > { %p1001_p10 = por %p1000_p1, %p999_p2 }
 0x2c0   : > { %p997_p0 = pneg %p996_p5 }
 0x2c1   : > { %p1003_p8 = por %p1002_p6, %p1001_p10 }
 0x2c3   : > { %p1004_p3 = pnand %p1003_p8, %p997_p0 }
 0x2c5   : > { %1007 = shalt.err (!%p1004_p3)
}
 0x2c6   : > { %751 = dma.vmem_to_hbm [thread:$0]  (%p1358_p4), %s1453_s15, 64, %s1451_s16, %s456_s25  }
 0x2c7   : > { %s1158_s20 = smov 64   ;;  %s460_s19 = sand.u32 1, %s1237_s29  }
 0x2c8   : > { %451 = vrot.lane.b32.xlu1 %v441_v22, %s1158_s20  ;;  %s339_s10 = scalar_lea.vmem [#allocation11], %s1423_s18  ;;  %s1484_s13 = scalar_lea.hbm %s1587_s5, %s1444_s9 }
 0x2c9   : > { %s496_s24 = sshll.u32 %s339_s10, 4  ;;  %s346_s21 = scalar_lea.vmem [#allocation13], %s1423_s18  ;;  %s1486_s24 = int_to_ptr.vmem [resolvable:$true] %s496_s24 }
 0x2ca   : > { %s1491_s12 = sshll.u32 %s346_s21, 4  ;;  %s1494_s29 = scalar_lea.sflag [#allocation12], %s460_s19  ;;  %s1525_s12 = int_to_ptr.vmem [resolvable:$true] %s1491_s12 }
 0x2cb   : > { %s1008_s15 = scalar_lea.vmem %s1486_s24, 64  ;;  %s1159_s16 = smov [#allocation11]  }
 0x2cc   : > { %p1009_p7 = scmp.ne.s32.totalorder %s1486_s24, %s1008_s15  ;;  %s1012_s25 = sshll.u32 %s1159_s16, 4  ;;  %s1013_s25 = int_to_ptr.vmem [resolvable:$false] %s1012_s25 }
 0x2cd   : > { %s1014_s8 = scalar_lea.vmem %s1013_s25, 128  ;;  %p1015_p13 = scmp.lt.s32.totalorder %s1486_s24, %s1013_s25 }
 0x2ce   : > { %p1010_p12 = pnand %p1009_p7, %p1358_p4  ;;  %p1016_p9 = scmp.lt.s32.totalorder %s1014_s8, %s1008_s15 }
 0x2d0   : > { %p1011_p11 = pneg %p1010_p12  ;;  %p1017_p5 = por %p1016_p9, %p1015_p13 }
 0x2d2   : > { %p1018_p0 = pnand %p1017_p5, %p1011_p11 }
 0x32b   : > { %v448_v26 = vpop.permute.xlu1 %447 }
 0x32c   : > { %450 = vst.msk [vmem:[%s339_s10] sm:$0xf] %vm442_vm2, %v448_v26 }
 0x32d   : > { %1021 = shalt.err (!%p1018_p0)
}
 0x32e   : > { %s1022_s2 = scalar_lea.hbm %s1484_s13, 64  ;;  %s1026_s7 = scalar_lea.hbm %s1587_s5, 256 }
 0x32f   : > { %p1023_p2 = scmp.ne.s32.totalorder %s1484_s13, %s1022_s2  ;;  %p1027_p6 = scmp.lt.u32.totalorder %s1484_s13, %s1587_s5 }
 0x330   : > { %p1028_p8 = scmp.lt.u32.totalorder %s1026_s7, %s1022_s2  ;;  %p1030_p7 = scmp.lt.u32.totalorder %s1022_s2, %s1484_s13 }
 0x331   : > { %p1024_p1 = pnand %p1023_p2, %p1358_p4 }
 0x332   : > { %p1029_p3 = por %p1028_p8, %p1027_p6 }
 0x333   : > { %p1025_p10 = pneg %p1024_p1 }
 0x334   : > { %p1031_p12 = por %p1030_p7, %p1029_p3 }
 0x336   : > { %p1032_p11 = pnand %p1031_p12, %p1025_p10 }
 0x338   : > { %1035 = shalt.err (!%p1032_p11)
}
 0x339   : > { %752 = dma.vmem_to_hbm [thread:$0]  (%p1358_p4), %s1486_s24, 64, %s1484_s13, %s1494_s29  }
 0x33a   : > { %s1622_s17 = sld [smem:[#allocation25_spill]]  ;;  %v452_v27 = vpop.permute.xlu1 %451  ;;  %s1036_s16 = scalar_lea.vmem %s1525_s12, 64 }
 0x33b   : > { %454 = vst.msk [vmem:[%s346_s21] sm:$0xf] %vm442_vm2, %v452_v27  ;;  %p1037_p13 = scmp.ne.s32.totalorder %s1525_s12, %s1036_s16  ;;  %s1160_s24 = smov [#allocation13]  }
 0x33c   : > { %s1040_s13 = sshll.u32 %s1160_s24, 4  ;;  %s1041_s13 = int_to_ptr.vmem [resolvable:$false] %s1040_s13 }
 0x33d   : > { %p1038_p9 = pnand %p1037_p13, %p1358_p4  ;;  %s1042_s25 = scalar_lea.vmem %s1041_s13, 128 }
 0x33e   : > { %p1043_p0 = scmp.lt.s32.totalorder %s1525_s12, %s1041_s13  ;;  %p1044_p2 = scmp.lt.s32.totalorder %s1042_s25, %s1036_s16 }
 0x33f   : > { %p1039_p5 = pneg %p1038_p9 }
 0x340   : > { %s1522_s15 = scalar_lea.hbm %s1622_s17, %s1444_s9  ;;  %p1045_p1 = por %p1044_p2, %p1043_p0 }
 0x342   : > { %p1046_p10 = pnand %p1045_p1, %p1039_p5 }
 0x344   : > { %1049 = shalt.err (!%p1046_p10)
}
 0x345   : > { %s1050_s18 = scalar_lea.hbm %s1522_s15, 64  ;;  %s1054_s8 = scalar_lea.hbm %s1622_s17, 256 }
 0x346   : > { %p1051_p6 = scmp.ne.s32.totalorder %s1522_s15, %s1050_s18  ;;  %p1055_p7 = scmp.lt.u32.totalorder %s1522_s15, %s1622_s17 }
 0x347   : > { %p1056_p12 = scmp.lt.u32.totalorder %s1054_s8, %s1050_s18  ;;  %p1058_p13 = scmp.lt.u32.totalorder %s1050_s18, %s1522_s15 }
 0x348   : > { %p1052_p8 = pnand %p1051_p6, %p1358_p4 }
 0x349   : > { %p1057_p11 = por %p1056_p12, %p1055_p7 }
 0x34a   : > { %p1053_p3 = pneg %p1052_p8 }
 0x34b   : > { %p1059_p9 = por %p1058_p13, %p1057_p11 }
 0x34d   : > { %p1060_p5 = pnand %p1059_p9, %p1053_p3 }
 0x34f   : > { %1063 = shalt.err (!%p1060_p5)
}
 0x350   : > { %753 = dma.vmem_to_hbm [thread:$0]  (%p1358_p4), %s1525_s12, 64, %s1522_s15, %s1494_s29  }
 0x351 PF: > { %s1623_s6 = sld [smem:[#allocation19_spill]]  ;;  %s1624_s7 = sld [smem:[#allocation20_spill]] }
 0x352   : > { %p788_p0 = scmp.ge.s32.totalorder %s1146_s28, 2 }
 0x357   : > { %s523_s20 = sand.u32 1, %s1623_s6   ;;  %p1625_p2 = scmp.ne.s32.totalorder %s1624_s7, 0 }
 0x358   : > { %s524_s19 = scalar_lea.sflag [#allocation4], %s523_s20 }
 0x359   : > { %p772_p1 = pnand %p788_p0, %p1625_p2 }
 0x35b   : > { %1109 = dma.done.wait (!%p772_p1), %s524_s19, 64  }
 0x35c   : > { %1111 = vsyncadd (!%p772_p1), %s524_s19, 4294967232  ;;  %s1626_s10 = sadd.s32 4294967294, %s1146_s28  }
 0x35d   : > { %s532_s11 = sand.u32 1, %s1626_s10  }
 0x35e   : > { %s533_s16 = scalar_lea.sflag [#allocation12], %s532_s11 }
 0x35f   : > { %1113 = dma.done.wait (!%p772_p1), %s533_s16, 128  }
 0x360   : > { %1115 = vsyncadd (!%p772_p1), %s533_s16, 4294967168  ;;  %s28_s28 = sadd.s32 1, %s1146_s28   ;;  %s1627_s14 = sld [smem:[#allocation21_spill]] }
 0x361   : > { %p25_p4 = scmp.ge.s32.totalorder %s28_s28, 6   ;;  %s1628_s21 = smov %s1122_s22 }
 0x362   : > { %s1629_s22 = smov %s1126_s23  ;;  %s1630_s23 = smov %s1375_s1 }
 0x363   : > { %s1631_s24 = smov %s1138_s26  ;;  %s1632_s25 = smov %s1142_s27 }
 0x364   : > { %s1634_s27 = smov %s1640_s30  ;;  %27 = sbr.rel (!%p25_p4) target bundleno = 16 (0x10), region = 125 }
 0x366   : > { %s1633_s26 = smov %s1627_s14 }
 0x36b   :  { %547 = vsyncpa [#allocation3], 1 }
 0x36c   :  { %549 = vsyncpa [#allocation3 + $0x1], 1 }
 0x36d   :  { %550 = vsyncpa [#allocation6], 1 }
 0x36e   :  { %551 = vsyncpa [#allocation9], 1 }
 0x36f   :  { %552 = vsyncpa [#allocation4], 1 }
 0x370   :  { %554 = vsyncpa [#allocation4 + $0x1], 1 }
 0x371   :  { %555 = vsyncpa [#allocation12], 1 }
 0x372   :  { %557 = vsyncpa [#allocation12 + $0x1], 1 }

// kernel: _lambda_.12
= control target key start
LH: loop header
LB: loop body
LE: loop exit
PB: predicated region body
PF: predicated region fallthrough
CT: control target
= control target key end

     0   :  { %s2548_s0 = inlined_call_operand.hbm [shape: bf16[2,16,32], index: 0, kind: input, shape index: {}, may-alias: {0,12}]   ;;  %s2549_s1 = inlined_call_operand.hbm [shape: bf16[2,16,32], index: 1, kind: input, shape index: {}]   ;;  %s2550_s2 = inlined_call_operand.hbm [shape: bf16[32,32], index: 2, kind: input, shape index: {}]   ;;  %s2551_s3 = inlined_call_operand.hbm [shape: f32[1,32], index: 3, kind: input, shape index: {}]   ;;  %s2552_s4 = inlined_call_operand.hbm [shape: f32[1,32], index: 4, kind: input, shape index: {}]   ;;  %s2553_s5 = inlined_call_operand.hbm [shape: f32[1,32], index: 5, kind: input, shape index: {}]   ;;  %s2554_s6 = inlined_call_operand.hbm [shape: bf16[32,128], index: 6, kind: input, shape index: {}]   ;;  %s2555_s7 = inlined_call_operand.hbm [shape: f32[1,128], index: 7, kind: input, shape index: {}]   ;;  %s2556_s8 = inlined_call_operand.hbm [shape: bf16[128,32], index: 8, kind: input, shape index: {}]   ;;  %s2557_s9 = inlined_call_operand.hbm [shape: f32[1,32], index: 9, kind: input, shape index: {}]   ;;  %s2558_s10 = inlined_call_operand.hbm [shape: f32[1,32], index: 10, kind: input, shape index: {}]   ;;  %s2559_s11 = inlined_call_operand.hbm [shape: f32[1,32], index: 11, kind: input, shape index: {}]   ;;  %s2560_s12 = inlined_call_operand.hbm [shape: bf16[2,16,32], index: 12, kind: output, shape index: {}, may-alias: {0,12}]  }
   0x1   :  { %2574 = sst [smem:[#allocation37_spill]] %s2548_s0 }
   0x2   :  { %2575 = sst [smem:[#allocation38_spill]] %s2549_s1 }
   0x3   :  { %2576 = sst [smem:[#allocation39_spill]] %s2550_s2 }
   0x4   :  { %2577 = sst [smem:[#allocation40_spill]] %s2551_s3 }
   0x5   :  { %2578 = sst [smem:[#allocation41_spill]] %s2552_s4 }
   0x6   :  { %2579 = sst [smem:[#allocation42_spill]] %s2553_s5 }
   0x7   :  { %2580 = sst [smem:[#allocation43_spill]] %s2554_s6 }
   0x8   :  { %2581 = sst [smem:[#allocation44_spill]] %s2555_s7 }
   0x9   :  { %2582 = sst [smem:[#allocation45_spill]] %s2556_s8 }
   0xa   :  { %2583 = sst [smem:[#allocation46_spill]] %s2557_s9 }
   0xb   :  { %2584 = sst [smem:[#allocation47_spill]] %s2560_s12 }
   0xc   :  { %17 = vsyncpa [#allocation3], 0 }
   0xd   :  { %19 = vsyncpa [#allocation3 + $0x1], 0 }
   0xe   :  { %20 = vsyncpa [#allocation6], 0 }
   0xf   :  { %22 = vsyncpa [#allocation6 + $0x1], 0 }
  0x10   :  { %23 = vsyncpa [#allocation9], 0 }
  0x11   :  { %24 = vsyncpa [#allocation12], 0 }
  0x12   :  { %25 = vsyncpa [#allocation15], 0 }
  0x13   :  { %26 = vsyncpa [#allocation18], 0 }
  0x14   :  { %27 = vsyncpa [#allocation21], 0 }
  0x15   :  { %28 = vsyncpa [#allocation4], 0 }
  0x16   :  { %30 = vsyncpa [#allocation4 + $0x1], 0  ;;  %s2030_s21 = smov 0   ;;  %s2032_s22 = smov 0  }
  0x17   :  { %s2034_s23 = smov 0   ;;  %s2036_s24 = smov 0  }
  0x18   :  { %s2038_s25 = smov 0   ;;  %s2040_s26 = smov 0  }
  0x19   :  { %s2042_s27 = smov 0   ;;  %s2044_s28 = smov 0  }
  0x1a LB: > { %2585 = sst [smem:[#allocation32_spill]] %s1918_s21  ;;  %s2071_s29 = sadd.s32 4294967295, %s1946_s28   ;;  %s1946_s28 = sphi %s2044_s28, %s36_s28   ;;  %s1942_s27 = sphi %s2042_s27, %s2640_s27   ;;  %s1938_s26 = sphi %s2040_s26, %s2639_s26   ;;  %s1934_s25 = sphi %s2038_s25, %s2638_s25   ;;  %s1930_s24 = sphi %s2036_s24, %s2637_s24   ;;  %s1926_s23 = sphi %s2034_s23, %s2636_s23   ;;  %s1922_s22 = sphi %s2032_s22, %s2635_s22   ;;  %s1918_s21 = sphi %s2030_s21, %s2634_s21  }
  0x1b   : > { %2586 = sst [smem:[#allocation33_spill]] %s1930_s24  ;;  %p1165_p0 = scmp.ge.s32.totalorder %s1946_s28, 1 }
  0x1c   : > { %2587 = sst [smem:[#allocation34_spill]] %s1934_s25  ;;  %p2568_p1 = scmp.eq.s32.totalorder %s2071_s29, 0 }
  0x1d   : > { %2588 = sst [smem:[#allocation35_spill]] %s2071_s29  ;;  %p347_p2 = scmp.lt.s32.totalorder %s1946_s28, 5 }
  0x1e   : > { %s1948_s13 = smov [#allocation7]   ;;  %s1949_s16 = smov [#allocation8]  }
  0x1f   : > { %p2076_p3 = pnand %p1165_p0, %p347_p2  ;;  %s359_s14 = sshll.u32 %s1948_s13, 4  ;;  %s2080_s14 = int_to_ptr.vmem [resolvable:$true] %s359_s14 }
  0x20   : > { %s373_s17 = sshll.u32 %s1949_s16, 4  ;;  %s1950_s18 = smov [#allocation11]   ;;  %s2090_s17 = int_to_ptr.vmem [resolvable:$true] %s373_s17 }
  0x21   : > { %s2589_s30 = scalar_select %p2076_p3, 1, 0 }
  0x22   : > { %p1320_p4 = pneg %p2076_p3  ;;  %s2092_s19 = sshll.u32 %s1950_s18, 4  ;;  %s396_s19 = int_to_ptr.vmem [resolvable:$true] %s2092_s19 }
  0x23   : > { %2590 = sst [smem:[#allocation36_spill]] %s2589_s30  ;;  %s2592_s2 = sld [smem:[#allocation39_spill]] }
  0x24   : > { %p2086_p5 = pnand %p1320_p4, %p2568_p1 }
  0x26   : > { %p2102_p7 = pneg %p2086_p5 }
  0x29   : > { %s1480_s13 = scalar_lea.hbm %s2592_s2, 256 }
  0x2a   : > { %p1481_p6 = scmp.ne.s32.totalorder %s2592_s2, %s1480_s13  ;;  %p1487_p10 = scmp.lt.u32.totalorder %s1480_s13, %s2592_s2 }
  0x2c   : > { %p1483_p8 = pnand %p2102_p7, %p1481_p6 }
  0x2e   : > { %p1484_p9 = pneg %p1483_p8 }
  0x30   : > { %p1489_p11 = pnand %p1487_p10, %p1484_p9 }
  0x32   : > { %1492 = shalt.err (!%p1489_p11)
}
  0x33   : > { %s1493_s12 = scalar_lea.vmem %s2080_s14, 256  ;;  %p1501_p2 = scmp.lt.s32.totalorder %s2080_s14, %s2080_s14 }
  0x34   : > { %p1494_p12 = scmp.ne.s32.totalorder %s2080_s14, %s1493_s12  ;;  %p1502_p4 = scmp.lt.s32.totalorder %s1493_s12, %s1493_s12 }
  0x36   : > { %p1496_p13 = pnand %p1494_p12, %p2102_p7  ;;  %p1503_p6 = por %p1502_p4, %p1501_p2 }
  0x38   : > { %p1497_p0 = pneg %p1496_p13 }
  0x3a   : > { %p1504_p8 = pnand %p1503_p6, %p1497_p0 }
  0x3c   : > { %1507 = shalt.err (!%p1504_p8)
}
  0x3d   : > { %s2570_s24 = smov 64   ;;  %s1952_s25 = smov 4  }
  0x3e   : > { %1323 = dma.hbm_to_vmem [thread:$0]  (!%p2086_p5), %s2592_s2, 256, %s2080_s14, [#allocation6], %s2570_s24, %s2570_s24, %s1952_s25  }
  0x3f   : > { %s2594_s3 = sld [smem:[#allocation40_spill]] }
  0x45   : > { %s1508_s12 = scalar_lea.hbm %s2594_s3, 16 }
  0x46   : > { %p1509_p9 = scmp.ne.s32.totalorder %s2594_s3, %s1508_s12  ;;  %p1515_p12 = scmp.lt.u32.totalorder %s1508_s12, %s2594_s3 }
  0x48   : > { %p1511_p10 = pnand %p1509_p9, %p2102_p7 }
  0x4a   : > { %p1512_p11 = pneg %p1511_p10 }
  0x4c   : > { %p1517_p13 = pnand %p1515_p12, %p1512_p11 }
  0x4e   : > { %1520 = shalt.err (!%p1517_p13)
}
  0x4f   : > { %s1521_s14 = scalar_lea.vmem %s2090_s17, 16  ;;  %s1528_s0 = scalar_lea.vmem %s2090_s17, 32 }
  0x50   : > { %p1522_p0 = scmp.ne.s32.totalorder %s2090_s17, %s1521_s14  ;;  %p1529_p6 = scmp.lt.s32.totalorder %s2090_s17, %s2090_s17 }
  0x51   : > { %p1530_p8 = scmp.lt.s32.totalorder %s1528_s0, %s1521_s14 }
  0x52   : > { %p1524_p2 = pnand %p1522_p0, %p2102_p7 }
  0x53   : > { %p1531_p9 = por %p1530_p8, %p1529_p6 }
  0x54   : > { %p1525_p4 = pneg %p1524_p2 }
  0x56   : > { %p1532_p10 = pnand %p1531_p9, %p1525_p4 }
  0x58   : > { %1535 = shalt.err (!%p1532_p10)
}
  0x59   : > { %1326 = dma.hbm_to_vmem [thread:$0]  (!%p2086_p5), %s2594_s3, 16, %s2090_s17, [#allocation9]  }
  0x5a   : > { %s2595_s5 = sld [smem:[#allocation42_spill]] }
  0x60   : > { %s1536_s13 = scalar_lea.hbm %s2595_s5, 16 }
  0x61   : > { %p1537_p11 = scmp.ne.s32.totalorder %s2595_s5, %s1536_s13  ;;  %p1543_p0 = scmp.lt.u32.totalorder %s1536_s13, %s2595_s5 }
  0x63   : > { %p1539_p12 = pnand %p1537_p11, %p2102_p7 }
  0x65   : > { %p1540_p13 = pneg %p1539_p12 }
  0x67   : > { %p1545_p2 = pnand %p1543_p0, %p1540_p13 }
  0x69   : > { %1548 = shalt.err (!%p1545_p2)
}
  0x6a   : > { %s1549_s0 = scalar_lea.vmem %s396_s19, 16  ;;  %s1556_s17 = scalar_lea.vmem %s396_s19, 32 }
  0x6b   : > { %p1550_p4 = scmp.ne.s32.totalorder %s396_s19, %s1549_s0  ;;  %p1557_p9 = scmp.lt.s32.totalorder %s396_s19, %s396_s19 }
  0x6c   : > { %p1558_p10 = scmp.lt.s32.totalorder %s1556_s17, %s1549_s0 }
  0x6d   : > { %p1552_p6 = pnand %p1550_p4, %p2102_p7 }
  0x6e   : > { %p1559_p1 = por %p1558_p10, %p1557_p9 }
  0x6f   : > { %p1553_p8 = pneg %p1552_p6 }
  0x71   : > { %p1560_p3 = pnand %p1559_p1, %p1553_p8 }
  0x73   : > { %1563 = shalt.err (!%p1560_p3)
}
  0x74   : > { %1332 = dma.hbm_to_vmem [thread:$0]  (!%p2086_p5), %s2595_s5, 16, %s396_s19, [#allocation12]  }
  0x75   : > { %s1953_s29 = smov [#allocation14]   ;;  %s1954_s13 = smov [#allocation17]  }
  0x76   : > { %s419_s20 = sshll.u32 %s1953_s29, 4  ;;  %s443_s16 = sshll.u32 %s1954_s13, 4  ;;  %s420_s20 = int_to_ptr.vmem [resolvable:$true] %s419_s20  ;;  %s444_s16 = int_to_ptr.vmem [resolvable:$true] %s443_s16 }
  0x77   : > { %s2596_s7 = sld [smem:[#allocation44_spill]] }
  0x7d   : > { %s1564_s14 = scalar_lea.hbm %s2596_s7, 16 }
  0x7e   : > { %p1565_p1 = scmp.ne.s32.totalorder %s2596_s7, %s1564_s14  ;;  %p1571_p12 = scmp.lt.u32.totalorder %s1564_s14, %s2596_s7 }
  0x80   : > { %p1567_p3 = pnand %p1565_p1, %p2102_p7 }
  0x82   : > { %p1568_p11 = pneg %p1567_p3 }
  0x84   : > { %p1573_p13 = pnand %p1571_p12, %p1568_p11 }
  0x86   : > { %1576 = shalt.err (!%p1573_p13)
}
  0x87   : > { %s1577_s19 = scalar_lea.vmem %s420_s20, 16  ;;  %s1584_s21 = scalar_lea.vmem %s420_s20, 32 }
  0x88   : > { %p1578_p0 = scmp.ne.s32.totalorder %s420_s20, %s1577_s19  ;;  %p1585_p6 = scmp.lt.s32.totalorder %s420_s20, %s420_s20 }
  0x89   : > { %p1586_p8 = scmp.lt.s32.totalorder %s1584_s21, %s1577_s19 }
  0x8a   : > { %p1580_p2 = pnand %p1578_p0, %p2102_p7 }
  0x8b   : > { %p1587_p9 = por %p1586_p8, %p1585_p6 }
  0x8c   : > { %p1581_p4 = pneg %p1580_p2 }
  0x8e   : > { %p1588_p10 = pnand %p1587_p9, %p1581_p4 }
  0x90   : > { %1591 = shalt.err (!%p1588_p10)
}
  0x91   : > { %1338 = dma.hbm_to_vmem [thread:$0]  (!%p2086_p5), %s2596_s7, 16, %s420_s20, [#allocation15]  }
  0x92   : > { %s2597_s9 = sld [smem:[#allocation46_spill]] }
  0x98   : > { %s1592_s12 = scalar_lea.hbm %s2597_s9, 16 }
  0x99   : > { %p1593_p1 = scmp.ne.s32.totalorder %s2597_s9, %s1592_s12  ;;  %p1599_p12 = scmp.lt.u32.totalorder %s1592_s12, %s2597_s9 }
  0x9b   : > { %p1595_p3 = pnand %p1593_p1, %p2102_p7 }
  0x9d   : > { %p1596_p11 = pneg %p1595_p3 }
  0x9f   : > { %p1601_p13 = pnand %p1599_p12, %p1596_p11 }
  0xa1   : > { %1604 = shalt.err (!%p1601_p13)
}
  0xa2   : > { %s1605_s19 = scalar_lea.vmem %s444_s16, 16  ;;  %s1612_s20 = scalar_lea.vmem %s444_s16, 32 }
  0xa3   : > { %p1606_p0 = scmp.ne.s32.totalorder %s444_s16, %s1605_s19  ;;  %p1613_p6 = scmp.lt.s32.totalorder %s444_s16, %s444_s16 }
  0xa4   : > { %p1614_p8 = scmp.lt.s32.totalorder %s1612_s20, %s1605_s19 }
  0xa5   : > { %p1608_p2 = pnand %p1606_p0, %p2102_p7 }
  0xa6   : > { %p1615_p9 = por %p1614_p8, %p1613_p6 }
  0xa7   : > { %p1609_p4 = pneg %p1608_p2 }
  0xa9   : > { %p1616_p10 = pnand %p1615_p9, %p1609_p4 }
  0xab   : > { %1619 = shalt.err (!%p1616_p10)
}
  0xac   : > { %1344 = dma.hbm_to_vmem [thread:$0]  (!%p2086_p5), %s2597_s9, 16, %s444_s16, [#allocation18]  }
  0xad   : > { %s1955_s13 = smov [#allocation10]   ;;  %s1956_s18 = smov [#allocation13]  }
  0xae   : > { %s384_s24 = sshll.u32 %s1955_s13, 4  ;;  %s405_s12 = sshll.u32 %s1956_s18, 4  ;;  %s385_s24 = int_to_ptr.vmem [resolvable:$true] %s384_s24  ;;  %s406_s12 = int_to_ptr.vmem [resolvable:$true] %s405_s12 }
  0xaf   : > { %s2598_s4 = sld [smem:[#allocation41_spill]] }
  0xb5   : > { %s1620_s17 = scalar_lea.hbm %s2598_s4, 16 }
  0xb6   : > { %p1621_p1 = scmp.ne.s32.totalorder %s2598_s4, %s1620_s17  ;;  %p1627_p12 = scmp.lt.u32.totalorder %s1620_s17, %s2598_s4 }
  0xb8   : > { %p1623_p3 = pnand %p1621_p1, %p2102_p7 }
  0xba   : > { %p1624_p11 = pneg %p1623_p3 }
  0xbc   : > { %p1629_p13 = pnand %p1627_p12, %p1624_p11 }
  0xbe   : > { %1632 = shalt.err (!%p1629_p13)
}
  0xbf   : > { %s1633_s16 = scalar_lea.vmem %s385_s24, 16  ;;  %s1640_s29 = scalar_lea.vmem %s385_s24, 32 }
  0xc0   : > { %p1634_p0 = scmp.ne.s32.totalorder %s385_s24, %s1633_s16  ;;  %p1641_p6 = scmp.lt.s32.totalorder %s385_s24, %s385_s24 }
  0xc1   : > { %p1642_p8 = scmp.lt.s32.totalorder %s1640_s29, %s1633_s16 }
  0xc2   : > { %p1636_p2 = pnand %p1634_p0, %p2102_p7 }
  0xc3   : > { %p1643_p9 = por %p1642_p8, %p1641_p6 }
  0xc4   : > { %p1637_p4 = pneg %p1636_p2 }
  0xc6   : > { %p1644_p10 = pnand %p1643_p9, %p1637_p4 }
  0xc8   : > { %1647 = shalt.err (!%p1644_p10)
}
  0xc9   : > { %1329 = dma.hbm_to_vmem [thread:$0]  (!%p2086_p5), %s2598_s4, 16, %s385_s24, [#allocation9]  }
  0xca   : > { %s2599_s6 = sld [smem:[#allocation43_spill]] }
  0xd0   : > { %s1648_s17 = scalar_lea.hbm %s2599_s6, 256 }
  0xd1   : > { %p1649_p1 = scmp.ne.s32.totalorder %s2599_s6, %s1648_s17  ;;  %p1655_p12 = scmp.lt.u32.totalorder %s1648_s17, %s2599_s6 }
  0xd3   : > { %p1651_p3 = pnand %p1649_p1, %p2102_p7 }
  0xd5   : > { %p1652_p11 = pneg %p1651_p3 }
  0xd7   : > { %p1657_p13 = pnand %p1655_p12, %p1652_p11 }
  0xd9   : > { %1660 = shalt.err (!%p1657_p13)
}
  0xda   : > { %s1661_s16 = scalar_lea.vmem %s406_s12, 256  ;;  %p1669_p6 = scmp.lt.s32.totalorder %s406_s12, %s406_s12 }
  0xdb   : > { %p1662_p0 = scmp.ne.s32.totalorder %s406_s12, %s1661_s16  ;;  %p1670_p8 = scmp.lt.s32.totalorder %s1661_s16, %s1661_s16 }
  0xdd   : > { %p1664_p2 = pnand %p1662_p0, %p2102_p7  ;;  %p1671_p9 = por %p1670_p8, %p1669_p6 }
  0xdf   : > { %p1665_p4 = pneg %p1664_p2 }
  0xe1   : > { %p1672_p10 = pnand %p1671_p9, %p1665_p4 }
  0xe3   : > { %1675 = shalt.err (!%p1672_p10)
}
  0xe4   : > { %s2600_s24 = smov 64   ;;  %s1957_s18 = smov [#allocation16]  }
  0xe5   : > { %1335 = dma.hbm_to_vmem [thread:$0]  (!%p2086_p5), %s2599_s6, 256, %s406_s12, [#allocation12], %s2600_s24, %s2600_s24, %s1952_s25  }
  0xe6   : > { %s429_s14 = sshll.u32 %s1957_s18, 4  ;;  %s1958_s0 = smov [#allocation19]   ;;  %s430_s14 = int_to_ptr.vmem [resolvable:$true] %s429_s14 }
  0xe7   : > { %s454_s17 = sshll.u32 %s1958_s0, 4  ;;  %s2601_s8 = sld [smem:[#allocation45_spill]]  ;;  %s455_s17 = int_to_ptr.vmem [resolvable:$true] %s454_s17 }
  0xed   : > { %s1676_s20 = scalar_lea.hbm %s2601_s8, 1024 }
  0xee   : > { %p1677_p1 = scmp.ne.s32.totalorder %s2601_s8, %s1676_s20  ;;  %p1683_p12 = scmp.lt.u32.totalorder %s1676_s20, %s2601_s8 }
  0xf0   : > { %p1679_p3 = pnand %p1677_p1, %p2102_p7 }
  0xf2   : > { %p1680_p11 = pneg %p1679_p3 }
  0xf4   : > { %p1685_p13 = pnand %p1683_p12, %p1680_p11 }
  0xf6   : > { %1688 = shalt.err (!%p1685_p13)
}
  0xf7   : > { %s1689_s12 = scalar_lea.vmem %s430_s14, 1024  ;;  %p1697_p6 = scmp.lt.s32.totalorder %s430_s14, %s430_s14 }
  0xf8   : > { %p1690_p0 = scmp.ne.s32.totalorder %s430_s14, %s1689_s12  ;;  %p1698_p8 = scmp.lt.s32.totalorder %s1689_s12, %s1689_s12 }
  0xfa   : > { %p1692_p2 = pnand %p1690_p0, %p2102_p7  ;;  %p1699_p9 = por %p1698_p8, %p1697_p6 }
  0xfc   : > { %p1693_p4 = pneg %p1692_p2 }
  0xfe   : > { %p1700_p10 = pnand %p1699_p9, %p1693_p4 }
 0x100   : > { %1703 = shalt.err (!%p1700_p10)
}
 0x101   : > { %1341 = dma.hbm_to_vmem [thread:$0]  (!%p2086_p5), %s2601_s8, 1024, %s430_s14, [#allocation15], %s2600_s24, %s2600_s24, %s1952_s25  }
 0x102   : > { %s1704_s1 = scalar_lea.hbm %s2558_s10, 16 }
 0x103   : > { %p1705_p1 = scmp.ne.s32.totalorder %s2558_s10, %s1704_s1  ;;  %p1711_p12 = scmp.lt.u32.totalorder %s1704_s1, %s2558_s10 }
 0x105   : > { %p1707_p3 = pnand %p1705_p1, %p2102_p7 }
 0x107   : > { %p1708_p11 = pneg %p1707_p3 }
 0x109   : > { %p1713_p13 = pnand %p1711_p12, %p1708_p11 }
 0x10b   : > { %1716 = shalt.err (!%p1713_p13)
}
 0x10c   : > { %s1717_s29 = scalar_lea.vmem %s455_s17, 16  ;;  %s1724_s25 = scalar_lea.vmem %s455_s17, 32 }
 0x10d   : > { %p1718_p0 = scmp.ne.s32.totalorder %s455_s17, %s1717_s29  ;;  %p1725_p6 = scmp.lt.s32.totalorder %s455_s17, %s455_s17 }
 0x10e   : > { %p1726_p8 = scmp.lt.s32.totalorder %s1724_s25, %s1717_s29 }
 0x10f   : > { %p1720_p2 = pnand %p1718_p0, %p2102_p7 }
 0x110   : > { %p1727_p9 = por %p1726_p8, %p1725_p6 }
 0x111   : > { %p1721_p4 = pneg %p1720_p2 }
 0x113   : > { %p1728_p10 = pnand %p1727_p9, %p1721_p4 }
 0x115   : > { %1731 = shalt.err (!%p1728_p10)
}
 0x116   : > { %1347 = dma.hbm_to_vmem [thread:$0]  (!%p2086_p5), %s2558_s10, 16, %s455_s17, [#allocation18]  }
 0x117   : > { %s1959_s12 = smov [#allocation20]   ;;  %s1732_s0 = scalar_lea.hbm %s2559_s11, 16 }
 0x118   : > { %s465_s2 = sshll.u32 %s1959_s12, 4  ;;  %p1733_p1 = scmp.ne.s32.totalorder %s2559_s11, %s1732_s0  ;;  %s466_s2 = int_to_ptr.vmem [resolvable:$true] %s465_s2 }
 0x119   : > { %p1739_p12 = scmp.lt.u32.totalorder %s1732_s0, %s2559_s11 }
 0x11a   : > { %p1735_p3 = pnand %p1733_p1, %p2102_p7 }
 0x11c   : > { %p1736_p11 = pneg %p1735_p3 }
 0x11e   : > { %p1741_p13 = pnand %p1739_p12, %p1736_p11 }
 0x120   : > { %1744 = shalt.err (!%p1741_p13)
}
 0x121   : > { %s1745_s17 = scalar_lea.vmem %s466_s2, 16  ;;  %s1752_s16 = scalar_lea.vmem %s466_s2, 32 }
 0x122   : > { %p1746_p0 = scmp.ne.s32.totalorder %s466_s2, %s1745_s17  ;;  %p1753_p6 = scmp.lt.s32.totalorder %s466_s2, %s466_s2 }
 0x123   : > { %p1754_p8 = scmp.lt.s32.totalorder %s1752_s16, %s1745_s17 }
 0x124   : > { %p1748_p2 = pnand %p1746_p0, %p2102_p7 }
 0x125   : > { %p1755_p9 = por %p1754_p8, %p1753_p6 }
 0x126   : > { %p1749_p4 = pneg %p1748_p2 }
 0x128   : > { %p1756_p10 = pnand %p1755_p9, %p1749_p4 }
 0x12a   : > { %1759 = shalt.err (!%p1756_p10)
}
 0x12b   : > { %s2602_s30 = sld [smem:[#allocation32_spill]]  ;;  %s2603_s24 = sld [smem:[#allocation35_spill]] }
 0x12c   : > { %1350 = dma.hbm_to_vmem [thread:$0]  (!%p2086_p5), %s2559_s11, 16, %s466_s2, [#allocation21]  }
 0x12d   : > { %s1164_s14 = sadd.s32 4294967294, %s1946_s28   ;;  %s45_s12 = sadd.s32 1, %s1938_s26 }
 0x12e   : > { %p46_p7 = scmp.ge.s32.totalorder %s45_s12, 2  ;;  %s48_s15 = sadd.s32 1, %s1942_s27 }
 0x12f   : > { %s57_s13 = sadd.s32 1, %s1926_s23  ;;  %p64_p1 = scmp.ne.s32.totalorder %s1926_s23, %s1922_s22 }
 0x130   : > { %s2642_s12 = smov (%p46_p7, %s45_s12), 0  ;;  %s2644_s15 = smov (!%p46_p7, %s48_s15), %s1942_s27 }
 0x131   : > { %s53_s18 = ssub.s32 %s1938_s26, %s2642_s12  ;;  %p65_p3 = scmp.eq.s32.totalorder %s1946_s28, 0 }
 0x132   : > { %p50_p11 = scmp.ge.s32.totalorder %s2644_s15, 2  ;;  %p70_p5 = scmp.ne.s32.totalorder %s1922_s22, %s2602_s30 }
 0x133   : > { %p2315_p12 = por %p65_p3, %p64_p1  ;;  %p334_p13 = scmp.eq.s32.totalorder %s2603_s24, 3 }
 0x134   : > { %s2646_s15 = smov (%p50_p11, %s2644_s15), 0  ;;  %p2605_p0 = scmp.eq.s32.totalorder %s2603_s24, 0 }
 0x135   : > { %p2328_p4 = por %p334_p13, %p64_p1  ;;  %s52_s19 = ssub.s32 %s1942_s27, %s2646_s15 }
 0x136   : > { %p2324_p2 = por %p2605_p0, %p70_p5  ;;  %p340_p6 = scmp.eq.s32.totalorder %s1164_s14, 3 }
 0x137   : > { %s2607_s1 = scalar_select %p2328_p4, 1, 0 }
 0x138   : > { %s2606_s0 = scalar_select %p2324_p2, 1, 0 }
 0x139   : > { %s54_s20 = sor.u32 %s53_s18, %s52_s19  ;;  %p1372_p8 = scmp.lt.s32.totalorder %s1946_s28, 4 }
 0x13a   : > { %p55_p9 = scmp.eq.s32.totalorder %s54_s20, 0  ;;  %p2335_p10 = por %p340_p6, %p70_p5 }
 0x13b   : > { %s476_s17 = sand.u32 1, %s1926_s23   ;;  %s1178_s16 = sshll.u32 %s1942_s27, 1 }
 0x13c   : > { %s2608_s21 = scalar_select %p2335_p10, 1, 0 }
 0x13d   : > { %s2342_s29 = scalar_select %p55_p9, %s1926_s23, %s57_s13  }
 0x13e   : > { %s2344_s25 = sshll.u32 %s476_s17, 2  ;;  %s485_s30 = sadd.s32 %s1938_s26, %s1178_s16 }
 0x13f   : > { %s1179_s24 = sshll.u32 %s485_s30, 6  ;;  %s480_s3 = scalar_lea.vmem [#allocation2], %s2344_s25 }
 0x140   : > { %s489_s4 = sshll.u32 %s480_s3, 4  ;;  %s2609_s19 = sld [smem:[#allocation37_spill]]  ;;  %s2353_s4 = int_to_ptr.vmem [resolvable:$true] %s489_s4 }
 0x141   : > { %p2359_p7 = pnand %p1372_p8, %p2315_p12  ;;  %s2611_s3 = sld [smem:[#allocation38_spill]] }
 0x142   : > { %s496_s14 = sand.u32 1, %s1946_s28   ;;  %s477_s18 = scalar_lea.sflag [#allocation3], %s476_s17 }
 0x143   : > { %p1762_p3 = pneg %p2359_p7 }
 0x146   : > { %s2351_s5 = scalar_lea.hbm %s2609_s19, %s1179_s24  ;;  %s1765_s8 = scalar_lea.hbm %s2609_s19, 256 }
 0x147   : > { %s2366_s30 = scalar_lea.hbm %s2611_s3, %s1179_s24  ;;  %s1760_s6 = scalar_lea.hbm %s2351_s5, 64 }
 0x148   : > { %p1761_p1 = scmp.ne.s32.totalorder %s2351_s5, %s1760_s6  ;;  %p1766_p12 = scmp.lt.u32.totalorder %s2351_s5, %s2609_s19 }
 0x149   : > { %p1767_p13 = scmp.lt.u32.totalorder %s1765_s8, %s1760_s6  ;;  %p1769_p6 = scmp.lt.u32.totalorder %s1760_s6, %s2351_s5 }
 0x14a   : > { %p1763_p11 = pnand %p1762_p3, %p1761_p1 }
 0x14b   : > { %p1768_p0 = por %p1767_p13, %p1766_p12 }
 0x14c   : > { %p1764_p5 = pneg %p1763_p11 }
 0x14d   : > { %p1770_p8 = por %p1769_p6, %p1768_p0 }
 0x14f   : > { %p1771_p9 = pnand %p1770_p8, %p1764_p5 }
 0x151   : > { %1774 = shalt.err (!%p1771_p9)
}
 0x152   : > { %s1775_s17 = scalar_lea.vmem %s2353_s4, 64  ;;  %s1960_s7 = smov [#allocation2]  }
 0x153   : > { %p1776_p1 = scmp.ne.s32.totalorder %s2353_s4, %s1775_s17  ;;  %s1780_s24 = sshll.u32 %s1960_s7, 4  ;;  %s1781_s24 = int_to_ptr.vmem [resolvable:$false] %s1780_s24 }
 0x154   : > { %s1782_s9 = scalar_lea.vmem %s1781_s24, 128  ;;  %p1783_p4 = scmp.lt.s32.totalorder %s2353_s4, %s1781_s24 }
 0x155   : > { %p1778_p11 = pnand %p1776_p1, %p1762_p3  ;;  %p1784_p12 = scmp.lt.s32.totalorder %s1782_s9, %s1775_s17 }
 0x157   : > { %p1779_p10 = pneg %p1778_p11  ;;  %p1785_p13 = por %p1784_p12, %p1783_p4 }
 0x159   : > { %p1786_p0 = pnand %p1785_p13, %p1779_p10 }
 0x15b   : > { %1789 = shalt.err (!%p1786_p0)
}
 0x15c   : > { %1354 = dma.hbm_to_vmem [thread:$0]  (!%p2359_p7), %s2351_s5, 64, %s2353_s4, %s477_s18  }
 0x15d   : > { %s500_s6 = scalar_lea.vmem [#allocation5], %s2344_s25  ;;  %s497_s16 = scalar_lea.sflag [#allocation6], %s496_s14 }
 0x15e   : > { %s509_s8 = sshll.u32 %s500_s6, 4  ;;  %s1790_s2 = scalar_lea.hbm %s2366_s30, 64  ;;  %s510_s8 = int_to_ptr.vmem [resolvable:$true] %s509_s8 }
 0x15f   : > { %p1791_p4 = scmp.ne.s32.totalorder %s2366_s30, %s1790_s2  ;;  %s1795_s7 = scalar_lea.hbm %s2611_s3, 256 }
 0x160   : > { %p1796_p6 = scmp.lt.u32.totalorder %s2366_s30, %s2611_s3  ;;  %p1797_p8 = scmp.lt.u32.totalorder %s1795_s7, %s1790_s2 }
 0x161   : > { %p1793_p10 = pnand %p1791_p4, %p1762_p3  ;;  %p1799_p1 = scmp.lt.u32.totalorder %s1790_s2, %s2366_s30 }
 0x162   : > { %p1798_p9 = por %p1797_p8, %p1796_p6 }
 0x163   : > { %p1794_p5 = pneg %p1793_p10 }
 0x164   : > { %p1800_p11 = por %p1799_p1, %p1798_p9 }
 0x166   : > { %p1801_p12 = pnand %p1800_p11, %p1794_p5 }
 0x168   : > { %1804 = shalt.err (!%p1801_p12)
}
 0x169   : > { %s1805_s4 = scalar_lea.vmem %s510_s8, 64  ;;  %s1961_s5 = smov [#allocation5]  }
 0x16a   : > { %p1806_p13 = scmp.ne.s32.totalorder %s510_s8, %s1805_s4  ;;  %s1810_s25 = sshll.u32 %s1961_s5, 4  ;;  %s1811_s25 = int_to_ptr.vmem [resolvable:$false] %s1810_s25 }
 0x16b   : > { %s1812_s14 = scalar_lea.vmem %s1811_s25, 128  ;;  %p1813_p10 = scmp.lt.s32.totalorder %s510_s8, %s1811_s25 }
 0x16c   : > { %p1808_p0 = pnand %p1806_p13, %p1762_p3  ;;  %p1814_p2 = scmp.lt.s32.totalorder %s1812_s14, %s1805_s4 }
 0x16e   : > { %p1809_p4 = pneg %p1808_p0  ;;  %p1815_p6 = por %p1814_p2, %p1813_p10 }
 0x170   : > { %p1816_p8 = pnand %p1815_p6, %p1809_p4 }
 0x172   : > { %1819 = shalt.err (!%p1816_p8)
}
 0x173   : > { %1357 = dma.hbm_to_vmem [thread:$0]  (!%p2359_p7), %s2366_s30, 64, %s510_s8, %s497_s16  }
 0x174   : > { %s2612_s18 = sld [smem:[#allocation36_spill]] }
 0x17a   : > { %p2613_p5 = scmp.ne.s32.totalorder %s2612_s18, 0 }
 0x17b   : > { %s2419_s6 = sand.u32 (!%p2613_p5), 1, %s1922_s22   ;;  %p2614_p2 = scmp.ne.s32.totalorder (!%p2613_p5), %s2606_s0, 0 }
 0x17c   : > { %518 = sbr.rel (%p2613_p5) target bundleno = 1743 (0x6cf), region = 68  ;;  %s2422_s2 = sshll.u32 (!%p2613_p5), %s2419_s6, 2 }
 0x17d   : > { %s521_s20 = scalar_lea.sflag (!%p2613_p5), [#allocation3], %s2419_s6  ;;  %s524_s17 = scalar_lea.vmem (!%p2613_p5), [#allocation2], %s2422_s2 }
 0x183   : > { %1881 = dma.done.wait (%p2614_p2), %s521_s20, 64  }
 0x184   : > { %1883 = vsyncadd (%p2614_p2), %s521_s20, 4294967232  ;;  %s2615_s13 = sld [smem:[#allocation35_spill]]  ;;  %s533_s16 = scalar_lea.vmem [#allocation5], %s2422_s2 }
 0x18a   : > { %s529_s30 = sand.u32 1, %s2615_s13  }
 0x18b   : > { %s530_s8 = scalar_lea.sflag [#allocation6], %s529_s30 }
 0x18c   : > { %1885 = dma.done.wait (%p2614_p2), %s530_s8, 64  }
 0x18d   : > { %1887 = vsyncadd (%p2614_p2), %s530_s8, 4294967232  ;;  %p2616_p7 = scmp.eq.s32.totalorder %s2615_s13, 0 }
 0x18f   : > { %1889 = dma.done.wait (%p2616_p7), [#allocation6], 256   ;;  %p2617_p3 = pmov %p2616_p7 }
 0x191   : > { %1891 = vsyncadd (%p2617_p3), [#allocation6], 4294967040  ;;  %p2618_p9 = pmov %p2617_p3 }
 0x192   : > { %p2619_p1 = pmov %p2617_p3 }
 0x193   : > { %1893 = dma.done.wait (%p2618_p9), [#allocation9], 32  }
 0x194   : > { %1895 = vsyncadd (%p2619_p1), [#allocation9], 4294967264  ;;  %p2620_p11 = pmov %p2619_p1 }
 0x195   : > { %p2621_p12 = pmov %p2619_p1 }
 0x196   : > { %1897 = dma.done.wait (%p2620_p11), [#allocation12], 272  }
 0x197   : > { %1899 = vsyncadd (%p2621_p12), [#allocation12], 4294967024  ;;  %p2622_p13 = pmov %p2619_p1 }
 0x198   : > { %p2623_p0 = pmov %p2619_p1 }
 0x199   : > { %1901 = dma.done.wait (%p2622_p13), [#allocation15], 1040  }
 0x19a   : > { %1903 = vsyncadd (%p2623_p0), [#allocation15], 4294966256  ;;  %p2624_p4 = pmov %p2623_p0 }
 0x19b   : > { %p2625_p10 = pmov %p2623_p0 }
 0x19c   : > { %1905 = dma.done.wait (%p2624_p4), [#allocation18], 32  }
 0x19d   : > { %1907 = vsyncadd (%p2625_p10), [#allocation18], 4294967264  ;;  %p2626_p6 = pmov %p2623_p0 }
 0x19e   : > { %p2627_p8 = pmov %p2623_p0 }
 0x19f   : > { %1909 = dma.done.wait (%p2626_p6), [#allocation21], 16  }
 0x1a0   : > { %1911 = vsyncadd (%p2627_p8), [#allocation21], 4294967280  ;;  %v1962_v0 = vmov 0.0   ;;  %vm1963_vm0 = vmmov 0   ;;  %v1462_v1 = vld [vmem:[#allocation7] sm:$0xff]   ;;  %v1463_v2 = vld [vmem:[#allocation7 + $0x8] sm:$0xff]  }
 0x1a1   : > { %1238 = vmatprep.subr.bf16.mxu1 %v1962_v0  ;;  %1242 = vmatprep.mubr.msk.bf16.mxu1 %vm1963_vm0, %v1962_v0  ;;  %vm646_vm1 = vcmask 261120   ;;  %v622_v3 = vld [vmem:[%s533_s16] sm:$0xf]  ;;  %v620_v4 = vld [vmem:[%s524_s17] sm:$0xf]  ;;  %v1466_v21 = vld [vmem:[#allocation16] sm:$0xff]  }
 0x1a2   : > { %1254 = vmatprep.subr.bf16.mxu0 %v1962_v0  ;;  %1270 = vmatprep.mubr.msk.bf16.mxu0 %vm1963_vm0, %v1962_v0  ;;  %v1197_v5 = vld [vmem:[#allocation8] ss:$0 sm:$0xff]  ;;  %v621_v6 = vunpack.c.l.bf16 %v620_v4  ;;  %v1464_v19 = vld [vmem:[#allocation13] sm:$0xff]   ;;  %v1465_v20 = vld [vmem:[#allocation13 + $0x8] sm:$0xff]   ;;  %s2628_s0 = sld [smem:[#allocation34_spill]]  ;;  %s2629_s7 = sld [smem:[#allocation33_spill]] }
 0x1a3   : > { %1239 = vmatpush3.bf16.msra.mxu1 %v1462_v1  ;;  %1255 = vmatpush3.bf16.msra.mxu0 %v1466_v21  ;;  %v1201_v26 = vld [vmem:[#allocation10] ss:$0 sm:$0xff]  ;;  %v1202_v28 = vld [vmem:[#allocation11] ss:$0 sm:$0xff]  ;;  %v1468_v33 = vld [vmem:[#allocation16 + $0x10] sm:$0xff]   ;;  %s618_s5 = scalar_lea.vmem [#allocation22], %s2422_s2 }
 0x1a4   : > { %1240 = vmatprep.subr.bf16.mxu1 %v1962_v0  ;;  %1256 = vmatprep.subr.bf16.mxu0 %v1962_v0  ;;  %v1467_v32 = vld [vmem:[#allocation16 + $0x8] sm:$0xff]   ;;  %v1469_v34 = vld [vmem:[#allocation16 + $0x18] sm:$0xff]   ;;  %v1470_v35 = vld [vmem:[#allocation16 + $0x20] sm:$0xff]   ;;  %s958_s25 = sshll.u32 %s618_s5, 4  ;;  %vm940_vm2 = vcmask 257024   ;;  %s2630_s20 = sld [smem:[#allocation47_spill]]  ;;  %s2496_s25 = int_to_ptr.vmem [resolvable:$true] %s958_s25 }
 0x1a5   : > { %v1471_v36 = vld [vmem:[#allocation16 + $0x28] sm:$0xff]   ;;  %v1472_v37 = vld [vmem:[#allocation16 + $0x30] sm:$0xff]   ;;  %v1473_v38 = vld [vmem:[#allocation16 + $0x38] sm:$0xff]   ;;  %s943_s13 = scalar_lea.sflag [#allocation4], %s2419_s6  ;;  %s1820_s30 = scalar_lea.vmem %s2496_s25, 64 }
 0x1a6   : > { %v1203_v39 = vld [vmem:[#allocation14] ss:$0 sm:$0xff]  ;;  %v1207_v55 = vld [vmem:[#allocation17] ss:$0 sm:$0xff]  ;;  %p1821_p5 = scmp.ne.s32.totalorder %s2496_s25, %s1820_s30  ;;  %p2631_p2 = scmp.ne.s32.totalorder %s2607_s1, 0 }
 0x1a7   : > { %1241 = vmatpush3.bf16.msra.mxu1 %v1463_v2  ;;  %1257 = vmatpush3.bf16.msra.mxu0 %v1467_v32  ;;  %s1964_s2 = smov [#allocation22]  }
 0x1a8   : > { %1246 = vmatprep.subr.bf16.mxu1 %v1962_v0  ;;  %1258 = vmatprep.subr.bf16.mxu0 %v1962_v0  ;;  %s1219_s24 = sshll.u32 %s2628_s0, 1  ;;  %p1822_p7 = pnand %p1821_p5, %p2631_p2 }
 0x1a9   : > { %s954_s9 = sadd.s32 %s2629_s7, %s1219_s24  ;;  %s1824_s8 = sshll.u32 %s1964_s2, 4  ;;  %s1825_s8 = int_to_ptr.vmem [resolvable:$false] %s1824_s8 }
 0x1aa   : > { %1243 = vmatmul.mubr.msk.bf16.vlgmr.msra.gmra.mrb[0].mxu1 %vm646_vm1, %v622_v3  ;;  %s1220_s4 = sshll.u32 %s954_s9, 6  ;;  %p1823_p3 = pneg %p1822_p7 }
 0x1ab   : > { %1250 = vmatprep.mubr.msk.bf16.mxu1 %vm1963_vm0, %v1962_v0  ;;  %1247 = vmatpush3.bf16.msra.mxu1 %v1464_v19  ;;  %s2494_s17 = scalar_lea.hbm %s2630_s20, %s1220_s4  ;;  %s1826_s16 = scalar_lea.vmem %s1825_s8, 128 }
 0x1ac   : > { %1248 = vmatprep.subr.bf16.mxu1 %v1962_v0  ;;  %1259 = vmatpush3.bf16.msra.mxu0 %v1468_v33  ;;  %p1827_p9 = scmp.lt.s32.totalorder %s2496_s25, %s1825_s8  ;;  %p1828_p1 = scmp.lt.s32.totalorder %s1826_s16, %s1820_s30 }
 0x1ad   : > { %1260 = vmatprep.subr.bf16.mxu0 %v1962_v0 }
 0x1ae   : > { %p1829_p11 = por %p1828_p1, %p1827_p9 }
 0x1af   : > { %1249 = vmatpush3.bf16.msra.mxu1 %v1465_v20 }
 0x1b0   : > { %1261 = vmatpush3.bf16.msra.mxu0 %v1469_v34  ;;  %p1830_p12 = pnand %p1829_p11, %p1823_p3 }
 0x1b1   : > { %1262 = vmatprep.subr.bf16.mxu0 %v1962_v0 }
 0x1b4   : > { %1263 = vmatpush3.bf16.msra.mxu0 %v1470_v35 }
 0x1b5   : > { %1264 = vmatprep.subr.bf16.mxu0 %v1962_v0 }
 0x1b8   : > { %1265 = vmatpush3.bf16.msra.mxu0 %v1471_v36 }
 0x1b9   : > { %1266 = vmatprep.subr.bf16.mxu0 %v1962_v0 }
 0x1bc   : > { %1267 = vmatpush3.bf16.msra.mxu0 %v1472_v37 }
 0x1bd   : > { %1268 = vmatprep.subr.bf16.mxu0 %v1962_v0 }
 0x1c0   : > { %1269 = vmatpush3.bf16.msra.mxu0 %v1473_v38 }
 0x27d   : > { %v684_v7 = vpop.f32.mrb[0].mxu1 }
 0x27e   : > { %v685_v8 = vadd.f32 %v1197_v5, %v684_v7  ;;  %v1244_v9 = vpop.f32.mrb[1].mxu1 }
 0x27f   : > { %v687_v10 = vpop.f32.mrb[2].mxu1 }
 0x280   : > { %v2470_v11 = vadd.f32 %v685_v8, %v621_v6  ;;  %v1245_v12 = vpop.f32.mrb[3].mxu1  ;;  %v1216_v8 = vld [vmem:[#allocation19] ss:$0 sm:$0xff]  ;;  %v1217_v10 = vld [vmem:[#allocation20] ss:$0 sm:$0xff] }
 0x282   : > { %v693_v13 = vsel %vm646_vm1, %v2470_v11, 0.0 }
 0x283   : > { %694 = vadd.xlane.f32.xlu0 %v693_v13 }
 0x310   : > { %v695_v14 = vpop.xlane.xlu0 %694 }
 0x311   : > { %v697_v15 = vmul.f32 0.03125, %v695_v14 }
 0x313   : > { %v698_v16 = vsub.f32 %v2470_v11, %v697_v15 }
 0x315   : > { %v699_v17 = vmul.f32 %v698_v16, %v698_v16 }
 0x317   : > { %v700_v18 = vsel %vm646_vm1, %v699_v17, 0.0 }
 0x318   : > { %701 = vadd.xlane.f32.xlu0 %v700_v18 }
 0x3a5   : > { %v702_v22 = vpop.xlane.xlu0 %701 }
 0x3a6   : > { %v703_v23 = vmul.f32 0.03125, %v702_v22 }
 0x3a8   : > { %v704_v24 = vadd.f32 1e-05, %v703_v23 }
 0x3aa   : > { %1474 = vrsqrt.f32 %v704_v24 }
 0x3b4   : > { %v1475_v25 = vpop.eup %1474 }
 0x3b5   : > { %v706_v27 = vmul.f32 %v1475_v25, %v698_v16 }
 0x3b7   : > { %v713_v29 = vmul.f32 %v1201_v26, %v706_v27 }
 0x3b9   : > { %v720_v30 = vadd.f32 %v1202_v28, %v713_v29 }
 0x3bb   : > { %v721_v31 = vpack.c.bf16 %v720_v30, %v720_v30 }
 0x3bd   : > { %1251 = vmatmul.mubr.msk.bf16.vlgmr.msra.gmra.mrb[4].mxu1 %vm646_vm1, %v721_v31 }
 0x490   : > { %v782_v40 = vpop.f32.mrb[4].mxu1 }
 0x491   : > { %v783_v41 = vadd.f32 %v1203_v39, %v782_v40  ;;  %v1252_v42 = vpop.f32.mrb[5].mxu1 }
 0x492   : > { %v785_v43 = vpop.f32.mrb[6].mxu1 }
 0x493   : > { %v789_v44 = vmul.f32 0.044715, %v783_v41  ;;  %v1253_v45 = vpop.f32.mrb[7].mxu1  ;;  %v788_v51 = vmul.f32 0.5, %v783_v41 }
 0x495   : > { %v790_v46 = vmul.f32 %v789_v44, %v783_v41 }
 0x497   : > { %v791_v47 = vmul.f32 %v790_v46, %v783_v41 }
 0x499   : > { %v792_v48 = vadd.f32 %v791_v47, %v783_v41 }
 0x49b   : > { %v793_v49 = vmul.f32 0.7978846, %v792_v48 }
 0x49d   : > { %1476 = vtanh.f32 %v793_v49 }
 0x4a7   : > { %v1477_v50 = vpop.eup %1476 }
 0x4a8   : > { %v795_v52 = vadd.f32 1.0, %v1477_v50 }
 0x4aa   : > { %v796_v53 = vmul.f32 %v795_v52, %v788_v51 }
 0x4ac   : > { %v797_v54 = vpack.c.bf16 %v796_v53, %v796_v53 }
 0x4ae   : > { %1271 = vmatmul.mubr.bf16.vlgmr.msra.gmra.mrb[0].mxu0 %v797_v54 }
 0x581   : > { %v903_v56 = vpop.f32.mrb[0].mxu0 }
 0x582   : > { %v904_v57 = vadd.f32 %v1207_v55, %v903_v56  ;;  %v1272_v58 = vpop.f32.mrb[1].mxu0 }
 0x583   : > { %v906_v59 = vpop.f32.mrb[2].mxu0 }
 0x584   : > { %v1273_v60 = vpop.f32.mrb[3].mxu0  ;;  %v909_v61 = vadd.f32 %v904_v57, %v2470_v11 }
 0x586   : > { %v912_v62 = vsel %vm646_vm1, %v909_v61, 0.0 }
 0x587   : > { %913 = vadd.xlane.f32.xlu1 %v912_v62 }
 0x614   : > { %v914_v63 = vpop.xlane.xlu1 %913 }
 0x615   : > { %v915_v0 = vmul.f32 0.03125, %v914_v63 }
 0x617   : > { %v916_v1 = vsub.f32 %v909_v61, %v915_v0 }
 0x619   : > { %v917_v2 = vmul.f32 %v916_v1, %v916_v1 }
 0x61b   : > { %v918_v3 = vsel %vm646_vm1, %v917_v2, 0.0 }
 0x61c   : > { %919 = vadd.xlane.f32.xlu1 %v918_v3 }
 0x6a9   : > { %v920_v4 = vpop.xlane.xlu1 %919 }
 0x6aa   : > { %v921_v5 = vmul.f32 0.03125, %v920_v4 }
 0x6ac   : > { %v922_v6 = vadd.f32 1e-05, %v921_v5 }
 0x6ae   : > { %1478 = vrsqrt.f32 %v922_v6 }
 0x6b8   : > { %v1479_v7 = vpop.eup %1478 }
 0x6b9   : > { %v924_v9 = vmul.f32 %v1479_v7, %v916_v1 }
 0x6bb   : > { %v931_v11 = vmul.f32 %v1216_v8, %v924_v9 }
 0x6bd   : > { %v938_v12 = vadd.f32 %v1217_v10, %v931_v11 }
 0x6bf   : > { %v939_v13 = vpack.c.bf16 %v938_v12, %v938_v12 }
 0x6c1   : > { %941 = vst.msk [vmem:[%s618_s5] sm:$0xf] %vm940_vm2, %v939_v13 }
 0x6c2   : > { %1833 = shalt.err (!%p1830_p12)
}
 0x6c3   : > { %s1834_s6 = scalar_lea.hbm %s2494_s17, 64  ;;  %s1838_s24 = scalar_lea.hbm %s2630_s20, 256 }
 0x6c4   : > { %p1835_p13 = scmp.ne.s32.totalorder %s2494_s17, %s1834_s6  ;;  %p1839_p10 = scmp.lt.u32.totalorder %s2494_s17, %s2630_s20 }
 0x6c5   : > { %p1840_p6 = scmp.lt.u32.totalorder %s1838_s24, %s1834_s6  ;;  %p1842_p5 = scmp.lt.u32.totalorder %s1834_s6, %s2494_s17 }
 0x6c6   : > { %p1836_p0 = pnand %p1835_p13, %p2631_p2 }
 0x6c7   : > { %p1841_p8 = por %p1840_p6, %p1839_p10 }
 0x6c8   : > { %p1837_p4 = pneg %p1836_p0 }
 0x6c9   : > { %p1843_p7 = por %p1842_p5, %p1841_p8 }
 0x6cb   : > { %p1844_p3 = pnand %p1843_p7, %p1837_p4 }
 0x6cd   : > { %1847 = shalt.err (!%p1844_p3)
}
 0x6ce   : > { %1318 = dma.vmem_to_hbm [thread:$0]  (%p2631_p2), %s2496_s25, 64, %s2494_s17, %s943_s13  }
 0x6cf PF: > { %s2632_s5 = sld [smem:[#allocation32_spill]]  ;;  %p1383_p9 = scmp.ge.s32.totalorder %s1946_s28, 2 }
 0x6d0   : > { %p2633_p1 = scmp.ne.s32.totalorder %s2608_s21, 0 }
 0x6d2   : > { %p1359_p11 = pnand %p1383_p9, %p2633_p1 }
 0x6d5   : > { %s970_s14 = sand.u32 1, %s2632_s5  }
 0x6d6   : > { %s971_s18 = scalar_lea.sflag [#allocation4], %s970_s14 }
 0x6d7   : > { %1913 = dma.done.wait (!%p1359_p11), %s971_s18, 64  }
 0x6d8   : > { %1915 = vsyncadd (!%p1359_p11), %s971_s18, 4294967232  ;;  %s36_s28 = sadd.s32 1, %s1946_s28   ;;  %s2634_s21 = smov %s1922_s22 }
 0x6d9   : > { %p33_p12 = scmp.ge.s32.totalorder %s36_s28, 6   ;;  %s2635_s22 = smov %s1926_s23 }
 0x6da   : > { %s2636_s23 = smov %s2342_s29  ;;  %s2637_s24 = smov %s1938_s26 }
 0x6db   : > { %s2638_s25 = smov %s1942_s27  ;;  %s2639_s26 = smov %s2642_s12 }
 0x6dc   : > { %s2640_s27 = smov %s2646_s15  ;;  %35 = sbr.rel (!%p33_p12) target bundleno = 26 (0x1a), region = 166 }
 0x6e3   :  { %976 = vsyncpa [#allocation3], 1 }
 0x6e4   :  { %978 = vsyncpa [#allocation3 + $0x1], 1 }
 0x6e5   :  { %979 = vsyncpa [#allocation6], 1 }
 0x6e6   :  { %981 = vsyncpa [#allocation6 + $0x1], 1 }
 0x6e7   :  { %982 = vsyncpa [#allocation9], 1 }
 0x6e8   :  { %983 = vsyncpa [#allocation12], 1 }
 0x6e9   :  { %984 = vsyncpa [#allocation15], 1 }
 0x6ea   :  { %985 = vsyncpa [#allocation18], 1 }
 0x6eb   :  { %986 = vsyncpa [#allocation21], 1 }
 0x6ec   :  { %987 = vsyncpa [#allocation4], 1 }
 0x6ed   :  { %989 = vsyncpa [#allocation4 + $0x1], 1 }

// kernel: _lambda_.9
= control target key start
LH: loop header
LB: loop body
LE: loop exit
PB: predicated region body
PF: predicated region fallthrough
CT: control target
= control target key end

     0   :  { %s2513_s0 = inlined_call_operand.hbm [shape: bf16[2,16,32], index: 0, kind: input, shape index: {}, may-alias: {0,12}]   ;;  %s2514_s1 = inlined_call_operand.hbm [shape: bf16[2,16,32], index: 1, kind: input, shape index: {}]   ;;  %s2515_s2 = inlined_call_operand.hbm [shape: bf16[32,32], index: 2, kind: input, shape index: {}]   ;;  %s2516_s3 = inlined_call_operand.hbm [shape: f32[1,32], index: 3, kind: input, shape index: {}]   ;;  %s2517_s4 = inlined_call_operand.hbm [shape: f32[1,32], index: 4, kind: input, shape index: {}]   ;;  %s2518_s5 = inlined_call_operand.hbm [shape: f32[1,32], index: 5, kind: input, shape index: {}]   ;;  %s2519_s6 = inlined_call_operand.hbm [shape: bf16[32,128], index: 6, kind: input, shape index: {}]   ;;  %s2520_s7 = inlined_call_operand.hbm [shape: f32[1,128], index: 7, kind: input, shape index: {}]   ;;  %s2521_s8 = inlined_call_operand.hbm [shape: bf16[128,32], index: 8, kind: input, shape index: {}]   ;;  %s2522_s9 = inlined_call_operand.hbm [shape: f32[1,32], index: 9, kind: input, shape index: {}]   ;;  %s2523_s10 = inlined_call_operand.hbm [shape: f32[1,32], index: 10, kind: input, shape index: {}]   ;;  %s2524_s11 = inlined_call_operand.hbm [shape: f32[1,32], index: 11, kind: input, shape index: {}]   ;;  %s2525_s12 = inlined_call_operand.hbm [shape: bf16[2,16,32], index: 12, kind: output, shape index: {}, may-alias: {0,12}]  }
   0x1   :  { %2539 = sst [smem:[#allocation37_spill]] %s2513_s0 }
   0x2   :  { %2540 = sst [smem:[#allocation38_spill]] %s2514_s1 }
   0x3   :  { %2541 = sst [smem:[#allocation39_spill]] %s2515_s2 }
   0x4   :  { %2542 = sst [smem:[#allocation40_spill]] %s2516_s3 }
   0x5   :  { %2543 = sst [smem:[#allocation41_spill]] %s2517_s4 }
   0x6   :  { %2544 = sst [smem:[#allocation42_spill]] %s2518_s5 }
   0x7   :  { %2545 = sst [smem:[#allocation43_spill]] %s2519_s6 }
   0x8   :  { %2546 = sst [smem:[#allocation44_spill]] %s2520_s7 }
   0x9   :  { %2547 = sst [smem:[#allocation45_spill]] %s2521_s8 }
   0xa   :  { %2548 = sst [smem:[#allocation46_spill]] %s2522_s9 }
   0xb   :  { %2549 = sst [smem:[#allocation47_spill]] %s2525_s12 }
   0xc   :  { %17 = vsyncpa [#allocation3], 0 }
   0xd   :  { %19 = vsyncpa [#allocation3 + $0x1], 0 }
   0xe   :  { %20 = vsyncpa [#allocation6], 0 }
   0xf   :  { %22 = vsyncpa [#allocation6 + $0x1], 0 }
  0x10   :  { %23 = vsyncpa [#allocation9], 0 }
  0x11   :  { %24 = vsyncpa [#allocation12], 0 }
  0x12   :  { %25 = vsyncpa [#allocation15], 0 }
  0x13   :  { %26 = vsyncpa [#allocation18], 0 }
  0x14   :  { %27 = vsyncpa [#allocation21], 0 }
  0x15   :  { %28 = vsyncpa [#allocation4], 0 }
  0x16   :  { %30 = vsyncpa [#allocation4 + $0x1], 0  ;;  %s1997_s21 = smov 0   ;;  %s1999_s22 = smov 0  }
  0x17   :  { %s2001_s23 = smov 0   ;;  %s2003_s24 = smov 0  }
  0x18   :  { %s2005_s25 = smov 0   ;;  %s2007_s26 = smov 0  }
  0x19   :  { %s2009_s27 = smov 0   ;;  %s2011_s28 = smov 0  }
  0x1a LB: > { %2550 = sst [smem:[#allocation32_spill]] %s1885_s21  ;;  %s2038_s29 = sadd.s32 4294967295, %s1913_s28   ;;  %s1913_s28 = sphi %s2011_s28, %s36_s28   ;;  %s1909_s27 = sphi %s2009_s27, %s2605_s27   ;;  %s1905_s26 = sphi %s2007_s26, %s2604_s26   ;;  %s1901_s25 = sphi %s2005_s25, %s2603_s25   ;;  %s1897_s24 = sphi %s2003_s24, %s2602_s24   ;;  %s1893_s23 = sphi %s2001_s23, %s2601_s23   ;;  %s1889_s22 = sphi %s1999_s22, %s2600_s22   ;;  %s1885_s21 = sphi %s1997_s21, %s2599_s21  }
  0x1b   : > { %2551 = sst [smem:[#allocation33_spill]] %s1897_s24  ;;  %p1136_p0 = scmp.ge.s32.totalorder %s1913_s28, 1 }
  0x1c   : > { %2552 = sst [smem:[#allocation34_spill]] %s1901_s25  ;;  %p2533_p1 = scmp.eq.s32.totalorder %s2038_s29, 0 }
  0x1d   : > { %2553 = sst [smem:[#allocation35_spill]] %s2038_s29  ;;  %p347_p2 = scmp.lt.s32.totalorder %s1913_s28, 5 }
  0x1e   : > { %s1915_s13 = smov [#allocation7]   ;;  %s1916_s16 = smov [#allocation8]  }
  0x1f   : > { %p2043_p3 = pnand %p1136_p0, %p347_p2  ;;  %s359_s14 = sshll.u32 %s1915_s13, 4  ;;  %s2047_s14 = int_to_ptr.vmem [resolvable:$true] %s359_s14 }
  0x20   : > { %s373_s17 = sshll.u32 %s1916_s16, 4  ;;  %s1917_s18 = smov [#allocation11]   ;;  %s2057_s17 = int_to_ptr.vmem [resolvable:$true] %s373_s17 }
  0x21   : > { %s2554_s30 = scalar_select %p2043_p3, 1, 0 }
  0x22   : > { %p1289_p4 = pneg %p2043_p3  ;;  %s2059_s19 = sshll.u32 %s1917_s18, 4  ;;  %s396_s19 = int_to_ptr.vmem [resolvable:$true] %s2059_s19 }
  0x23   : > { %2555 = sst [smem:[#allocation36_spill]] %s2554_s30  ;;  %s2557_s2 = sld [smem:[#allocation39_spill]] }
  0x24   : > { %p2053_p5 = pnand %p1289_p4, %p2533_p1 }
  0x26   : > { %p2069_p7 = pneg %p2053_p5 }
  0x29   : > { %s1447_s13 = scalar_lea.hbm %s2557_s2, 256 }
  0x2a   : > { %p1448_p6 = scmp.ne.s32.totalorder %s2557_s2, %s1447_s13  ;;  %p1454_p10 = scmp.lt.u32.totalorder %s1447_s13, %s2557_s2 }
  0x2c   : > { %p1450_p8 = pnand %p2069_p7, %p1448_p6 }
  0x2e   : > { %p1451_p9 = pneg %p1450_p8 }
  0x30   : > { %p1456_p11 = pnand %p1454_p10, %p1451_p9 }
  0x32   : > { %1459 = shalt.err (!%p1456_p11)
}
  0x33   : > { %s1460_s12 = scalar_lea.vmem %s2047_s14, 256  ;;  %p1468_p2 = scmp.lt.s32.totalorder %s2047_s14, %s2047_s14 }
  0x34   : > { %p1461_p12 = scmp.ne.s32.totalorder %s2047_s14, %s1460_s12  ;;  %p1469_p4 = scmp.lt.s32.totalorder %s1460_s12, %s1460_s12 }
  0x36   : > { %p1463_p13 = pnand %p1461_p12, %p2069_p7  ;;  %p1470_p6 = por %p1469_p4, %p1468_p2 }
  0x38   : > { %p1464_p0 = pneg %p1463_p13 }
  0x3a   : > { %p1471_p8 = pnand %p1470_p6, %p1464_p0 }
  0x3c   : > { %1474 = shalt.err (!%p1471_p8)
}
  0x3d   : > { %s2535_s24 = smov 64   ;;  %s1919_s25 = smov 4  }
  0x3e   : > { %1292 = dma.hbm_to_vmem [thread:$0]  (!%p2053_p5), %s2557_s2, 256, %s2047_s14, [#allocation6], %s2535_s24, %s2535_s24, %s1919_s25  }
  0x3f   : > { %s2559_s3 = sld [smem:[#allocation40_spill]] }
  0x45   : > { %s1475_s12 = scalar_lea.hbm %s2559_s3, 16 }
  0x46   : > { %p1476_p9 = scmp.ne.s32.totalorder %s2559_s3, %s1475_s12  ;;  %p1482_p12 = scmp.lt.u32.totalorder %s1475_s12, %s2559_s3 }
  0x48   : > { %p1478_p10 = pnand %p1476_p9, %p2069_p7 }
  0x4a   : > { %p1479_p11 = pneg %p1478_p10 }
  0x4c   : > { %p1484_p13 = pnand %p1482_p12, %p1479_p11 }
  0x4e   : > { %1487 = shalt.err (!%p1484_p13)
}
  0x4f   : > { %s1488_s14 = scalar_lea.vmem %s2057_s17, 16  ;;  %s1495_s0 = scalar_lea.vmem %s2057_s17, 32 }
  0x50   : > { %p1489_p0 = scmp.ne.s32.totalorder %s2057_s17, %s1488_s14  ;;  %p1496_p6 = scmp.lt.s32.totalorder %s2057_s17, %s2057_s17 }
  0x51   : > { %p1497_p8 = scmp.lt.s32.totalorder %s1495_s0, %s1488_s14 }
  0x52   : > { %p1491_p2 = pnand %p1489_p0, %p2069_p7 }
  0x53   : > { %p1498_p9 = por %p1497_p8, %p1496_p6 }
  0x54   : > { %p1492_p4 = pneg %p1491_p2 }
  0x56   : > { %p1499_p10 = pnand %p1498_p9, %p1492_p4 }
  0x58   : > { %1502 = shalt.err (!%p1499_p10)
}
  0x59   : > { %1295 = dma.hbm_to_vmem [thread:$0]  (!%p2053_p5), %s2559_s3, 16, %s2057_s17, [#allocation9]  }
  0x5a   : > { %s2560_s5 = sld [smem:[#allocation42_spill]] }
  0x60   : > { %s1503_s13 = scalar_lea.hbm %s2560_s5, 16 }
  0x61   : > { %p1504_p11 = scmp.ne.s32.totalorder %s2560_s5, %s1503_s13  ;;  %p1510_p0 = scmp.lt.u32.totalorder %s1503_s13, %s2560_s5 }
  0x63   : > { %p1506_p12 = pnand %p1504_p11, %p2069_p7 }
  0x65   : > { %p1507_p13 = pneg %p1506_p12 }
  0x67   : > { %p1512_p2 = pnand %p1510_p0, %p1507_p13 }
  0x69   : > { %1515 = shalt.err (!%p1512_p2)
}
  0x6a   : > { %s1516_s0 = scalar_lea.vmem %s396_s19, 16  ;;  %s1523_s17 = scalar_lea.vmem %s396_s19, 32 }
  0x6b   : > { %p1517_p4 = scmp.ne.s32.totalorder %s396_s19, %s1516_s0  ;;  %p1524_p9 = scmp.lt.s32.totalorder %s396_s19, %s396_s19 }
  0x6c   : > { %p1525_p10 = scmp.lt.s32.totalorder %s1523_s17, %s1516_s0 }
  0x6d   : > { %p1519_p6 = pnand %p1517_p4, %p2069_p7 }
  0x6e   : > { %p1526_p1 = por %p1525_p10, %p1524_p9 }
  0x6f   : > { %p1520_p8 = pneg %p1519_p6 }
  0x71   : > { %p1527_p3 = pnand %p1526_p1, %p1520_p8 }
  0x73   : > { %1530 = shalt.err (!%p1527_p3)
}
  0x74   : > { %1301 = dma.hbm_to_vmem [thread:$0]  (!%p2053_p5), %s2560_s5, 16, %s396_s19, [#allocation12]  }
  0x75   : > { %s1920_s29 = smov [#allocation14]   ;;  %s1921_s13 = smov [#allocation17]  }
  0x76   : > { %s419_s20 = sshll.u32 %s1920_s29, 4  ;;  %s443_s16 = sshll.u32 %s1921_s13, 4  ;;  %s420_s20 = int_to_ptr.vmem [resolvable:$true] %s419_s20  ;;  %s444_s16 = int_to_ptr.vmem [resolvable:$true] %s443_s16 }
  0x77   : > { %s2561_s7 = sld [smem:[#allocation44_spill]] }
  0x7d   : > { %s1531_s14 = scalar_lea.hbm %s2561_s7, 16 }
  0x7e   : > { %p1532_p1 = scmp.ne.s32.totalorder %s2561_s7, %s1531_s14  ;;  %p1538_p12 = scmp.lt.u32.totalorder %s1531_s14, %s2561_s7 }
  0x80   : > { %p1534_p3 = pnand %p1532_p1, %p2069_p7 }
  0x82   : > { %p1535_p11 = pneg %p1534_p3 }
  0x84   : > { %p1540_p13 = pnand %p1538_p12, %p1535_p11 }
  0x86   : > { %1543 = shalt.err (!%p1540_p13)
}
  0x87   : > { %s1544_s19 = scalar_lea.vmem %s420_s20, 16  ;;  %s1551_s21 = scalar_lea.vmem %s420_s20, 32 }
  0x88   : > { %p1545_p0 = scmp.ne.s32.totalorder %s420_s20, %s1544_s19  ;;  %p1552_p6 = scmp.lt.s32.totalorder %s420_s20, %s420_s20 }
  0x89   : > { %p1553_p8 = scmp.lt.s32.totalorder %s1551_s21, %s1544_s19 }
  0x8a   : > { %p1547_p2 = pnand %p1545_p0, %p2069_p7 }
  0x8b   : > { %p1554_p9 = por %p1553_p8, %p1552_p6 }
  0x8c   : > { %p1548_p4 = pneg %p1547_p2 }
  0x8e   : > { %p1555_p10 = pnand %p1554_p9, %p1548_p4 }
  0x90   : > { %1558 = shalt.err (!%p1555_p10)
}
  0x91   : > { %1307 = dma.hbm_to_vmem [thread:$0]  (!%p2053_p5), %s2561_s7, 16, %s420_s20, [#allocation15]  }
  0x92   : > { %s2562_s9 = sld [smem:[#allocation46_spill]] }
  0x98   : > { %s1559_s12 = scalar_lea.hbm %s2562_s9, 16 }
  0x99   : > { %p1560_p1 = scmp.ne.s32.totalorder %s2562_s9, %s1559_s12  ;;  %p1566_p12 = scmp.lt.u32.totalorder %s1559_s12, %s2562_s9 }
  0x9b   : > { %p1562_p3 = pnand %p1560_p1, %p2069_p7 }
  0x9d   : > { %p1563_p11 = pneg %p1562_p3 }
  0x9f   : > { %p1568_p13 = pnand %p1566_p12, %p1563_p11 }
  0xa1   : > { %1571 = shalt.err (!%p1568_p13)
}
  0xa2   : > { %s1572_s19 = scalar_lea.vmem %s444_s16, 16  ;;  %s1579_s20 = scalar_lea.vmem %s444_s16, 32 }
  0xa3   : > { %p1573_p0 = scmp.ne.s32.totalorder %s444_s16, %s1572_s19  ;;  %p1580_p6 = scmp.lt.s32.totalorder %s444_s16, %s444_s16 }
  0xa4   : > { %p1581_p8 = scmp.lt.s32.totalorder %s1579_s20, %s1572_s19 }
  0xa5   : > { %p1575_p2 = pnand %p1573_p0, %p2069_p7 }
  0xa6   : > { %p1582_p9 = por %p1581_p8, %p1580_p6 }
  0xa7   : > { %p1576_p4 = pneg %p1575_p2 }
  0xa9   : > { %p1583_p10 = pnand %p1582_p9, %p1576_p4 }
  0xab   : > { %1586 = shalt.err (!%p1583_p10)
}
  0xac   : > { %1313 = dma.hbm_to_vmem [thread:$0]  (!%p2053_p5), %s2562_s9, 16, %s444_s16, [#allocation18]  }
  0xad   : > { %s1922_s13 = smov [#allocation10]   ;;  %s1923_s18 = smov [#allocation13]  }
  0xae   : > { %s384_s24 = sshll.u32 %s1922_s13, 4  ;;  %s405_s12 = sshll.u32 %s1923_s18, 4  ;;  %s385_s24 = int_to_ptr.vmem [resolvable:$true] %s384_s24  ;;  %s406_s12 = int_to_ptr.vmem [resolvable:$true] %s405_s12 }
  0xaf   : > { %s2563_s4 = sld [smem:[#allocation41_spill]] }
  0xb5   : > { %s1587_s17 = scalar_lea.hbm %s2563_s4, 16 }
  0xb6   : > { %p1588_p1 = scmp.ne.s32.totalorder %s2563_s4, %s1587_s17  ;;  %p1594_p12 = scmp.lt.u32.totalorder %s1587_s17, %s2563_s4 }
  0xb8   : > { %p1590_p3 = pnand %p1588_p1, %p2069_p7 }
  0xba   : > { %p1591_p11 = pneg %p1590_p3 }
  0xbc   : > { %p1596_p13 = pnand %p1594_p12, %p1591_p11 }
  0xbe   : > { %1599 = shalt.err (!%p1596_p13)
}
  0xbf   : > { %s1600_s16 = scalar_lea.vmem %s385_s24, 16  ;;  %s1607_s29 = scalar_lea.vmem %s385_s24, 32 }
  0xc0   : > { %p1601_p0 = scmp.ne.s32.totalorder %s385_s24, %s1600_s16  ;;  %p1608_p6 = scmp.lt.s32.totalorder %s385_s24, %s385_s24 }
  0xc1   : > { %p1609_p8 = scmp.lt.s32.totalorder %s1607_s29, %s1600_s16 }
  0xc2   : > { %p1603_p2 = pnand %p1601_p0, %p2069_p7 }
  0xc3   : > { %p1610_p9 = por %p1609_p8, %p1608_p6 }
  0xc4   : > { %p1604_p4 = pneg %p1603_p2 }
  0xc6   : > { %p1611_p10 = pnand %p1610_p9, %p1604_p4 }
  0xc8   : > { %1614 = shalt.err (!%p1611_p10)
}
  0xc9   : > { %1298 = dma.hbm_to_vmem [thread:$0]  (!%p2053_p5), %s2563_s4, 16, %s385_s24, [#allocation9]  }
  0xca   : > { %s2564_s6 = sld [smem:[#allocation43_spill]] }
  0xd0   : > { %s1615_s17 = scalar_lea.hbm %s2564_s6, 256 }
  0xd1   : > { %p1616_p1 = scmp.ne.s32.totalorder %s2564_s6, %s1615_s17  ;;  %p1622_p12 = scmp.lt.u32.totalorder %s1615_s17, %s2564_s6 }
  0xd3   : > { %p1618_p3 = pnand %p1616_p1, %p2069_p7 }
  0xd5   : > { %p1619_p11 = pneg %p1618_p3 }
  0xd7   : > { %p1624_p13 = pnand %p1622_p12, %p1619_p11 }
  0xd9   : > { %1627 = shalt.err (!%p1624_p13)
}
  0xda   : > { %s1628_s16 = scalar_lea.vmem %s406_s12, 256  ;;  %p1636_p6 = scmp.lt.s32.totalorder %s406_s12, %s406_s12 }
  0xdb   : > { %p1629_p0 = scmp.ne.s32.totalorder %s406_s12, %s1628_s16  ;;  %p1637_p8 = scmp.lt.s32.totalorder %s1628_s16, %s1628_s16 }
  0xdd   : > { %p1631_p2 = pnand %p1629_p0, %p2069_p7  ;;  %p1638_p9 = por %p1637_p8, %p1636_p6 }
  0xdf   : > { %p1632_p4 = pneg %p1631_p2 }
  0xe1   : > { %p1639_p10 = pnand %p1638_p9, %p1632_p4 }
  0xe3   : > { %1642 = shalt.err (!%p1639_p10)
}
  0xe4   : > { %s2565_s24 = smov 64   ;;  %s1924_s18 = smov [#allocation16]  }
  0xe5   : > { %1304 = dma.hbm_to_vmem [thread:$0]  (!%p2053_p5), %s2564_s6, 256, %s406_s12, [#allocation12], %s2565_s24, %s2565_s24, %s1919_s25  }
  0xe6   : > { %s429_s14 = sshll.u32 %s1924_s18, 4  ;;  %s1925_s0 = smov [#allocation19]   ;;  %s430_s14 = int_to_ptr.vmem [resolvable:$true] %s429_s14 }
  0xe7   : > { %s454_s17 = sshll.u32 %s1925_s0, 4  ;;  %s2566_s8 = sld [smem:[#allocation45_spill]]  ;;  %s455_s17 = int_to_ptr.vmem [resolvable:$true] %s454_s17 }
  0xed   : > { %s1643_s20 = scalar_lea.hbm %s2566_s8, 1024 }
  0xee   : > { %p1644_p1 = scmp.ne.s32.totalorder %s2566_s8, %s1643_s20  ;;  %p1650_p12 = scmp.lt.u32.totalorder %s1643_s20, %s2566_s8 }
  0xf0   : > { %p1646_p3 = pnand %p1644_p1, %p2069_p7 }
  0xf2   : > { %p1647_p11 = pneg %p1646_p3 }
  0xf4   : > { %p1652_p13 = pnand %p1650_p12, %p1647_p11 }
  0xf6   : > { %1655 = shalt.err (!%p1652_p13)
}
  0xf7   : > { %s1656_s12 = scalar_lea.vmem %s430_s14, 1024  ;;  %p1664_p6 = scmp.lt.s32.totalorder %s430_s14, %s430_s14 }
  0xf8   : > { %p1657_p0 = scmp.ne.s32.totalorder %s430_s14, %s1656_s12  ;;  %p1665_p8 = scmp.lt.s32.totalorder %s1656_s12, %s1656_s12 }
  0xfa   : > { %p1659_p2 = pnand %p1657_p0, %p2069_p7  ;;  %p1666_p9 = por %p1665_p8, %p1664_p6 }
  0xfc   : > { %p1660_p4 = pneg %p1659_p2 }
  0xfe   : > { %p1667_p10 = pnand %p1666_p9, %p1660_p4 }
 0x100   : > { %1670 = shalt.err (!%p1667_p10)
}
 0x101   : > { %1310 = dma.hbm_to_vmem [thread:$0]  (!%p2053_p5), %s2566_s8, 1024, %s430_s14, [#allocation15], %s2565_s24, %s2565_s24, %s1919_s25  }
 0x102   : > { %s1671_s1 = scalar_lea.hbm %s2523_s10, 16 }
 0x103   : > { %p1672_p1 = scmp.ne.s32.totalorder %s2523_s10, %s1671_s1  ;;  %p1678_p12 = scmp.lt.u32.totalorder %s1671_s1, %s2523_s10 }
 0x105   : > { %p1674_p3 = pnand %p1672_p1, %p2069_p7 }
 0x107   : > { %p1675_p11 = pneg %p1674_p3 }
 0x109   : > { %p1680_p13 = pnand %p1678_p12, %p1675_p11 }
 0x10b   : > { %1683 = shalt.err (!%p1680_p13)
}
 0x10c   : > { %s1684_s29 = scalar_lea.vmem %s455_s17, 16  ;;  %s1691_s25 = scalar_lea.vmem %s455_s17, 32 }
 0x10d   : > { %p1685_p0 = scmp.ne.s32.totalorder %s455_s17, %s1684_s29  ;;  %p1692_p6 = scmp.lt.s32.totalorder %s455_s17, %s455_s17 }
 0x10e   : > { %p1693_p8 = scmp.lt.s32.totalorder %s1691_s25, %s1684_s29 }
 0x10f   : > { %p1687_p2 = pnand %p1685_p0, %p2069_p7 }
 0x110   : > { %p1694_p9 = por %p1693_p8, %p1692_p6 }
 0x111   : > { %p1688_p4 = pneg %p1687_p2 }
 0x113   : > { %p1695_p10 = pnand %p1694_p9, %p1688_p4 }
 0x115   : > { %1698 = shalt.err (!%p1695_p10)
}
 0x116   : > { %1316 = dma.hbm_to_vmem [thread:$0]  (!%p2053_p5), %s2523_s10, 16, %s455_s17, [#allocation18]  }
 0x117   : > { %s1926_s12 = smov [#allocation20]   ;;  %s1699_s0 = scalar_lea.hbm %s2524_s11, 16 }
 0x118   : > { %s465_s2 = sshll.u32 %s1926_s12, 4  ;;  %p1700_p1 = scmp.ne.s32.totalorder %s2524_s11, %s1699_s0  ;;  %s466_s2 = int_to_ptr.vmem [resolvable:$true] %s465_s2 }
 0x119   : > { %p1706_p12 = scmp.lt.u32.totalorder %s1699_s0, %s2524_s11 }
 0x11a   : > { %p1702_p3 = pnand %p1700_p1, %p2069_p7 }
 0x11c   : > { %p1703_p11 = pneg %p1702_p3 }
 0x11e   : > { %p1708_p13 = pnand %p1706_p12, %p1703_p11 }
 0x120   : > { %1711 = shalt.err (!%p1708_p13)
}
 0x121   : > { %s1712_s17 = scalar_lea.vmem %s466_s2, 16  ;;  %s1719_s16 = scalar_lea.vmem %s466_s2, 32 }
 0x122   : > { %p1713_p0 = scmp.ne.s32.totalorder %s466_s2, %s1712_s17  ;;  %p1720_p6 = scmp.lt.s32.totalorder %s466_s2, %s466_s2 }
 0x123   : > { %p1721_p8 = scmp.lt.s32.totalorder %s1719_s16, %s1712_s17 }
 0x124   : > { %p1715_p2 = pnand %p1713_p0, %p2069_p7 }
 0x125   : > { %p1722_p9 = por %p1721_p8, %p1720_p6 }
 0x126   : > { %p1716_p4 = pneg %p1715_p2 }
 0x128   : > { %p1723_p10 = pnand %p1722_p9, %p1716_p4 }
 0x12a   : > { %1726 = shalt.err (!%p1723_p10)
}
 0x12b   : > { %s2567_s30 = sld [smem:[#allocation32_spill]]  ;;  %s2568_s24 = sld [smem:[#allocation35_spill]] }
 0x12c   : > { %1319 = dma.hbm_to_vmem [thread:$0]  (!%p2053_p5), %s2524_s11, 16, %s466_s2, [#allocation21]  }
 0x12d   : > { %s1135_s14 = sadd.s32 4294967294, %s1913_s28   ;;  %s45_s12 = sadd.s32 1, %s1905_s26 }
 0x12e   : > { %p46_p7 = scmp.ge.s32.totalorder %s45_s12, 2  ;;  %s48_s15 = sadd.s32 1, %s1909_s27 }
 0x12f   : > { %s57_s13 = sadd.s32 1, %s1893_s23  ;;  %p64_p1 = scmp.ne.s32.totalorder %s1893_s23, %s1889_s22 }
 0x130   : > { %s2607_s12 = smov (%p46_p7, %s45_s12), 0  ;;  %s2609_s15 = smov (!%p46_p7, %s48_s15), %s1909_s27 }
 0x131   : > { %s53_s18 = ssub.s32 %s1905_s26, %s2607_s12  ;;  %p65_p3 = scmp.eq.s32.totalorder %s1913_s28, 0 }
 0x132   : > { %p50_p11 = scmp.ge.s32.totalorder %s2609_s15, 2  ;;  %p70_p5 = scmp.ne.s32.totalorder %s1889_s22, %s2567_s30 }
 0x133   : > { %p2282_p12 = por %p65_p3, %p64_p1  ;;  %p334_p13 = scmp.eq.s32.totalorder %s2568_s24, 3 }
 0x134   : > { %s2611_s15 = smov (%p50_p11, %s2609_s15), 0  ;;  %p2570_p0 = scmp.eq.s32.totalorder %s2568_s24, 0 }
 0x135   : > { %p2295_p4 = por %p334_p13, %p64_p1  ;;  %s52_s19 = ssub.s32 %s1909_s27, %s2611_s15 }
 0x136   : > { %p2291_p2 = por %p2570_p0, %p70_p5  ;;  %p340_p6 = scmp.eq.s32.totalorder %s1135_s14, 3 }
 0x137   : > { %s2572_s1 = scalar_select %p2295_p4, 1, 0 }
 0x138   : > { %s2571_s0 = scalar_select %p2291_p2, 1, 0 }
 0x139   : > { %s54_s20 = sor.u32 %s53_s18, %s52_s19  ;;  %p1341_p8 = scmp.lt.s32.totalorder %s1913_s28, 4 }
 0x13a   : > { %p55_p9 = scmp.eq.s32.totalorder %s54_s20, 0  ;;  %p2302_p10 = por %p340_p6, %p70_p5 }
 0x13b   : > { %s476_s17 = sand.u32 1, %s1893_s23   ;;  %s1149_s16 = sshll.u32 %s1909_s27, 1 }
 0x13c   : > { %s2573_s21 = scalar_select %p2302_p10, 1, 0 }
 0x13d   : > { %s2309_s29 = scalar_select %p55_p9, %s1893_s23, %s57_s13  }
 0x13e   : > { %s2311_s25 = sshll.u32 %s476_s17, 2  ;;  %s485_s30 = sadd.s32 %s1905_s26, %s1149_s16 }
 0x13f   : > { %s1150_s24 = sshll.u32 %s485_s30, 6  ;;  %s480_s3 = scalar_lea.vmem [#allocation2], %s2311_s25 }
 0x140   : > { %s489_s4 = sshll.u32 %s480_s3, 4  ;;  %s2574_s19 = sld [smem:[#allocation37_spill]]  ;;  %s2320_s4 = int_to_ptr.vmem [resolvable:$true] %s489_s4 }
 0x141   : > { %p2326_p7 = pnand %p1341_p8, %p2282_p12  ;;  %s2576_s3 = sld [smem:[#allocation38_spill]] }
 0x142   : > { %s496_s14 = sand.u32 1, %s1913_s28   ;;  %s477_s18 = scalar_lea.sflag [#allocation3], %s476_s17 }
 0x143   : > { %p1729_p3 = pneg %p2326_p7 }
 0x146   : > { %s2318_s5 = scalar_lea.hbm %s2574_s19, %s1150_s24  ;;  %s1732_s8 = scalar_lea.hbm %s2574_s19, 256 }
 0x147   : > { %s2333_s30 = scalar_lea.hbm %s2576_s3, %s1150_s24  ;;  %s1727_s6 = scalar_lea.hbm %s2318_s5, 64 }
 0x148   : > { %p1728_p1 = scmp.ne.s32.totalorder %s2318_s5, %s1727_s6  ;;  %p1733_p12 = scmp.lt.u32.totalorder %s2318_s5, %s2574_s19 }
 0x149   : > { %p1734_p13 = scmp.lt.u32.totalorder %s1732_s8, %s1727_s6  ;;  %p1736_p6 = scmp.lt.u32.totalorder %s1727_s6, %s2318_s5 }
 0x14a   : > { %p1730_p11 = pnand %p1729_p3, %p1728_p1 }
 0x14b   : > { %p1735_p0 = por %p1734_p13, %p1733_p12 }
 0x14c   : > { %p1731_p5 = pneg %p1730_p11 }
 0x14d   : > { %p1737_p8 = por %p1736_p6, %p1735_p0 }
 0x14f   : > { %p1738_p9 = pnand %p1737_p8, %p1731_p5 }
 0x151   : > { %1741 = shalt.err (!%p1738_p9)
}
 0x152   : > { %s1742_s17 = scalar_lea.vmem %s2320_s4, 64  ;;  %s1927_s7 = smov [#allocation2]  }
 0x153   : > { %p1743_p1 = scmp.ne.s32.totalorder %s2320_s4, %s1742_s17  ;;  %s1747_s24 = sshll.u32 %s1927_s7, 4  ;;  %s1748_s24 = int_to_ptr.vmem [resolvable:$false] %s1747_s24 }
 0x154   : > { %s1749_s9 = scalar_lea.vmem %s1748_s24, 128  ;;  %p1750_p4 = scmp.lt.s32.totalorder %s2320_s4, %s1748_s24 }
 0x155   : > { %p1745_p11 = pnand %p1743_p1, %p1729_p3  ;;  %p1751_p12 = scmp.lt.s32.totalorder %s1749_s9, %s1742_s17 }
 0x157   : > { %p1746_p10 = pneg %p1745_p11  ;;  %p1752_p13 = por %p1751_p12, %p1750_p4 }
 0x159   : > { %p1753_p0 = pnand %p1752_p13, %p1746_p10 }
 0x15b   : > { %1756 = shalt.err (!%p1753_p0)
}
 0x15c   : > { %1323 = dma.hbm_to_vmem [thread:$0]  (!%p2326_p7), %s2318_s5, 64, %s2320_s4, %s477_s18  }
 0x15d   : > { %s500_s6 = scalar_lea.vmem [#allocation5], %s2311_s25  ;;  %s497_s16 = scalar_lea.sflag [#allocation6], %s496_s14 }
 0x15e   : > { %s509_s8 = sshll.u32 %s500_s6, 4  ;;  %s1757_s2 = scalar_lea.hbm %s2333_s30, 64  ;;  %s510_s8 = int_to_ptr.vmem [resolvable:$true] %s509_s8 }
 0x15f   : > { %p1758_p4 = scmp.ne.s32.totalorder %s2333_s30, %s1757_s2  ;;  %s1762_s7 = scalar_lea.hbm %s2576_s3, 256 }
 0x160   : > { %p1763_p6 = scmp.lt.u32.totalorder %s2333_s30, %s2576_s3  ;;  %p1764_p8 = scmp.lt.u32.totalorder %s1762_s7, %s1757_s2 }
 0x161   : > { %p1760_p10 = pnand %p1758_p4, %p1729_p3  ;;  %p1766_p1 = scmp.lt.u32.totalorder %s1757_s2, %s2333_s30 }
 0x162   : > { %p1765_p9 = por %p1764_p8, %p1763_p6 }
 0x163   : > { %p1761_p5 = pneg %p1760_p10 }
 0x164   : > { %p1767_p11 = por %p1766_p1, %p1765_p9 }
 0x166   : > { %p1768_p12 = pnand %p1767_p11, %p1761_p5 }
 0x168   : > { %1771 = shalt.err (!%p1768_p12)
}
 0x169   : > { %s1772_s4 = scalar_lea.vmem %s510_s8, 64  ;;  %s1928_s5 = smov [#allocation5]  }
 0x16a   : > { %p1773_p13 = scmp.ne.s32.totalorder %s510_s8, %s1772_s4  ;;  %s1777_s25 = sshll.u32 %s1928_s5, 4  ;;  %s1778_s25 = int_to_ptr.vmem [resolvable:$false] %s1777_s25 }
 0x16b   : > { %s1779_s14 = scalar_lea.vmem %s1778_s25, 128  ;;  %p1780_p10 = scmp.lt.s32.totalorder %s510_s8, %s1778_s25 }
 0x16c   : > { %p1775_p0 = pnand %p1773_p13, %p1729_p3  ;;  %p1781_p2 = scmp.lt.s32.totalorder %s1779_s14, %s1772_s4 }
 0x16e   : > { %p1776_p4 = pneg %p1775_p0  ;;  %p1782_p6 = por %p1781_p2, %p1780_p10 }
 0x170   : > { %p1783_p8 = pnand %p1782_p6, %p1776_p4 }
 0x172   : > { %1786 = shalt.err (!%p1783_p8)
}
 0x173   : > { %1326 = dma.hbm_to_vmem [thread:$0]  (!%p2326_p7), %s2333_s30, 64, %s510_s8, %s497_s16  }
 0x174   : > { %s2577_s18 = sld [smem:[#allocation36_spill]] }
 0x17a   : > { %p2578_p5 = scmp.ne.s32.totalorder %s2577_s18, 0 }
 0x17b   : > { %s2386_s6 = sand.u32 (!%p2578_p5), 1, %s1889_s22   ;;  %p2579_p2 = scmp.ne.s32.totalorder (!%p2578_p5), %s2571_s0, 0 }
 0x17c   : > { %518 = sbr.rel (%p2578_p5) target bundleno = 1430 (0x596), region = 68  ;;  %s2389_s2 = sshll.u32 (!%p2578_p5), %s2386_s6, 2 }
 0x17d   : > { %s521_s20 = scalar_lea.sflag (!%p2578_p5), [#allocation3], %s2386_s6  ;;  %s524_s17 = scalar_lea.vmem (!%p2578_p5), [#allocation2], %s2389_s2 }
 0x183   : > { %1848 = dma.done.wait (%p2579_p2), %s521_s20, 64  }
 0x184   : > { %1850 = vsyncadd (%p2579_p2), %s521_s20, 4294967232  ;;  %s2580_s13 = sld [smem:[#allocation35_spill]]  ;;  %s533_s16 = scalar_lea.vmem [#allocation5], %s2389_s2 }
 0x18a   : > { %s529_s30 = sand.u32 1, %s2580_s13  }
 0x18b   : > { %s530_s8 = scalar_lea.sflag [#allocation6], %s529_s30 }
 0x18c   : > { %1852 = dma.done.wait (%p2579_p2), %s530_s8, 64  }
 0x18d   : > { %1854 = vsyncadd (%p2579_p2), %s530_s8, 4294967232  ;;  %p2581_p7 = scmp.eq.s32.totalorder %s2580_s13, 0 }
 0x18f   : > { %1856 = dma.done.wait (%p2581_p7), [#allocation6], 256   ;;  %p2582_p3 = pmov %p2581_p7 }
 0x191   : > { %1858 = vsyncadd (%p2582_p3), [#allocation6], 4294967040  ;;  %p2583_p9 = pmov %p2582_p3 }
 0x192   : > { %p2584_p1 = pmov %p2582_p3 }
 0x193   : > { %1860 = dma.done.wait (%p2583_p9), [#allocation9], 32  }
 0x194   : > { %1862 = vsyncadd (%p2584_p1), [#allocation9], 4294967264  ;;  %p2585_p11 = pmov %p2584_p1 }
 0x195   : > { %p2586_p12 = pmov %p2584_p1 }
 0x196   : > { %1864 = dma.done.wait (%p2585_p11), [#allocation12], 272  }
 0x197   : > { %1866 = vsyncadd (%p2586_p12), [#allocation12], 4294967024  ;;  %p2587_p13 = pmov %p2584_p1 }
 0x198   : > { %p2588_p0 = pmov %p2584_p1 }
 0x199   : > { %1868 = dma.done.wait (%p2587_p13), [#allocation15], 1040  }
 0x19a   : > { %1870 = vsyncadd (%p2588_p0), [#allocation15], 4294966256  ;;  %p2589_p4 = pmov %p2588_p0 }
 0x19b   : > { %p2590_p10 = pmov %p2588_p0 }
 0x19c   : > { %1872 = dma.done.wait (%p2589_p4), [#allocation18], 32  }
 0x19d   : > { %1874 = vsyncadd (%p2590_p10), [#allocation18], 4294967264  ;;  %p2591_p6 = pmov %p2588_p0 }
 0x19e   : > { %p2592_p8 = pmov %p2588_p0 }
 0x19f   : > { %1876 = dma.done.wait (%p2591_p6), [#allocation21], 16  }
 0x1a0   : > { %1878 = vsyncadd (%p2592_p8), [#allocation21], 4294967280  ;;  %v1929_v0 = vmov 0.0   ;;  %vm1930_vm0 = vmmov 0   ;;  %v1431_v1 = vld [vmem:[#allocation7] sm:$0xff]   ;;  %v1432_v2 = vld [vmem:[#allocation7 + $0x8] sm:$0xff]  }
 0x1a1   : > { %1207 = vmatprep.subr.bf16.mxu1 %v1929_v0  ;;  %1211 = vmatprep.mubr.msk.bf16.mxu1 %vm1930_vm0, %v1929_v0  ;;  %vm646_vm1 = vcmask 261120   ;;  %v622_v3 = vld [vmem:[%s533_s16] sm:$0xf]  ;;  %v620_v4 = vld [vmem:[%s524_s17] sm:$0xf]  ;;  %v1435_v21 = vld [vmem:[#allocation16] sm:$0xff]  }
 0x1a2   : > { %1223 = vmatprep.subr.bf16.mxu0 %v1929_v0  ;;  %1239 = vmatprep.mubr.msk.bf16.mxu0 %vm1930_vm0, %v1929_v0  ;;  %v1168_v5 = vld [vmem:[#allocation8] ss:$0 sm:$0xff]  ;;  %v621_v6 = vunpack.c.l.bf16 %v620_v4  ;;  %v1433_v19 = vld [vmem:[#allocation13] sm:$0xff]   ;;  %v1434_v20 = vld [vmem:[#allocation13 + $0x8] sm:$0xff]   ;;  %s2593_s0 = sld [smem:[#allocation34_spill]]  ;;  %s2594_s7 = sld [smem:[#allocation33_spill]] }
 0x1a3   : > { %1208 = vmatpush3.bf16.msra.mxu1 %v1431_v1  ;;  %1224 = vmatpush3.bf16.msra.mxu0 %v1435_v21  ;;  %v1172_v26 = vld [vmem:[#allocation10] ss:$0 sm:$0xff]  ;;  %v1173_v28 = vld [vmem:[#allocation11] ss:$0 sm:$0xff]  ;;  %v1437_v33 = vld [vmem:[#allocation16 + $0x10] sm:$0xff]   ;;  %s618_s5 = scalar_lea.vmem [#allocation22], %s2389_s2 }
 0x1a4   : > { %1209 = vmatprep.subr.bf16.mxu1 %v1929_v0  ;;  %1225 = vmatprep.subr.bf16.mxu0 %v1929_v0  ;;  %v1436_v32 = vld [vmem:[#allocation16 + $0x8] sm:$0xff]   ;;  %v1438_v34 = vld [vmem:[#allocation16 + $0x18] sm:$0xff]   ;;  %v1439_v35 = vld [vmem:[#allocation16 + $0x20] sm:$0xff]   ;;  %s929_s25 = sshll.u32 %s618_s5, 4  ;;  %vm911_vm2 = vcmask 257024   ;;  %s2595_s20 = sld [smem:[#allocation47_spill]]  ;;  %s2461_s25 = int_to_ptr.vmem [resolvable:$true] %s929_s25 }
 0x1a5   : > { %v1440_v36 = vld [vmem:[#allocation16 + $0x28] sm:$0xff]   ;;  %v1441_v37 = vld [vmem:[#allocation16 + $0x30] sm:$0xff]   ;;  %v1442_v38 = vld [vmem:[#allocation16 + $0x38] sm:$0xff]   ;;  %s914_s13 = scalar_lea.sflag [#allocation4], %s2386_s6  ;;  %s1787_s30 = scalar_lea.vmem %s2461_s25, 64 }
 0x1a6   : > { %v1174_v39 = vld [vmem:[#allocation14] ss:$0 sm:$0xff]  ;;  %v1178_v55 = vld [vmem:[#allocation17] ss:$0 sm:$0xff]  ;;  %p1788_p5 = scmp.ne.s32.totalorder %s2461_s25, %s1787_s30  ;;  %p2596_p2 = scmp.ne.s32.totalorder %s2572_s1, 0 }
 0x1a7   : > { %1210 = vmatpush3.bf16.msra.mxu1 %v1432_v2  ;;  %1226 = vmatpush3.bf16.msra.mxu0 %v1436_v32  ;;  %s1931_s2 = smov [#allocation22]  }
 0x1a8   : > { %1215 = vmatprep.subr.bf16.mxu1 %v1929_v0  ;;  %1227 = vmatprep.subr.bf16.mxu0 %v1929_v0  ;;  %s1188_s24 = sshll.u32 %s2593_s0, 1  ;;  %p1789_p7 = pnand %p1788_p5, %p2596_p2 }
 0x1a9   : > { %s925_s9 = sadd.s32 %s2594_s7, %s1188_s24  ;;  %s1791_s8 = sshll.u32 %s1931_s2, 4  ;;  %s1792_s8 = int_to_ptr.vmem [resolvable:$false] %s1791_s8 }
 0x1aa   : > { %1212 = vmatmul.mubr.msk.bf16.vlgmr.msra.gmra.mrb[0].mxu1 %vm646_vm1, %v622_v3  ;;  %s1189_s4 = sshll.u32 %s925_s9, 6  ;;  %p1790_p3 = pneg %p1789_p7 }
 0x1ab   : > { %1219 = vmatprep.mubr.msk.bf16.mxu1 %vm1930_vm0, %v1929_v0  ;;  %1216 = vmatpush3.bf16.msra.mxu1 %v1433_v19  ;;  %s2459_s17 = scalar_lea.hbm %s2595_s20, %s1189_s4  ;;  %s1793_s16 = scalar_lea.vmem %s1792_s8, 128 }
 0x1ac   : > { %1217 = vmatprep.subr.bf16.mxu1 %v1929_v0  ;;  %1228 = vmatpush3.bf16.msra.mxu0 %v1437_v33  ;;  %p1794_p9 = scmp.lt.s32.totalorder %s2461_s25, %s1792_s8  ;;  %p1795_p1 = scmp.lt.s32.totalorder %s1793_s16, %s1787_s30 }
 0x1ad   : > { %1229 = vmatprep.subr.bf16.mxu0 %v1929_v0 }
 0x1ae   : > { %p1796_p11 = por %p1795_p1, %p1794_p9 }
 0x1af   : > { %1218 = vmatpush3.bf16.msra.mxu1 %v1434_v20 }
 0x1b0   : > { %1230 = vmatpush3.bf16.msra.mxu0 %v1438_v34  ;;  %p1797_p12 = pnand %p1796_p11, %p1790_p3 }
 0x1b1   : > { %1231 = vmatprep.subr.bf16.mxu0 %v1929_v0 }
 0x1b4   : > { %1232 = vmatpush3.bf16.msra.mxu0 %v1439_v35 }
 0x1b5   : > { %1233 = vmatprep.subr.bf16.mxu0 %v1929_v0 }
 0x1b8   : > { %1234 = vmatpush3.bf16.msra.mxu0 %v1440_v36 }
 0x1b9   : > { %1235 = vmatprep.subr.bf16.mxu0 %v1929_v0 }
 0x1bc   : > { %1236 = vmatpush3.bf16.msra.mxu0 %v1441_v37 }
 0x1bd   : > { %1237 = vmatprep.subr.bf16.mxu0 %v1929_v0 }
 0x1c0   : > { %1238 = vmatpush3.bf16.msra.mxu0 %v1442_v38 }
 0x27d   : > { %v684_v7 = vpop.f32.mrb[0].mxu1 }
 0x27e   : > { %v685_v8 = vadd.f32 %v1168_v5, %v684_v7  ;;  %v1213_v9 = vpop.f32.mrb[1].mxu1 }
 0x27f   : > { %v687_v10 = vpop.f32.mrb[2].mxu1 }
 0x280   : > { %v2437_v11 = vadd.f32 %v685_v8, %v621_v6  ;;  %v1214_v12 = vpop.f32.mrb[3].mxu1 }
 0x282   : > { %v693_v13 = vsel %vm646_vm1, %v2437_v11, 0.0 }
 0x283   : > { %694 = vadd.xlane.f32.xlu0 %v693_v13 }
 0x310   : > { %v695_v14 = vpop.xlane.xlu0 %694 }
 0x311   : > { %v697_v15 = vmul.f32 0.03125, %v695_v14 }
 0x313   : > { %v698_v16 = vsub.f32 %v2437_v11, %v697_v15 }
 0x315   : > { %v699_v17 = vmul.f32 %v698_v16, %v698_v16 }
 0x317   : > { %v700_v18 = vsel %vm646_vm1, %v699_v17, 0.0 }
 0x318   : > { %701 = vadd.xlane.f32.xlu0 %v700_v18 }
 0x3a5   : > { %v702_v22 = vpop.xlane.xlu0 %701 }
 0x3a6   : > { %v703_v23 = vmul.f32 0.03125, %v702_v22 }
 0x3a8   : > { %v704_v24 = vadd.f32 1e-05, %v703_v23 }
 0x3aa   : > { %1443 = vrsqrt.f32 %v704_v24 }
 0x3b4   : > { %v1444_v25 = vpop.eup %1443 }
 0x3b5   : > { %v706_v27 = vmul.f32 %v1444_v25, %v698_v16 }
 0x3b7   : > { %v713_v29 = vmul.f32 %v1172_v26, %v706_v27 }
 0x3b9   : > { %v720_v30 = vadd.f32 %v1173_v28, %v713_v29 }
 0x3bb   : > { %v721_v31 = vpack.c.bf16 %v720_v30, %v720_v30 }
 0x3bd   : > { %1220 = vmatmul.mubr.msk.bf16.vlgmr.msra.gmra.mrb[4].mxu1 %vm646_vm1, %v721_v31 }
 0x490   : > { %v782_v40 = vpop.f32.mrb[4].mxu1 }
 0x491   : > { %v783_v41 = vadd.f32 %v1174_v39, %v782_v40  ;;  %v1221_v42 = vpop.f32.mrb[5].mxu1 }
 0x492   : > { %v785_v43 = vpop.f32.mrb[6].mxu1 }
 0x493   : > { %v789_v44 = vmul.f32 0.044715, %v783_v41  ;;  %v1222_v45 = vpop.f32.mrb[7].mxu1  ;;  %v788_v51 = vmul.f32 0.5, %v783_v41 }
 0x495   : > { %v790_v46 = vmul.f32 %v789_v44, %v783_v41 }
 0x497   : > { %v791_v47 = vmul.f32 %v790_v46, %v783_v41 }
 0x499   : > { %v792_v48 = vadd.f32 %v791_v47, %v783_v41 }
 0x49b   : > { %v793_v49 = vmul.f32 0.7978846, %v792_v48 }
 0x49d   : > { %1445 = vtanh.f32 %v793_v49 }
 0x4a7   : > { %v1446_v50 = vpop.eup %1445 }
 0x4a8   : > { %v795_v52 = vadd.f32 1.0, %v1446_v50 }
 0x4aa   : > { %v796_v53 = vmul.f32 %v795_v52, %v788_v51 }
 0x4ac   : > { %v797_v54 = vpack.c.bf16 %v796_v53, %v796_v53 }
 0x4ae   : > { %1240 = vmatmul.mubr.bf16.vlgmr.msra.gmra.mrb[0].mxu0 %v797_v54 }
 0x581   : > { %v903_v56 = vpop.f32.mrb[0].mxu0 }
 0x582   : > { %v904_v57 = vadd.f32 %v1178_v55, %v903_v56  ;;  %v1241_v58 = vpop.f32.mrb[1].mxu0 }
 0x583   : > { %v906_v59 = vpop.f32.mrb[2].mxu0 }
 0x584   : > { %v909_v60 = vadd.f32 %v904_v57, %v2437_v11  ;;  %v1242_v61 = vpop.f32.mrb[3].mxu0 }
 0x586   : > { %v910_v62 = vpack.c.bf16 %v909_v60, %v909_v60 }
 0x588   : > { %912 = vst.msk [vmem:[%s618_s5] sm:$0xf] %vm911_vm2, %v910_v62 }
 0x589   : > { %1800 = shalt.err (!%p1797_p12)
}
 0x58a   : > { %s1801_s6 = scalar_lea.hbm %s2459_s17, 64  ;;  %s1805_s24 = scalar_lea.hbm %s2595_s20, 256 }
 0x58b   : > { %p1802_p13 = scmp.ne.s32.totalorder %s2459_s17, %s1801_s6  ;;  %p1806_p10 = scmp.lt.u32.totalorder %s2459_s17, %s2595_s20 }
 0x58c   : > { %p1807_p6 = scmp.lt.u32.totalorder %s1805_s24, %s1801_s6  ;;  %p1809_p5 = scmp.lt.u32.totalorder %s1801_s6, %s2459_s17 }
 0x58d   : > { %p1803_p0 = pnand %p1802_p13, %p2596_p2 }
 0x58e   : > { %p1808_p8 = por %p1807_p6, %p1806_p10 }
 0x58f   : > { %p1804_p4 = pneg %p1803_p0 }
 0x590   : > { %p1810_p7 = por %p1809_p5, %p1808_p8 }
 0x592   : > { %p1811_p3 = pnand %p1810_p7, %p1804_p4 }
 0x594   : > { %1814 = shalt.err (!%p1811_p3)
}
 0x595   : > { %1287 = dma.vmem_to_hbm [thread:$0]  (%p2596_p2), %s2461_s25, 64, %s2459_s17, %s914_s13  }
 0x596 PF: > { %s2597_s5 = sld [smem:[#allocation32_spill]]  ;;  %p1352_p9 = scmp.ge.s32.totalorder %s1913_s28, 2 }
 0x597   : > { %p2598_p1 = scmp.ne.s32.totalorder %s2573_s21, 0 }
 0x599   : > { %p1328_p11 = pnand %p1352_p9, %p2598_p1 }
 0x59c   : > { %s941_s14 = sand.u32 1, %s2597_s5  }
 0x59d   : > { %s942_s18 = scalar_lea.sflag [#allocation4], %s941_s14 }
 0x59e   : > { %1880 = dma.done.wait (!%p1328_p11), %s942_s18, 64  }
 0x59f   : > { %1882 = vsyncadd (!%p1328_p11), %s942_s18, 4294967232  ;;  %s36_s28 = sadd.s32 1, %s1913_s28   ;;  %s2599_s21 = smov %s1889_s22 }
 0x5a0   : > { %p33_p12 = scmp.ge.s32.totalorder %s36_s28, 6   ;;  %s2600_s22 = smov %s1893_s23 }
 0x5a1   : > { %s2601_s23 = smov %s2309_s29  ;;  %s2602_s24 = smov %s1905_s26 }
 0x5a2   : > { %s2603_s25 = smov %s1909_s27  ;;  %s2604_s26 = smov %s2607_s12 }
 0x5a3   : > { %s2605_s27 = smov %s2611_s15  ;;  %35 = sbr.rel (!%p33_p12) target bundleno = 26 (0x1a), region = 166 }
 0x5aa   :  { %947 = vsyncpa [#allocation3], 1 }
 0x5ab   :  { %949 = vsyncpa [#allocation3 + $0x1], 1 }
 0x5ac   :  { %950 = vsyncpa [#allocation6], 1 }
 0x5ad   :  { %952 = vsyncpa [#allocation6 + $0x1], 1 }
 0x5ae   :  { %953 = vsyncpa [#allocation9], 1 }
 0x5af   :  { %954 = vsyncpa [#allocation12], 1 }
 0x5b0   :  { %955 = vsyncpa [#allocation15], 1 }
 0x5b1   :  { %956 = vsyncpa [#allocation18], 1 }
 0x5b2   :  { %957 = vsyncpa [#allocation21], 1 }
 0x5b3   :  { %958 = vsyncpa [#allocation4], 1 }
 0x5b4   :  { %960 = vsyncpa [#allocation4 + $0x1], 1 }

// kernel: _lambda_.8
= control target key start
LH: loop header
LB: loop body
LE: loop exit
PB: predicated region body
PF: predicated region fallthrough
CT: control target
= control target key end

     0   :  { %s3183_s0 = inlined_call_operand.hbm [shape: s32[3], index: 0, kind: input, shape index: {}]   ;;  %s3184_s2 = inlined_call_operand.hbm [shape: bf16[2,16,32], index: 2, kind: input, shape index: {}]   ;;  %s3185_s3 = inlined_call_operand.hbm [shape: bf16[2,16,32], index: 3, kind: input, shape index: {}]   ;;  %s3186_s4 = inlined_call_operand.hbm [shape: bf16[2,16,32], index: 4, kind: input, shape index: {}]   ;;  %s3187_s5 = inlined_call_operand.hbm [shape: bf16[2,16,32], index: 5, kind: output, shape index: {}]   ;;  %s3188_s1 = inlined_call_operand.hbm [shape: s32[3], index: 1, kind: input, shape index: {}]  }
   0x1   :  { %3212 = sst [smem:[#allocation42_spill]] %s3185_s3  ;;  %s2085_s20 = scalar_lea.hbm %s3183_s0, 16 }
   0x2   :  { %3213 = sst [smem:[#allocation43_spill]] %s3187_s5  ;;  %p2086_p0 = scmp.ne.s32.totalorder %s3183_s0, %s2085_s20 }
   0x3   :  { %p2089_p1 = scmp.lt.u32.totalorder %s2085_s20, %s3183_s0 }
   0x5   :  { %p2091_p2 = pnand %p2089_p1, %p2086_p0 }
   0x7   :  { %2094 = shalt.err (!%p2091_p2)  }
   0x8   :  { %s2377_s25 = smov [#allocation6]   ;;  %s2095_s30 = scalar_lea.hbm %s3188_s1, 16 }
   0x9   :  { %11 = dma.hbm_to_smem %s3183_s0, 16, %s2377_s25, [#allocation5] }
   0xa   :  { %p2096_p3 = scmp.ne.s32.totalorder %s3188_s1, %s2095_s30  ;;  %p2099_p4 = scmp.lt.u32.totalorder %s2095_s30, %s3188_s1 }
   0xc   :  { %p2101_p5 = pnand %p2099_p4, %p2096_p3 }
   0xe   :  { %2104 = shalt.err (!%p2101_p5)  }
   0xf   :  { %s2378_s10 = smov [#allocation7]  }
  0x10   :  { %13 = dma.hbm_to_smem %s3188_s1, 16, %s2378_s10, [#allocation5] }
  0x11   :  { %2291 = dma.done.wait [#allocation5], 32 }
  0x12   :  { %2292 = vsyncadd [#allocation5], 4294967264 }
  0x13   :  { %15 = sfence }
  0x14   :  { %16 = vsyncpa [#allocation9], 0 }
  0x15   :  { %18 = vsyncpa [#allocation9 + $0x1], 0 }
  0x16   :  { %19 = vsyncpa [#allocation12], 0 }
  0x17   :  { %21 = vsyncpa [#allocation12 + $0x1], 0 }
  0x18   :  { %22 = vsyncpa [#allocation10], 0 }
  0x19   :  { %24 = vsyncpa [#allocation10 + $0x1], 0  ;;  %s2454_s0 = smov 0   ;;  %s2456_s13 = smov 0  }
  0x1a   :  { %s2458_s14 = smov 0   ;;  %s2460_s15 = smov 0  }
  0x1b   :  { %s2462_s16 = smov 0   ;;  %s2464_s1 = smov 0  }
  0x1c   :  { %s2466_s17 = smov 0   ;;  %s2468_s18 = smov 0  }
  0x1d   :  { %s2470_s19 = smov 0   ;;  %s2472_s20 = smov 0  }
  0x1e   :  { %s2474_s21 = smov 0   ;;  %s2476_s22 = smov 0  }
  0x1f   :  { %s2478_s23 = smov 0   ;;  %s2480_s24 = smov 0  }
  0x20   :  { %s2482_s25 = smov 0   ;;  %s2484_s26 = smov 0  }
  0x21   :  { %s2486_s27 = smov 0  }
  0x22 LB: > { %3214 = sst [smem:[#allocation27_spill]] %s2311_s0  ;;  %s2538_s28 = sadd.s32 4294967295, %s2375_s27   ;;  %s2375_s27 = sphi %s2486_s27, %s30_s27   ;;  %s2371_s26 = sphi %s2484_s26, %s3280_s26   ;;  %s2367_s25 = sphi %s2482_s25, %s3290_s25   ;;  %s2363_s24 = sphi %s2480_s24, %s3278_s24   ;;  %s2359_s23 = sphi %s2478_s23, %s3289_s23   ;;  %s2355_s22 = sphi %s2476_s22, %s3288_s22   ;;  %s2351_s21 = sphi %s2474_s21, %s3287_s21   ;;  %s2347_s20 = sphi %s2472_s20, %s3286_s20   ;;  %s2343_s19 = sphi %s2470_s19, %s3285_s19   ;;  %s2339_s18 = sphi %s2468_s18, %s3276_s18   ;;  %s2335_s17 = sphi %s2466_s17, %s3275_s17   ;;  %s2331_s1 = sphi %s2464_s1, %s3284_s1   ;;  %s2327_s16 = sphi %s2462_s16, %s3283_s16   ;;  %s2323_s15 = sphi %s2460_s15, %s3282_s15   ;;  %s2319_s14 = sphi %s2458_s14, %s3274_s14   ;;  %s2315_s13 = sphi %s2456_s13, %s3273_s13   ;;  %s2311_s0 = sphi %s2454_s0, %s3272_s0  }
  0x23   : > { %3215 = sst [smem:[#allocation28_spill]] %s2315_s13  ;;  %s42_s30 = sadd.s32 1, %s2367_s25 }
  0x24   : > { %3216 = sst [smem:[#allocation29_spill]] %s2319_s14  ;;  %p43_p6 = scmp.ge.s32.totalorder %s42_s30, 3 }
  0x25   : > { %3217 = sst [smem:[#allocation30_spill]] %s2339_s18  ;;  %s49_s6 = sadd.s32 1, %s2371_s26 }
  0x26   : > { %3218 = sst [smem:[#allocation31_spill]] %s2343_s19  ;;  %p3205_p7 = scmp.eq.s32.totalorder %s2375_s27, 0 }
  0x27   : > { %3219 = sst [smem:[#allocation32_spill]] %s2359_s23  ;;  %s3292_s30 = smov (%p43_p6, %s42_s30), 0 }
  0x28   : > { %3220 = sst [smem:[#allocation33_spill]] %s2363_s24  ;;  %s3294_s6 = smov (!%p43_p6, %s49_s6), %s2371_s26 }
  0x29   : > { %3221 = sst [smem:[#allocation34_spill]] %s2371_s26  ;;  %p3204_p8 = scmp.eq.s32.totalorder %s2538_s28, 0 }
  0x2a   : > { %s85_s7 = sld [smem:[#allocation7 + %s2367_s25]]  ;;  %p51_p9 = scmp.ge.s32.totalorder %s3294_s6, 2 }
  0x2b   : > { %3222 = sst [smem:[#allocation35_spill]] %s3292_s30  ;;  %s94_s9 = sadd.s32 1, %s2343_s19 }
  0x2c   : > { %s86_s8 = sld [smem:[#allocation7 + %s3292_s30]]  ;;  %p107_p10 = scmp.ne.s32.totalorder %s2339_s18, %s2335_s17 }
  0x2d   : > { %s117_s10 = sld [smem:[#allocation7 + %s2367_s25]]  ;;  %s3296_s6 = smov (%p51_p9, %s3294_s6), 0 }
  0x2e   : > { %3223 = sst [smem:[#allocation36_spill]] %s3296_s6  ;;  %p101_p11 = scmp.ne.s32.totalorder %s2343_s19, %s2339_s18 }
  0x2f   : > { %p2559_p12 = por %p107_p10, %p3204_p8  ;;  %s2565_s12 = ssub.s32 %s2371_s26, %s3296_s6 }
  0x30   : > { %s118_s29 = sld [smem:[#allocation7 + %s3292_s30]]  ;;  %p2573_p0 = por %p101_p11, %p3205_p7 }
  0x31   : > { %s3224_s11 = scalar_select %p2559_p12, 1, 0 }
  0x32   : > { %s88_s17 = ssub.s32 %s85_s7, %s86_s8  ;;  %s149_s5 = sld [smem:[#allocation6 + %s2367_s25]] }
  0x33   : > { %3225 = sst [smem:[#allocation37_spill]] %s3224_s11  ;;  %s89_s24 = sor.u32 %s88_s17, %s2565_s12 }
  0x34   : > { %s150_s23 = sld [smem:[#allocation6 + %s3292_s30]]  ;;  %p92_p13 = scmp.eq.s32.totalorder %s89_s24, 0 }
  0x35   : > { %p168_p1 = scmp.ne.s32.totalorder %s2319_s14, %s2315_s13  ;;  %p169_p2 = scmp.eq.s32.totalorder %s2538_s28, 5 }
  0x36   : > { %s2581_s6 = scalar_select %p92_p13, %s2343_s19, %s94_s9  }
  0x37   : > { %s120_s7 = ssub.s32 %s117_s10, %s118_s29  ;;  %p2583_p3 = por %p169_p2, %p168_p1 }
  0x38   : > { %3227 = sst [smem:[#allocation38_spill]] %s2581_s6  ;;  %s158_s24 = sadd.s32 1, %s2319_s14 }
  0x39   : > { %s3228_s8 = scalar_select %p2583_p3, 1, 0 }
  0x3a   : > { %p174_p4 = scmp.ne.s32.totalorder %s2315_s13, %s2311_s0  ;;  %s2591_s17 = sor.u32 %s120_s7, %s2565_s12 }
  0x3b   : > { %3229 = sst [smem:[#allocation39_spill]] %s3228_s8  ;;  %s152_s11 = ssub.s32 %s149_s5, %s150_s23 }
  0x3c   : > { %s153_s9 = sor.u32 %s152_s11, %s2565_s12  ;;  %s3230_s6 = sadd.s32 4294967294, %s2375_s27  }
  0x3d   : > { %p175_p5 = scmp.eq.s32.totalorder %s3230_s6, 5  ;;  %p156_p6 = scmp.eq.s32.totalorder %s153_s9, 0 }
  0x3e   : > { %p3203_p10 = scmp.lt.s32.totalorder %s2375_s27, 6  ;;  %s2605_s0 = sshll.u32 %s2371_s26, 1 }
  0x3f   : > { %p2596_p9 = por %p175_p5, %p174_p4  ;;  %s217_s7 = sand.u32 1, %s2375_s27  }
  0x40   : > { %s2602_s10 = scalar_select %p156_p6, %s2319_s14, %s158_s24  }
  0x41   : > { %s3231_s29 = scalar_select %p2596_p9, 1, 0 }
  0x42   : > { %3233 = sst [smem:[#allocation41_spill]] %s2602_s10  ;;  %s219_s8 = sand.u32 1, %s2343_s19  }
  0x43   : > { %3232 = sst [smem:[#allocation40_spill]] %s3231_s29  ;;  %s1679_s13 = sshll.u32 %s219_s8, 2 }
  0x44   : > { %p2613_p11 = pnand %p3203_p10, %p2573_p0  ;;  %p1685_p13 = scmp.ge.s32.totalorder %s2375_s27, 1 }
  0x45   : > { %s1851_s23 = scalar_select %p2573_p0, [#allocation7], [#allocation16] }
  0x46   : > { %s1852_s6 = scalar_select %p2573_p0, %s2367_s25, 0 }
  0x47   : > { %s3298_s23 = smov (!%p3203_p10, %s1851_s23), [#allocation20]  ;;  %s221_s11 = scalar_lea.vmem [#allocation11], %s1679_s13 }
  0x48   : > { %s3300_s6 = smov (!%p3203_p10, %s1852_s6), 0  ;;  %s232_s8 = sshll.u32 %s221_s11, 4  ;;  %s2627_s8 = int_to_ptr.vmem [resolvable:$true] %s232_s8 }
  0x49   : > { %s222_s24 = sld [smem:[%s3298_s23 + %s3300_s6]]  ;;  %p259_p1 = scmp.lt.s32.totalorder %s2375_s27, 7 }
  0x4a   : > { %s3236_s3 = sld [smem:[#allocation42_spill]]  ;;  %s2643_s23 = scalar_lea.sflag [#allocation12], %s217_s7 }
  0x4b   : > { %p2630_p2 = pnand %p1685_p13, %p259_p1  ;;  %s2641_s13 = sld [smem:[#allocation6 + %s2367_s25]] }
  0x4c   : > { %p2107_p4 = pneg %p2613_p11 }
  0x4d   : > { %s3235_s9 = scalar_select %p2630_p2, 1, 0 }
  0x4f   : > { %s228_s26 = sadd.s32 %s2605_s0, %s222_s24 }
  0x50   : > { %s1681_s19 = sshll.u32 %s228_s26, 6 }
  0x51   : > { %s2638_s14 = scalar_lea.hbm %s3236_s3, %s1681_s19  ;;  %s2110_s19 = scalar_lea.hbm %s3236_s3, 256 }
  0x52   : > { %s2105_s6 = scalar_lea.hbm %s2638_s14, 64  ;;  %p2111_p13 = scmp.lt.u32.totalorder %s2638_s14, %s3236_s3 }
  0x53   : > { %p2106_p0 = scmp.ne.s32.totalorder %s2638_s14, %s2105_s6  ;;  %p2112_p1 = scmp.lt.u32.totalorder %s2110_s19, %s2105_s6 }
  0x54   : > { %p2114_p8 = scmp.lt.u32.totalorder %s2105_s6, %s2638_s14 }
  0x55   : > { %p2108_p5 = pnand %p2107_p4, %p2106_p0  ;;  %p2113_p10 = por %p2112_p1, %p2111_p13 }
  0x57   : > { %p2109_p6 = pneg %p2108_p5  ;;  %p2115_p7 = por %p2114_p8, %p2113_p10 }
  0x59   : > { %p2116_p9 = pnand %p2115_p7, %p2109_p6 }
  0x5b   : > { %2119 = shalt.err (!%p2116_p9)
}
  0x5c   : > { %s2120_s7 = scalar_lea.vmem %s2627_s8, 64  ;;  %s2379_s18 = smov [#allocation11]  }
  0x5d   : > { %p2121_p0 = scmp.ne.s32.totalorder %s2627_s8, %s2120_s7  ;;  %s2125_s26 = sshll.u32 %s2379_s18, 4  ;;  %s2126_s26 = int_to_ptr.vmem [resolvable:$false] %s2125_s26 }
  0x5e   : > { %s2127_s10 = scalar_lea.vmem %s2126_s26, 128  ;;  %p2128_p12 = scmp.lt.s32.totalorder %s2627_s8, %s2126_s26 }
  0x5f   : > { %p2123_p5 = pnand %p2121_p0, %p2107_p4  ;;  %p2129_p13 = scmp.lt.s32.totalorder %s2127_s10, %s2120_s7 }
  0x61   : > { %p2124_p3 = pneg %p2123_p5  ;;  %p2130_p1 = por %p2129_p13, %p2128_p12 }
  0x63   : > { %p2131_p8 = pnand %p2130_p1, %p2124_p3 }
  0x65   : > { %2134 = shalt.err (!%p2131_p8)
}
  0x66   : > { %1874 = dma.hbm_to_vmem [thread:$0]  (!%p2613_p11), %s2638_s14, 64, %s2627_s8, %s2643_s23  }
  0x67   : > { %p124_p7 = scmp.eq.s32.totalorder %s2591_s17, 0  ;;  %s54_s5 = sld [smem:[#allocation6 + %s3292_s30]] }
  0x68   : > { %p69_p12 = scmp.ne.s32.totalorder %s2355_s22, %s2351_s21  ;;  %p75_p3 = scmp.ne.s32.totalorder %s2351_s21, %s2347_s20 }
  0x69   : > { %s62_s6 = sadd.s32 1, %s2355_s22  ;;  %s195_s19 = sand.u32 1, %s2355_s22  }
  0x6a   : > { %p3237_p9 = scmp.eq.s32.totalorder %s2375_s27, 0  ;;  %p3239_p4 = scmp.eq.s32.totalorder %s2538_s28, 0 }
  0x6b   : > { %s1676_s20 = sshll.u32 %s195_s19, 2  ;;  %p3241_p6 = scmp.lt.s32.totalorder %s2375_s27, 6 }
  0x6c   : > { %p2681_p10 = por %p3237_p9, %p69_p12  ;;  %p2687_p11 = por %p3239_p4, %p75_p3 }
  0x6d   : > { %s56_s24 = ssub.s32 %s2641_s13, %s54_s5  ;;  %s199_s18 = scalar_lea.vmem [#allocation8], %s1676_s20 }
  0x6e   : > { %s3240_s14 = scalar_select %p2687_p11, 1, 0 }
  0x6f   : > { %p2695_p0 = pnand %p3241_p6, %p2681_p10  ;;  %s57_s7 = sor.u32 %s56_s24, %s2565_s12 }
  0x70   : > { %s210_s26 = sshll.u32 %s199_s18, 4  ;;  %p60_p5 = scmp.eq.s32.totalorder %s57_s7, 0  ;;  %s2721_s26 = int_to_ptr.vmem [resolvable:$true] %s210_s26 }
  0x71   : > { %s1848_s10 = scalar_select %p2681_p10, [#allocation6], [#allocation15] }
  0x72   : > { %s2704_s3 = scalar_select %p60_p5, %s2355_s22, %s62_s6  }
  0x73   : > { %s1849_s30 = scalar_select %p2681_p10, %s2367_s25, 0 }
  0x74   : > { %p3243_p13 = pmov %p3241_p6  ;;  %p3244_p1 = pmov %p3241_p6 }
  0x75   : > { %s126_s13 = sadd.s32 1, %s2331_s1  ;;  %p133_p8 = scmp.ne.s32.totalorder %s2331_s1, %s2327_s16 }
  0x76   : > { %s3302_s10 = smov (!%p3243_p13, %s1848_s10), [#allocation19]  ;;  %s3304_s30 = smov (!%p3244_p1, %s1849_s30), 0 }
  0x77   : > { %s200_s29 = sld [smem:[%s3302_s10 + %s3304_s30]]  ;;  %p139_p12 = scmp.ne.s32.totalorder %s2327_s16, %s2323_s15 }
  0x78   : > { %s2719_s12 = scalar_select %p124_p7, %s2331_s1, %s126_s13  }
  0x79   : > { %p3245_p3 = pmov %p3237_p9  ;;  %s241_s6 = sand.u32 1, %s2331_s1  }
  0x7a   : > { %p3247_p10 = pmov %p3239_p4  ;;  %s2744_s15 = sshll.u32 %s241_s6, 2 }
  0x7b   : > { %p2727_p9 = por %p133_p8, %p3245_p3  ;;  %s196_s18 = scalar_lea.sflag [#allocation9], %s195_s19 }
  0x7c   : > { %p2735_p4 = por %p139_p12, %p3247_p10  ;;  %p2137_p6 = pneg %p2695_p0 }
  0x7d   : > { %s206_s11 = sadd.s32 %s2605_s0, %s200_s29 }
  0x7e   : > { %s3248_s30 = scalar_select %p2735_p4, 1, 0 }
  0x7f   : > { %s1678_s20 = sshll.u32 %s206_s11, 6  ;;  %s2140_s11 = scalar_lea.hbm %s3184_s2, 256 }
  0x80   : > { %s2742_s7 = scalar_lea.hbm %s3184_s2, %s1678_s20 }
  0x81   : > { %s2135_s10 = scalar_lea.hbm %s2742_s7, 64  ;;  %p2141_p1 = scmp.lt.u32.totalorder %s2742_s7, %s3184_s2 }
  0x82   : > { %p2136_p7 = scmp.ne.s32.totalorder %s2742_s7, %s2135_s10  ;;  %p2142_p8 = scmp.lt.u32.totalorder %s2140_s11, %s2135_s10 }
  0x83   : > { %p2144_p3 = scmp.lt.u32.totalorder %s2135_s10, %s2742_s7 }
  0x84   : > { %p2138_p5 = pnand %p2137_p6, %p2136_p7  ;;  %p2143_p12 = por %p2142_p8, %p2141_p1 }
  0x86   : > { %p2139_p13 = pneg %p2138_p5  ;;  %p2145_p10 = por %p2144_p3, %p2143_p12 }
  0x88   : > { %p2146_p4 = pnand %p2145_p10, %p2139_p13 }
  0x8a   : > { %2149 = shalt.err (!%p2146_p4)
}
  0x8b   : > { %s2150_s19 = scalar_lea.vmem %s2721_s26, 64  ;;  %s2380_s6 = smov [#allocation8]  }
  0x8c   : > { %p2151_p7 = scmp.ne.s32.totalorder %s2721_s26, %s2150_s19  ;;  %s2155_s17 = sshll.u32 %s2380_s6, 4  ;;  %s2156_s17 = int_to_ptr.vmem [resolvable:$false] %s2155_s17 }
  0x8d   : > { %s2157_s29 = scalar_lea.vmem %s2156_s17, 128  ;;  %p2158_p2 = scmp.lt.s32.totalorder %s2721_s26, %s2156_s17 }
  0x8e   : > { %p2153_p5 = pnand %p2151_p7, %p2137_p6  ;;  %p2159_p1 = scmp.lt.s32.totalorder %s2157_s29, %s2150_s19 }
  0x90   : > { %p2154_p11 = pneg %p2153_p5  ;;  %p2160_p8 = por %p2159_p1, %p2158_p2 }
  0x92   : > { %p2161_p12 = pnand %p2160_p8, %p2154_p11 }
  0x94   : > { %2164 = shalt.err (!%p2161_p12)
}
  0x95   : > { %1869 = dma.hbm_to_vmem [thread:$0]  (!%p2695_p0), %s2742_s7, 64, %s2721_s26, %s196_s18  }
  0x96   : > { %s1854_s10 = scalar_select %p2727_p9, [#allocation7], [#allocation17] }
  0x97   : > { %s1855_s13 = scalar_select %p2727_p9, %s2367_s25, 0 }
  0x98   : > { %p3249_p2 = scmp.lt.s32.totalorder %s2375_s27, 6  ;;  %s243_s20 = scalar_lea.vmem [#allocation13], %s2744_s15 }
  0x99   : > { %s254_s24 = sshll.u32 %s243_s20, 4  ;;  %s2170_s15 = scalar_lea.hbm %s3186_s4, 256  ;;  %s2790_s24 = int_to_ptr.vmem [resolvable:$true] %s254_s24 }
  0x9a   : > { %s3306_s10 = smov (!%p3249_p2, %s1854_s10), [#allocation21]  ;;  %p3250_p11 = pmov %p3249_p2 }
  0x9b   : > { %p3251_p4 = pmov %p3249_p2 }
  0x9c   : > { %s3308_s13 = smov (!%p3250_p11, %s1855_s13), 0 }
  0x9d   : > { %p2784_p6 = pnand %p3251_p4, %p2727_p9  ;;  %s244_s11 = sld [smem:[%s3306_s10 + %s3308_s13]] }
  0x9f   : > { %p2167_p9 = pneg %p2784_p6 }
  0xa3   : > { %s250_s26 = sadd.s32 %s2605_s0, %s244_s11 }
  0xa4   : > { %s1684_s7 = sshll.u32 %s250_s26, 6 }
  0xa5   : > { %s252_s6 = scalar_lea.hbm %s3186_s4, %s1684_s7 }
  0xa6   : > { %s2165_s17 = scalar_lea.hbm %s252_s6, 64  ;;  %p2171_p10 = scmp.lt.u32.totalorder %s252_s6, %s3186_s4 }
  0xa7   : > { %p2166_p0 = scmp.ne.s32.totalorder %s252_s6, %s2165_s17  ;;  %p2172_p7 = scmp.lt.u32.totalorder %s2170_s15, %s2165_s17 }
  0xa8   : > { %p2174_p1 = scmp.lt.u32.totalorder %s2165_s17, %s252_s6 }
  0xa9   : > { %p2168_p13 = pnand %p2167_p9, %p2166_p0  ;;  %p2173_p5 = por %p2172_p7, %p2171_p10 }
  0xab   : > { %p2169_p3 = pneg %p2168_p13  ;;  %p2175_p8 = por %p2174_p1, %p2173_p5 }
  0xad   : > { %p2176_p12 = pnand %p2175_p8, %p2169_p3 }
  0xaf   : > { %2179 = shalt.err (!%p2176_p12)
}
  0xb0   : > { %s2180_s13 = scalar_lea.vmem %s2790_s24, 64  ;;  %s2381_s11 = smov [#allocation13]  }
  0xb1   : > { %p2181_p2 = scmp.ne.s32.totalorder %s2790_s24, %s2180_s13  ;;  %s2185_s20 = sshll.u32 %s2381_s11, 4  ;;  %s2186_s20 = int_to_ptr.vmem [resolvable:$false] %s2185_s20 }
  0xb2   : > { %s2187_s26 = scalar_lea.vmem %s2186_s20, 128  ;;  %p2188_p0 = scmp.lt.s32.totalorder %s2790_s24, %s2186_s20 }
  0xb3   : > { %p2183_p11 = pnand %p2181_p2, %p2167_p9  ;;  %p2189_p13 = scmp.lt.s32.totalorder %s2187_s26, %s2180_s13 }
  0xb5   : > { %p2184_p4 = pneg %p2183_p11  ;;  %p2190_p10 = por %p2189_p13, %p2188_p0 }
  0xb7   : > { %p2191_p7 = pnand %p2190_p10, %p2184_p4 }
  0xb9   : > { %2194 = shalt.err (!%p2191_p7)
}
  0xba   : > { %1879 = dma.hbm_to_vmem [thread:$0]  (!%p2784_p6), %s252_s6, 64, %s2790_s24, %s2643_s23  }
  0xbb   : > { %p3253_p3 = scmp.ne.s32.totalorder %s3235_s9, 0 }
  0xbc   : > { %s265_s7 = sand.u32 (!%p3253_p3), 1, %s2351_s21   ;;  %p3254_p9 = scmp.ne.s32.totalorder (!%p3253_p3), %s3240_s14, 0 }
  0xbd   : > { %263 = sbr.rel (%p3253_p3) target bundleno = 2984 (0xba8), region = 32  ;;  %s2819_s18 = sshll.u32 (!%p3253_p3), %s265_s7, 2 }
  0xbe   : > { %s266_s19 = scalar_lea.sflag (!%p3253_p3), [#allocation9], %s265_s7  ;;  %s269_s17 = scalar_lea.vmem (!%p3253_p3), [#allocation8], %s2819_s18 }
  0xc4   : > { %2294 = dma.done.wait (%p3254_p9), %s266_s19, 64  }
  0xc5   : > { %2296 = vsyncadd (%p3254_p9), %s266_s19, 4294967232  ;;  %s3255_s8 = sld [smem:[#allocation30_spill]]  ;;  %s3256_s5 = sld [smem:[#allocation37_spill]] }
  0xc6   : > { %s274_s23 = sand.u32 1, %s2538_s28  }
  0xc7   : > { %s275_s6 = scalar_lea.sflag [#allocation12], %s274_s23 }
  0xcb   : > { %s276_s24 = sand.u32 1, %s3255_s8   ;;  %p3257_p6 = scmp.ne.s32.totalorder %s3256_s5, 0 }
  0xcc   : > { %s2828_s9 = sshll.u32 %s276_s24, 2 }
  0xcd   : > { %s278_s29 = scalar_lea.vmem [#allocation11], %s2828_s9 }
  0xce   : > { %2298 = dma.done.wait (%p3257_p6), %s275_s6, 64  }
  0xcf   : > { %2300 = vsyncadd (%p3257_p6), %s275_s6, 4294967232  ;;  %s285_s15 = sand.u32 1, %s2327_s16   ;;  %p3258_p5 = scmp.ne.s32.totalorder %s3248_s30, 0 }
  0xd0   : > { %s2836_s14 = sshll.u32 %s285_s15, 2 }
  0xd1   : > { %s287_s0 = scalar_lea.vmem [#allocation13], %s2836_s14 }
  0xd2   : > { %2302 = dma.done.wait (%p3258_p5), %s275_s6, 64  }
  0xd3   : > { %2304 = vsyncadd (%p3258_p5), %s275_s6, 4294967232  ;;  %s3259_s28 = sld [smem:[#allocation28_spill]]  ;;  %s3260_s10 = sld [smem:[#allocation32_spill]] }
  0xd9   : > { %s317_s13 = sand.u32 1, %s3259_s28   ;;  %s2845_s11 = sld [smem:[#allocation6 + %s3260_s10]] }
  0xda   : > { %s2848_s20 = sld [smem:[#allocation7 + %s3260_s10]]  ;;  %s2852_s26 = sshll.u32 %s317_s13, 2 }
  0xdb   : > { %s319_s7 = scalar_lea.vmem [#allocation14], %s2852_s26 }
  0xe0   : > { %p1690_p1 = scmp.ne.s32.totalorder %s2848_s20, 0 }
  0xe1   : > { %vm331_vm0 = vcmask (!%p1690_p1), 7168   ;;  %vm340_vm1 = vcmask (!%p1690_p1), 64512   ;;  %v2382_v0 = vmov (!%p1690_p1), -1e+30   ;;  %v2383_v1 = vmov (!%p1690_p1), 0.0  }
  0xe2   : > { %330 = sbr.rel (%p1690_p1) target bundleno = 233 (0xe9), region = 48  ;;  %332 = vst.msk [vmem:[#allocation2] sm:$0xff] (!%p1690_p1), %vm331_vm0, %v2382_v0  ;;  %333 = vst.msk [vmem:[#allocation2 + $0x8] sm:$0xff] (!%p1690_p1), %vm331_vm0, %v2382_v0 }
  0xe3   : > { %334 = vst.msk [vmem:[#allocation2 + $0x10] sm:$0xff] (!%p1690_p1), %vm331_vm0, %v2382_v0  ;;  %335 = vst.msk [vmem:[#allocation2 + $0x18] sm:$0xff] (!%p1690_p1), %vm331_vm0, %v2382_v0 }
  0xe4   : > { %336 = vst.msk [vmem:[#allocation3] sm:$0xff] (!%p1690_p1), %vm331_vm0, %v2383_v1  ;;  %337 = vst.msk [vmem:[#allocation3 + $0x8] sm:$0xff] (!%p1690_p1), %vm331_vm0, %v2383_v1 }
  0xe5   : > { %338 = vst.msk [vmem:[#allocation3 + $0x10] sm:$0xff] (!%p1690_p1), %vm331_vm0, %v2383_v1  ;;  %339 = vst.msk [vmem:[#allocation3 + $0x18] sm:$0xff] (!%p1690_p1), %vm331_vm0, %v2383_v1 }
  0xe6   : > { %341 = vst.msk [vmem:[#allocation4] sm:$0xff] (!%p1690_p1), %vm340_vm1, %v2383_v1  ;;  %342 = vst.msk [vmem:[#allocation4 + $0x8] sm:$0xff] (!%p1690_p1), %vm340_vm1, %v2383_v1 }
  0xe7   : > { %343 = vst.msk [vmem:[#allocation4 + $0x10] sm:$0xff] (!%p1690_p1), %vm340_vm1, %v2383_v1  ;;  %344 = vst.msk [vmem:[#allocation4 + $0x18] sm:$0xff] (!%p1690_p1), %vm340_vm1, %v2383_v1 }
  0xe9 PF: > { %v2858_v2 = vld [vmem:[%s269_s17] sm:$0xf]  ;;  %v2862_v3 = vld [vmem:[%s278_s29] sm:$0xf]  ;;  %v2864_v4 = vld [vmem:[%s287_s0] sm:$0xf]  ;;  %p1691_p8 = scmp.ge.s32.totalorder %s2848_s20, %s2845_s11 }
  0xea   : > { %vm352_vm2 = vcmask (!%p1691_p8), 64512   ;;  %v2384_v5 = vmov (!%p1691_p8), 0.0   ;;  %vm2385_vm3 = vmmov (!%p1691_p8), 0   ;;  %v2386_v13 = vmov (!%p1691_p8), 0   ;;  %s2387_s30 = smov (!%p1691_p8), 120   ;;  %s2388_s18 = smov (!%p1691_p8), 112  }
  0xeb   : > { %351 = sbr.rel (%p1691_p8) target bundleno = 1497 (0x5d9), region = 52  ;;  %1752 = vmatprep.subr.bf16.mxu0 (!%p1691_p8), %v2384_v5  ;;  %v357_v6 = vsel (!%p1691_p8), %vm352_vm2, %v2862_v3, 0  ;;  %1754 = vmatprep.mubr.msk.bf16.mxu0 (!%p1691_p8), %vm2385_vm3, %v2384_v5  ;;  %v1695_v14 = vcombine.low (!%p1691_p8), %v2862_v3, %v2862_v3  ;;  %v1694_v15 = vcombine.low (!%p1691_p8), %v2858_v2, %v2858_v2  ;;  %s2389_s19 = smov (!%p1691_p8), 104   ;;  %v2892_v16 = vld [vmem:[#allocation2] sm:$0xff] (!%p1691_p8)  ;;  %vm422_vm4 = vcmask (!%p1691_p8), 7168   ;;  %v540_v57 = vld [vmem:[#allocation2 + $0x8] sm:$0xff] (!%p1691_p8) }
  0xec   : > { %1753 = vmatpush3.bf16.xpose.msra.mxu0 (!%p1691_p8), %v357_v6  ;;  %1758 = vmatprep.subr.bf16.mxu1 (!%p1691_p8), %v2384_v5  ;;  %vm435_vm5 = vcmask (!%p1691_p8), 1043456   ;;  %v679_v62 = vld [vmem:[#allocation2 + $0x10] sm:$0xff] (!%p1691_p8) }
  0xed   : > { %1760 = vmatprep.mubr.msk.bf16.mxu1 (!%p1691_p8), %vm2385_vm3, %v2384_v5  ;;  %1770 = vmatprep.subr.bf16.mxu0 (!%p1691_p8), %v2384_v5  ;;  %v437_v20 = vsel (!%p1691_p8), %vm435_vm5, %v2864_v4, 0 }
  0xee   : > { %2041 = vset.pattern.permute.xlu0 (!%p1691_p8), %v2386_v13  ;;  %2042 = vset.pattern.permute.xlu1 (!%p1691_p8), %v2386_v13 }
  0xef   : > { %490 = vrot.lane.b32.xlu1 (!%p1691_p8), %v1695_v14, %s2387_s30  ;;  %1759 = vmatpush3.bf16.msra.mxu1 (!%p1691_p8), %v437_v20 }
  0xf0   : > { %1764 = vmatprep.subr.bf16.mxu1 (!%p1691_p8), %v2384_v5 }
  0xf3   : > { %1755 = vmatmul.mubr.msk.bf16.vlgmr.msra.gmra.mrb[0].mxu0 %vm352_vm2, %v2858_v2  ;;  %485 = vrot.lane.b32.xlu1 %v1694_v15, %s2387_s30 }
  0xf4   : > { %1772 = vmatprep.mubr.msk.bf16.mxu0 %vm2385_vm3, %v2384_v5 }
  0xf7   : > { %629 = vrot.lane.b32.xlu1 %v1695_v14, %s2388_s18 }
  0xfb   : > { %627 = vrot.lane.b32.xlu1 %v1694_v15, %s2388_s18 }
  0xff   : > { %765 = vrot.lane.b32.xlu1 %v1695_v14, %s2389_s19 }
 0x103   : > { %763 = vrot.lane.b32.xlu1 %v1694_v15, %s2389_s19 }
 0x161   : > { %v491_v24 = vpop.permute.xlu1 %490 }
 0x162   : > { %v496_v27 = vsel %vm352_vm2, %v491_v24, 0 }
 0x165   : > { %v486_v25 = vpop.permute.xlu1 %485 }
 0x169   : > { %v630_v29 = vpop.permute.xlu1 %629 }
 0x16a   : > { %v635_v31 = vsel %vm352_vm2, %v630_v29, 0 }
 0x16d   : > { %v628_v30 = vpop.permute.xlu1 %627 }
 0x171   : > { %v766_v32 = vpop.permute.xlu1 %765 }
 0x172   : > { %v771_v33 = vsel %vm352_vm2, %v766_v32, 0 }
 0x175   : > { %v764_v34 = vpop.permute.xlu1 %763 }
 0x1c6   : > { %v393_v7 = vpop.f32.mrb[0].mxu0 }
 0x1c7   : > { %v399_v8 = vmul.f32 0.35355338, %v393_v7  ;;  %v1756_v9 = vpop.f32.mrb[1].mxu0 }
 0x1c8   : > { %v396_v10 = vpop.f32.mrb[2].mxu0 }
 0x1c9   : > { %v1757_v11 = vpop.f32.mrb[3].mxu0  ;;  %v401_v12 = vsel %vm352_vm2, %v399_v8, -inf }
 0x1ca   : > { %402 = vmax.xlane.f32.xlu0 %v401_v12  ;;  %v1697_v12 = vcombine.low %v2864_v4, %v2864_v4 }
 0x257   : > { %v403_v17 = vpop.xlane.xlu0 %402 }
 0x258   : > { %v404_v18 = vmax.f32 %v2892_v16, %v403_v17 }
 0x25a   : > { %v405_v19 = vsub.f32 %v2892_v16, %v404_v18  ;;  %481 = vst.msk [vmem:[#allocation2] sm:$0xff] %vm422_vm4, %v404_v18  ;;  %410 = vperm.xlu0 %2041, %v404_v18  }
 0x25c   : > { %v406_v58 = vmul.f32 1.442695, %v405_v19 }
 0x2d9   : > { %v411_v21 = vpop.permute.xlu0 %410 }
 0x2da   : > { %v413_v22 = vsub.f32 %v399_v8, %v411_v21  ;;  %v815_v8 = vld [vmem:[#allocation2 + $0x18] sm:$0xff] }
 0x2dc   : > { %v414_v23 = vmul.f32 1.442695, %v413_v22  ;;  %v424_v22 = vld [vmem:[#allocation4] sm:$0xff] }
 0x2de   : > { %2043 = vpow2.f32 %v414_v23 }
 0x2df   : > { %2045 = vpow2.f32 %v406_v58 }
 0x2e8   : > { %v2900_v26 = vpop.eup %2043 }
 0x2e9   : > { %v431_v28 = vpack.c.bf16 %v2900_v26, %v2900_v26  ;;  %v2926_v7 = vpop.eup %2045  ;;  %v418_v14 = vsel %vm352_vm2, %v2900_v26, 0.0 }
 0x2eb   : > { %1761 = vmatmul.mubr.msk.bf16.vlgmr.msra.gmra.mrb[0].mxu1 %vm352_vm2, %v431_v28 }
 0x2ec   : > { %1765 = vmatpush3.bf16.xpose.msra.mxu1 %v496_v27  ;;  %1766 = vmatprep.mubr.msk.bf16.mxu1 %vm2385_vm3, %v2384_v5 }
 0x2ed   : > { %1776 = vmatprep.subr.bf16.mxu1 %v2384_v5 }
 0x2f3   : > { %1767 = vmatmul.mubr.msk.bf16.vlgmr.msra.gmra.mrb[4].mxu1 %vm352_vm2, %v486_v25 }
 0x2f4   : > { %1777 = vmatpush3.bf16.xpose.msra.mxu1 %v635_v31  ;;  %1778 = vmatprep.mubr.msk.bf16.mxu1 %vm2385_vm3, %v2384_v5 }
 0x2f5   : > { %1788 = vmatprep.subr.bf16.mxu1 %v2384_v5 }
 0x2fb   : > { %1779 = vmatmul.mubr.msk.bf16.vlgmr.msra.gmra.mrb[8].mxu1 %vm352_vm2, %v628_v30 }
 0x2fc   : > { %1789 = vmatpush3.bf16.xpose.msra.mxu1 %v771_v33  ;;  %1790 = vmatprep.mubr.msk.bf16.mxu1 %vm2385_vm3, %v2384_v5 }
 0x303   : > { %1791 = vmatmul.mubr.msk.bf16.vlgmr.msra.gmra.mrb[12].mxu1 %vm352_vm2, %v764_v34 }
 0x3be   : > { %v2919_v35 = vpop.f32.mrb[0].mxu1 }
 0x3bf   : > { %v1762_v36 = vpop.f32.mrb[1].mxu1 }
 0x3c0   : > { %v476_v37 = vpop.f32.mrb[2].mxu1 }
 0x3c1   : > { %v1763_v38 = vpop.f32.mrb[3].mxu1 }
 0x3c6   : > { %v532_v39 = vpop.f32.mrb[4].mxu1 }
 0x3c7   : > { %v538_v40 = vmul.f32 0.35355338, %v532_v39  ;;  %v1768_v41 = vpop.f32.mrb[5].mxu1 }
 0x3c8   : > { %v535_v42 = vpop.f32.mrb[6].mxu1 }
 0x3c9   : > { %v1769_v43 = vpop.f32.mrb[7].mxu1  ;;  %v541_v44 = vsel %vm352_vm2, %v538_v40, -inf }
 0x3ca   : > { %542 = vmax.xlane.f32.xlu1 %v541_v44 }
 0x3ce   : > { %v671_v45 = vpop.f32.mrb[8].mxu1 }
 0x3cf   : > { %v677_v46 = vmul.f32 0.35355338, %v671_v45  ;;  %v1780_v47 = vpop.f32.mrb[9].mxu1 }
 0x3d0   : > { %v674_v48 = vpop.f32.mrb[10].mxu1  ;;  %v416_v47 = vld [vmem:[#allocation3] sm:$0xff] }
 0x3d1   : > { %v1781_v49 = vpop.f32.mrb[11].mxu1  ;;  %v680_v50 = vsel %vm352_vm2, %v677_v46, -inf  ;;  %v417_v48 = vmul.f32 %v2926_v7, %v416_v47 }
 0x3d2   : > { %681 = vmax.xlane.f32.xlu0 %v680_v50 }
 0x3d6   : > { %v807_v51 = vpop.f32.mrb[12].mxu1 }
 0x3d7   : > { %v813_v52 = vmul.f32 0.35355338, %v807_v51  ;;  %v1792_v53 = vpop.f32.mrb[13].mxu1 }
 0x3d8   : > { %v810_v54 = vpop.f32.mrb[14].mxu1 }
 0x3d9   : > { %v1793_v55 = vpop.f32.mrb[15].mxu1  ;;  %v816_v56 = vsel %vm352_vm2, %v813_v52, -inf }
 0x3da   : > { %817 = vmax.xlane.f32.xlu1 %v816_v56 }
 0x457   : > { %v543_v59 = vpop.xlane.xlu1 %542 }
 0x458   : > { %v544_v60 = vmax.f32 %v540_v57, %v543_v59 }
 0x45a   : > { %v545_v61 = vsub.f32 %v540_v57, %v544_v60  ;;  %626 = vst.msk [vmem:[#allocation2 + $0x8] sm:$0xff] %vm422_vm4, %v544_v60  ;;  %550 = vperm.xlu1 %2042, %v544_v60   ;;  %v832_v60 = vld [vmem:[#allocation3 + $0x18] sm:$0xff] }
 0x45c   : > { %v546_v15 = vmul.f32 1.442695, %v545_v61 }
 0x45f   : > { %v682_v63 = vpop.xlane.xlu0 %681 }
 0x460   : > { %v683_v0 = vmax.f32 %v679_v62, %v682_v63 }
 0x462   : > { %v684_v1 = vsub.f32 %v679_v62, %v683_v0  ;;  %762 = vst.msk [vmem:[#allocation2 + $0x10] sm:$0xff] %vm422_vm4, %v683_v0  ;;  %689 = vperm.xlu0 %2041, %v683_v0   ;;  %v565_v0 = vld [vmem:[#allocation4 + $0x8] sm:$0xff] }
 0x464   : > { %v685_v6 = vmul.f32 1.442695, %v684_v1 }
 0x466   : > { %2047 = vpow2.f32 %v685_v6  ;;  %427 = vperm.xlu0 %2041, %v2926_v7  }
 0x467   : > { %v818_v9 = vpop.xlane.xlu1 %817  ;;  %2049 = vpow2.f32 %v546_v15 }
 0x468   : > { %v819_v10 = vmax.f32 %v815_v8, %v818_v9 }
 0x46a   : > { %v820_v11 = vsub.f32 %v815_v8, %v819_v10  ;;  %898 = vst.msk [vmem:[#allocation2 + $0x18] sm:$0xff] %vm422_vm4, %v819_v10  ;;  %825 = vperm.xlu1 %2042, %v819_v10  }
 0x46c   : > { %v821_v43 = vmul.f32 1.442695, %v820_v11  ;;  %v704_v11 = vld [vmem:[#allocation4 + $0x10] sm:$0xff] }
 0x46e   : > { %576 = vrot.lane.b32.xlu1 %v1697_v12, %s2387_s30 }
 0x470   : > { %v2933_v13 = vpop.eup %2047 }
 0x471   : > { %707 = vperm.xlu0 %2041, %v2933_v13   ;;  %v2050_v16 = vpop.eup %2049 }
 0x472   : > { %712 = vrot.lane.b32.xlu1 %v1697_v12, %s2388_s18 }
 0x476   : > { %848 = vrot.lane.b32.xlu1 %v1697_v12, %s2389_s19 }
 0x49a   : > { %419 = vadd.xlane.f32.xlu1 %v418_v14 }
 0x4ab   : > { %568 = vperm.xlu1 %2042, %v2050_v16  }
 0x4d9   : > { %v551_v17 = vpop.permute.xlu1 %550 }
 0x4da   : > { %v553_v18 = vsub.f32 %v538_v40, %v551_v17 }
 0x4dc   : > { %v554_v19 = vmul.f32 1.442695, %v553_v18  ;;  %v840_v18 = vld [vmem:[#allocation4 + $0x18] sm:$0xff] }
 0x4de   : > { %2051 = vpow2.f32 %v554_v19 }
 0x4e1   : > { %v690_v20 = vpop.permute.xlu0 %689 }
 0x4e2   : > { %v692_v21 = vsub.f32 %v677_v46, %v690_v20 }
 0x4e4   : > { %v693_v23 = vmul.f32 1.442695, %v692_v21 }
 0x4e5   : > { %v428_v24 = vpop.permute.xlu0 %427 }
 0x4e6   : > { %2053 = vpow2.f32 %v693_v23  ;;  %v430_v25 = vmul.f32 %v428_v24, %v424_v22 }
 0x4e8   : > { %v2052_v27 = vpop.eup %2051  ;;  %v479_v28 = vadd.f32 %v2919_v35, %v430_v25 }
 0x4e9   : > { %v826_v26 = vpop.permute.xlu1 %825  ;;  %v559_v29 = vsel %vm352_vm2, %v2052_v27, 0.0  ;;  %v572_v36 = vpack.c.bf16 %v2052_v27, %v2052_v27 }
 0x4ea   : > { %480 = vst.msk [vmem:[#allocation4] sm:$0xff] %vm352_vm2, %v479_v28  ;;  %v828_v30 = vsub.f32 %v813_v52, %v826_v26  ;;  %560 = vadd.xlane.f32.xlu0 %v559_v29  ;;  %v557_v52 = vld [vmem:[#allocation3 + $0x8] sm:$0xff] }
 0x4eb   : > { %v558_v53 = vmul.f32 %v2050_v16, %v557_v52 }
 0x4ec   : > { %v829_v31 = vmul.f32 1.442695, %v828_v30 }
 0x4ed   : > { %v577_v32 = vpop.permute.xlu1 %576 }
 0x4ee   : > { %2055 = vpow2.f32 %v829_v31  ;;  %v582_v33 = vsel %vm435_vm5, %v577_v32, 0 }
 0x4ef   : > { %1771 = vmatpush3.bf16.msra.mxu0 %v582_v33  ;;  %2057 = vpow2.f32 %v821_v43 }
 0x4f0   : > { %v2054_v34 = vpop.eup %2053  ;;  %1782 = vmatprep.subr.bf16.mxu0 %v2384_v5  ;;  %v708_v51 = vpop.permute.xlu0 %707 }
 0x4f1   : > { %v698_v37 = vsel %vm352_vm2, %v2054_v34, 0.0  ;;  %v713_v35 = vpop.permute.xlu1 %712  ;;  %v711_v41 = vpack.c.bf16 %v2054_v34, %v2054_v34  ;;  %v710_v12 = vmul.f32 %v708_v51, %v704_v11 }
 0x4f2   : > { %1773 = vmatmul.mubr.msk.bf16.vlgmr.msra.gmra.mrb[4].mxu0 %vm352_vm2, %v572_v36  ;;  %699 = vadd.xlane.f32.xlu0 %v698_v37  ;;  %v718_v38 = vsel %vm435_vm5, %v713_v35, 0 }
 0x4f3   : > { %1783 = vmatpush3.bf16.msra.mxu0 %v718_v38  ;;  %1784 = vmatprep.mubr.msk.bf16.mxu0 %vm2385_vm3, %v2384_v5 }
 0x4f4   : > { %1794 = vmatprep.subr.bf16.mxu0 %v2384_v5 }
 0x4f5   : > { %v849_v39 = vpop.permute.xlu1 %848 }
 0x4f6   : > { %v854_v42 = vsel %vm435_vm5, %v849_v39, 0 }
 0x4f8   : > { %v2056_v40 = vpop.eup %2055 }
 0x4f9   : > { %v834_v44 = vsel %vm352_vm2, %v2056_v40, 0.0  ;;  %v847_v45 = vpack.c.bf16 %v2056_v40, %v2056_v40  ;;  %v2058_v46 = vpop.eup %2057 }
 0x4fa   : > { %1785 = vmatmul.mubr.msk.bf16.vlgmr.msra.gmra.mrb[8].mxu0 %vm352_vm2, %v711_v41  ;;  %835 = vadd.xlane.f32.xlu1 %v834_v44  ;;  %v833_v61 = vmul.f32 %v2058_v46, %v832_v60 }
 0x4fb   : > { %1795 = vmatpush3.bf16.msra.mxu0 %v854_v42  ;;  %1796 = vmatprep.mubr.msk.bf16.mxu0 %vm2385_vm3, %v2384_v5  ;;  %v696_v5 = vld [vmem:[#allocation3 + $0x10] sm:$0xff] }
 0x4fc   : > { %v697_v56 = vmul.f32 %v2933_v13, %v696_v5 }
 0x502   : > { %1797 = vmatmul.mubr.msk.bf16.vlgmr.msra.gmra.mrb[12].mxu0 %vm352_vm2, %v847_v45 }
 0x508   : > { %843 = vperm.xlu0 %2041, %v2058_v46  }
 0x527   : > { %v420_v49 = vpop.xlane.xlu1 %419 }
 0x528   : > { %v421_v50 = vadd.f32 %v420_v49, %v417_v48 }
 0x52a   : > { %423 = vst.msk [vmem:[#allocation3] sm:$0xff] %vm422_vm4, %v421_v50 }
 0x52b   : > { %v569_v59 = vpop.permute.xlu1 %568 }
 0x52c   : > { %v571_v1 = vmul.f32 %v569_v59, %v565_v0 }
 0x577   : > { %v561_v54 = vpop.xlane.xlu0 %560 }
 0x578   : > { %v562_v55 = vadd.f32 %v561_v54, %v558_v53 }
 0x57a   : > { %563 = vst.msk [vmem:[#allocation3 + $0x8] sm:$0xff] %vm422_vm4, %v562_v55 }
 0x57f   : > { %v700_v57 = vpop.xlane.xlu0 %699 }
 0x580   : > { %v701_v58 = vadd.f32 %v700_v57, %v697_v56 }
 0x582   : > { %702 = vst.msk [vmem:[#allocation3 + $0x10] sm:$0xff] %vm422_vm4, %v701_v58 }
 0x587   : > { %v836_v62 = vpop.xlane.xlu1 %835  ;;  %v844_v19 = vpop.permute.xlu0 %843 }
 0x588   : > { %v837_v63 = vadd.f32 %v836_v62, %v833_v61  ;;  %v846_v20 = vmul.f32 %v844_v19, %v840_v18 }
 0x58a   : > { %838 = vst.msk [vmem:[#allocation3 + $0x18] sm:$0xff] %vm422_vm4, %v837_v63 }
 0x5c5   : > { %v618_v6 = vpop.f32.mrb[4].mxu0 }
 0x5c6   : > { %v624_v7 = vadd.f32 %v618_v6, %v571_v1  ;;  %v1774_v8 = vpop.f32.mrb[5].mxu0 }
 0x5c7   : > { %v621_v9 = vpop.f32.mrb[6].mxu0 }
 0x5c8   : > { %625 = vst.msk [vmem:[#allocation4 + $0x8] sm:$0xff] %vm352_vm2, %v624_v7  ;;  %v1775_v10 = vpop.f32.mrb[7].mxu0 }
 0x5cd   : > { %v754_v13 = vpop.f32.mrb[8].mxu0 }
 0x5ce   : > { %v760_v14 = vadd.f32 %v754_v13, %v710_v12  ;;  %v1786_v15 = vpop.f32.mrb[9].mxu0 }
 0x5cf   : > { %v757_v16 = vpop.f32.mrb[10].mxu0 }
 0x5d0   : > { %761 = vst.msk [vmem:[#allocation4 + $0x10] sm:$0xff] %vm352_vm2, %v760_v14  ;;  %v1787_v17 = vpop.f32.mrb[11].mxu0 }
 0x5d5   : > { %v890_v21 = vpop.f32.mrb[12].mxu0 }
 0x5d6   : > { %v896_v22 = vadd.f32 %v890_v21, %v846_v20  ;;  %v1798_v23 = vpop.f32.mrb[13].mxu0 }
 0x5d7   : > { %v893_v24 = vpop.f32.mrb[14].mxu0 }
 0x5d8   : > { %897 = vst.msk [vmem:[#allocation4 + $0x18] sm:$0xff] %vm352_vm2, %v896_v22  ;;  %v1799_v25 = vpop.f32.mrb[15].mxu0 }
 0x5d9 PF: > { %p1703_p12 = scmp.ne.s32.totalorder %s2848_s20, %s2845_s11 }
 0x5da   : > { %vm903_vm6 = vcmask (!%p1703_p12), 64512   ;;  %v2390_v27 = vmov (!%p1703_p12), 0.0   ;;  %vm2391_vm7 = vmmov (!%p1703_p12), 0   ;;  %v951_v26 = vlaneseq (!%p1703_p12)  ;;  %s2393_s17 = smov (!%p1703_p12), 120   ;;  %s2394_s8 = smov (!%p1703_p12), 112   ;;  %v3001_v41 = vld [vmem:[#allocation2] sm:$0xff] (!%p1703_p12) }
 0x5db   : > { %902 = sbr.rel (%p1703_p12) target bundleno = 2952 (0xb88), region = 56  ;;  %1800 = vmatprep.subr.bf16.mxu0 (!%p1703_p12), %v2390_v27  ;;  %v908_v28 = vsel (!%p1703_p12), %vm903_vm6, %v2862_v3, 0  ;;  %1802 = vmatprep.mubr.msk.bf16.mxu0 (!%p1703_p12), %vm2391_vm7, %v2390_v27  ;;  %v2392_v38 = vmov (!%p1703_p12), 0   ;;  %v1707_v39 = vcombine.low (!%p1703_p12), %v2862_v3, %v2862_v3  ;;  %v1706_v40 = vcombine.low (!%p1703_p12), %v2858_v2, %v2858_v2  ;;  %s2395_s5 = smov (!%p1703_p12), 104   ;;  %v3047_v22 = vld [vmem:[#allocation2 + $0x8] sm:$0xff] (!%p1703_p12) }
 0x5dc   : > { %1801 = vmatpush3.bf16.xpose.msra.mxu0 (!%p1703_p12), %v908_v28  ;;  %1806 = vmatprep.subr.bf16.mxu1 (!%p1703_p12), %v2390_v27  ;;  %v2981_v29 = vshrl.u32 (!%p1703_p12), %v951_v26, 7  ;;  %v2983_v30 = vand.u32 (!%p1703_p12), 127, %v951_v26  ;;  %vm979_vm9 = vcmask (!%p1703_p12), 7168   ;;  %vm992_vm10 = vcmask (!%p1703_p12), 1043456   ;;  %v1238_v28 = vld [vmem:[#allocation2 + $0x10] sm:$0xff] (!%p1703_p12)  ;;  %s2396_s23 = smov (!%p1703_p12), 8  }
 0x5dd   : > { %1808 = vmatprep.mubr.msk.bf16.mxu1 (!%p1703_p12), %vm2391_vm7, %v2390_v27  ;;  %1818 = vmatprep.subr.bf16.mxu0 (!%p1703_p12), %v2390_v27  ;;  %v994_v43 = vsel (!%p1703_p12), %vm992_vm10, %v2864_v4, 0  ;;  %s2397_s24 = smov (!%p1703_p12), 16   ;;  %s2398_s9 = smov (!%p1703_p12), 24   ;;  %vm1508_vm11 = vcmask (!%p1703_p12), 130048   ;;  %vm1510_vm12 = vcmask (!%p1703_p12), 195584   ;;  %vm1513_vm13 = vcmask (!%p1703_p12), 257024  }
 0x5de   : > { %vm955_vm8 = vcmp.gt.s32.totalorder (!%p1703_p12), %v2983_v30, %v2981_v29  ;;  %2059 = vset.pattern.permute.xlu0 (!%p1703_p12), %v2392_v38  ;;  %2060 = vset.pattern.permute.xlu1 (!%p1703_p12), %v2392_v38  ;;  %v1375_v29 = vld [vmem:[#allocation2 + $0x18] sm:$0xff] (!%p1703_p12) }
 0x5df   : > { %1047 = vrot.lane.b32.xlu1 (!%p1703_p12), %v1707_v39, %s2393_s17  ;;  %1807 = vmatpush3.bf16.msra.mxu1 (!%p1703_p12), %v994_v43 }
 0x5e0   : > { %1812 = vmatprep.subr.bf16.mxu1 (!%p1703_p12), %v2390_v27 }
 0x5e3   : > { %1803 = vmatmul.mubr.msk.bf16.vlgmr.msra.gmra.mrb[0].mxu0 %vm903_vm6, %v2858_v2  ;;  %1042 = vrot.lane.b32.xlu1 %v1706_v40, %s2393_s17 }
 0x5e4   : > { %1820 = vmatprep.mubr.msk.bf16.mxu0 %vm2391_vm7, %v2390_v27 }
 0x5e7   : > { %1187 = vrot.lane.b32.xlu1 %v1707_v39, %s2394_s8 }
 0x5eb   : > { %1185 = vrot.lane.b32.xlu1 %v1706_v40, %s2394_s8 }
 0x5ef   : > { %1324 = vrot.lane.b32.xlu1 %v1707_v39, %s2395_s5 }
 0x5f3   : > { %1322 = vrot.lane.b32.xlu1 %v1706_v40, %s2395_s5 }
 0x651   : > { %v1048_v47 = vpop.permute.xlu1 %1047 }
 0x652   : > { %v1053_v50 = vsel %vm903_vm6, %v1048_v47, 0 }
 0x655   : > { %v1043_v48 = vpop.permute.xlu1 %1042 }
 0x659   : > { %v1188_v52 = vpop.permute.xlu1 %1187 }
 0x65a   : > { %v1193_v54 = vsel %vm903_vm6, %v1188_v52, 0 }
 0x65d   : > { %v1186_v53 = vpop.permute.xlu1 %1185 }
 0x661   : > { %v1325_v55 = vpop.permute.xlu1 %1324 }
 0x662   : > { %v1330_v5 = vsel %vm903_vm6, %v1325_v55, 0 }
 0x665   : > { %v1323_v56 = vpop.permute.xlu1 %1322 }
 0x6b6   : > { %v944_v31 = vpop.f32.mrb[0].mxu0 }
 0x6b7   : > { %v950_v32 = vmul.f32 0.35355338, %v944_v31  ;;  %v1804_v33 = vpop.f32.mrb[1].mxu0 }
 0x6b8   : > { %v947_v34 = vpop.f32.mrb[2].mxu0 }
 0x6b9   : > { %v1805_v36 = vpop.f32.mrb[3].mxu0  ;;  %v956_v37 = vsel %vm955_vm8, -1e+30, %v950_v32 }
 0x6ba   : > { %v958_v35 = vsel %vm903_vm6, %v956_v37, -inf  ;;  %v1709_v36 = vcombine.low %v2864_v4, %v2864_v4 }
 0x6bb   : > { %959 = vmax.xlane.f32.xlu0 %v958_v35 }
 0x748   : > { %v960_v3 = vpop.xlane.xlu0 %959 }
 0x749   : > { %v3004_v42 = vmax.f32 %v3001_v41, %v960_v3 }
 0x74b   : > { %v962_v2 = vsub.f32 %v3001_v41, %v3004_v42  ;;  %1038 = vst.msk [vmem:[#allocation2] sm:$0xff] %vm979_vm9, %v3004_v42  ;;  %967 = vperm.xlu0 %2059, %v3004_v42  }
 0x7ca   : > { %v968_v44 = vpop.permute.xlu0 %967 }
 0x7cb   : > { %v970_v45 = vsub.f32 %v956_v37, %v968_v44 }
 0x7cd   : > { %v971_v46 = vmul.f32 1.442695, %v970_v45 }
 0x7cf   : > { %2061 = vpow2.f32 %v971_v46 }
 0x7d9   : > { %v3014_v49 = vpop.eup %2061 }
 0x7da   : > { %v988_v51 = vpack.c.bf16 %v3014_v49, %v3014_v49  ;;  %v975_v37 = vsel %vm903_vm6, %v3014_v49, 0.0 }
 0x7dc   : > { %1809 = vmatmul.mubr.msk.bf16.vlgmr.msra.gmra.mrb[0].mxu1 %vm903_vm6, %v988_v51 }
 0x7dd   : > { %1813 = vmatpush3.bf16.xpose.msra.mxu1 %v1053_v50  ;;  %1814 = vmatprep.mubr.msk.bf16.mxu1 %vm2391_vm7, %v2390_v27 }
 0x7de   : > { %1824 = vmatprep.subr.bf16.mxu1 %v2390_v27 }
 0x7e4   : > { %1815 = vmatmul.mubr.msk.bf16.vlgmr.msra.gmra.mrb[4].mxu1 %vm903_vm6, %v1043_v48 }
 0x7e5   : > { %1825 = vmatpush3.bf16.xpose.msra.mxu1 %v1193_v54  ;;  %1826 = vmatprep.mubr.msk.bf16.mxu1 %vm2391_vm7, %v2390_v27 }
 0x7e6   : > { %1836 = vmatprep.subr.bf16.mxu1 %v2390_v27 }
 0x7ec   : > { %1827 = vmatmul.mubr.msk.bf16.vlgmr.msra.gmra.mrb[8].mxu1 %vm903_vm6, %v1186_v53 }
 0x7ed   : > { %1837 = vmatpush3.bf16.xpose.msra.mxu1 %v1330_v5  ;;  %1838 = vmatprep.mubr.msk.bf16.mxu1 %vm2391_vm7, %v2390_v27 }
 0x7f4   : > { %1839 = vmatmul.mubr.msk.bf16.vlgmr.msra.gmra.mrb[12].mxu1 %vm903_vm6, %v1323_v56 }
 0x8af   : > { %v3033_v57 = vpop.f32.mrb[0].mxu1 }
 0x8b0   : > { %v1810_v58 = vpop.f32.mrb[1].mxu1 }
 0x8b1   : > { %v1033_v59 = vpop.f32.mrb[2].mxu1 }
 0x8b2   : > { %v1811_v60 = vpop.f32.mrb[3].mxu1  ;;  %v963_v59 = vmul.f32 1.442695, %v962_v2 }
 0x8b7   : > { %v1089_v61 = vpop.f32.mrb[4].mxu1 }
 0x8b8   : > { %v1095_v62 = vmul.f32 0.35355338, %v1089_v61  ;;  %v1816_v63 = vpop.f32.mrb[5].mxu1 }
 0x8b9   : > { %v1092_v0 = vpop.f32.mrb[6].mxu1 }
 0x8ba   : > { %v1817_v1 = vpop.f32.mrb[7].mxu1  ;;  %v1096_v6 = vsel %vm955_vm8, -1e+30, %v1095_v62 }
 0x8bb   : > { %v1099_v7 = vsel %vm903_vm6, %v1096_v6, -inf }
 0x8bc   : > { %1100 = vmax.xlane.f32.xlu1 %v1099_v7 }
 0x8bf   : > { %v1229_v8 = vpop.f32.mrb[8].mxu1 }
 0x8c0   : > { %v1235_v9 = vmul.f32 0.35355338, %v1229_v8  ;;  %v1828_v10 = vpop.f32.mrb[9].mxu1 }
 0x8c1   : > { %v1232_v11 = vpop.f32.mrb[10].mxu1 }
 0x8c2   : > { %v1829_v12 = vpop.f32.mrb[11].mxu1  ;;  %v1236_v13 = vsel %vm955_vm8, -1e+30, %v1235_v9  ;;  %v1115_v11 = vld [vmem:[#allocation3 + $0x8] sm:$0xff] }
 0x8c3   : > { %v1239_v14 = vsel %vm903_vm6, %v1236_v13, -inf }
 0x8c4   : > { %1240 = vmax.xlane.f32.xlu0 %v1239_v14 }
 0x8c7   : > { %v1366_v15 = vpop.f32.mrb[12].mxu1 }
 0x8c8   : > { %v1372_v16 = vmul.f32 0.35355338, %v1366_v15  ;;  %v1840_v17 = vpop.f32.mrb[13].mxu1  ;;  %v1255_v15 = vld [vmem:[#allocation3 + $0x10] sm:$0xff] }
 0x8c9   : > { %v1369_v18 = vpop.f32.mrb[14].mxu1 }
 0x8ca   : > { %v1841_v19 = vpop.f32.mrb[15].mxu1  ;;  %v1373_v20 = vsel %vm955_vm8, -1e+30, %v1372_v16 }
 0x8cb   : > { %v1376_v21 = vsel %vm903_vm6, %v1373_v20, -inf }
 0x8cc   : > { %1377 = vmax.xlane.f32.xlu1 %v1376_v21  ;;  %v981_v21 = vld [vmem:[#allocation4] sm:$0xff] }
 0x949   : > { %v1101_v23 = vpop.xlane.xlu1 %1100 }
 0x94a   : > { %v1102_v24 = vmax.f32 %v3047_v22, %v1101_v23 }
 0x94c   : > { %v1103_v25 = vsub.f32 %v3047_v22, %v1102_v24  ;;  %1184 = vst.msk [vmem:[#allocation2 + $0x8] sm:$0xff] %vm979_vm9, %v1102_v24  ;;  %1108 = vperm.xlu1 %2060, %v1102_v24  }
 0x94e   : > { %v1104_v61 = vmul.f32 1.442695, %v1103_v25 }
 0x951   : > { %v1241_v26 = vpop.xlane.xlu0 %1240 }
 0x952   : > { %v1242_v31 = vmax.f32 %v1238_v28, %v1241_v26 }
 0x954   : > { %v1243_v32 = vsub.f32 %v1238_v28, %v1242_v31  ;;  %1321 = vst.msk [vmem:[#allocation2 + $0x10] sm:$0xff] %vm979_vm9, %v1242_v31  ;;  %1248 = vperm.xlu0 %2059, %v1242_v31  }
 0x956   : > { %v1244_v63 = vmul.f32 1.442695, %v1243_v32 }
 0x959   : > { %v1378_v30 = vpop.xlane.xlu1 %1377 }
 0x95a   : > { %v1379_v33 = vmax.f32 %v1375_v29, %v1378_v30 }
 0x95c   : > { %v1380_v34 = vsub.f32 %v1375_v29, %v1379_v33  ;;  %1458 = vst.msk [vmem:[#allocation2 + $0x18] sm:$0xff] %vm979_vm9, %v1379_v33  ;;  %1385 = vperm.xlu1 %2060, %v1379_v33  }
 0x95e   : > { %v1381_v62 = vmul.f32 1.442695, %v1380_v34  ;;  %v1123_v34 = vld [vmem:[#allocation4 + $0x8] sm:$0xff] }
 0x960   : > { %1134 = vrot.lane.b32.xlu1 %v1709_v36, %s2393_s17 }
 0x964   : > { %1271 = vrot.lane.b32.xlu1 %v1709_v36, %s2394_s8 }
 0x968   : > { %1408 = vrot.lane.b32.xlu1 %v1709_v36, %s2395_s5 }
 0x98c   : > { %976 = vadd.xlane.f32.xlu1 %v975_v37 }
 0x9cb   : > { %v1109_v35 = vpop.permute.xlu1 %1108 }
 0x9cc   : > { %v1111_v38 = vsub.f32 %v1096_v6, %v1109_v35  ;;  %v973_v6 = vld [vmem:[#allocation3] sm:$0xff] }
 0x9ce   : > { %v1112_v39 = vmul.f32 1.442695, %v1111_v38 }
 0x9d0   : > { %2063 = vpow2.f32 %v1112_v39 }
 0x9d3   : > { %v1249_v40 = vpop.permute.xlu0 %1248 }
 0x9d4   : > { %v1251_v3 = vsub.f32 %v1236_v13, %v1249_v40 }
 0x9d6   : > { %v1252_v43 = vmul.f32 1.442695, %v1251_v3  ;;  %v1263_v3 = vld [vmem:[#allocation4 + $0x10] sm:$0xff] }
 0x9d8   : > { %2065 = vpow2.f32 %v1252_v43 }
 0x9da   : > { %v2064_v44 = vpop.eup %2063 }
 0x9db   : > { %v1386_v4 = vpop.permute.xlu1 %1385  ;;  %v1117_v45 = vsel %vm903_vm6, %v2064_v44, 0.0  ;;  %v1130_v51 = vpack.c.bf16 %v2064_v44, %v2064_v44 }
 0x9dc   : > { %v1388_v46 = vsub.f32 %v1373_v20, %v1386_v4  ;;  %1118 = vadd.xlane.f32.xlu0 %v1117_v45  ;;  %v1392_v20 = vld [vmem:[#allocation3 + $0x18] sm:$0xff] }
 0x9de   : > { %v1389_v47 = vmul.f32 1.442695, %v1388_v46 }
 0x9df   : > { %v1135_v48 = vpop.permute.xlu1 %1134 }
 0x9e0   : > { %2067 = vpow2.f32 %v1389_v47  ;;  %v1140_v49 = vsel %vm992_vm10, %v1135_v48, 0 }
 0x9e1   : > { %1819 = vmatpush3.bf16.msra.mxu0 %v1140_v49  ;;  %2069 = vpow2.f32 %v963_v59  ;;  %v1400_v49 = vld [vmem:[#allocation4 + $0x18] sm:$0xff] }
 0x9e2   : > { %v2066_v50 = vpop.eup %2065  ;;  %1830 = vmatprep.subr.bf16.mxu0 %v2390_v27  ;;  %2071 = vpow2.f32 %v1104_v61 }
 0x9e3   : > { %v1257_v52 = vsel %vm903_vm6, %v2066_v50, 0.0  ;;  %v1272_v53 = vpop.permute.xlu1 %1271  ;;  %v1270_v56 = vpack.c.bf16 %v2066_v50, %v2066_v50  ;;  %2073 = vpow2.f32 %v1381_v62 }
 0x9e4   : > { %1258 = vadd.xlane.f32.xlu0 %v1257_v52  ;;  %1821 = vmatmul.mubr.msk.bf16.vlgmr.msra.gmra.mrb[4].mxu0 %vm903_vm6, %v1130_v51  ;;  %v1277_v54 = vsel %vm992_vm10, %v1272_v53, 0  ;;  %2075 = vpow2.f32 %v1244_v63 }
 0x9e5   : > { %1831 = vmatpush3.bf16.msra.mxu0 %v1277_v54  ;;  %1832 = vmatprep.mubr.msk.bf16.mxu0 %vm2391_vm7, %v2390_v27 }
 0x9e6   : > { %1842 = vmatprep.subr.bf16.mxu0 %v2390_v27 }
 0x9e7   : > { %v1409_v55 = vpop.permute.xlu1 %1408 }
 0x9e8   : > { %v1414_v58 = vsel %vm992_vm10, %v1409_v55, 0 }
 0x9ea   : > { %v2068_v5 = vpop.eup %2067 }
 0x9eb   : > { %v1394_v60 = vsel %vm903_vm6, %v2068_v5, 0.0  ;;  %v1407_v0 = vpack.c.bf16 %v2068_v5, %v2068_v5  ;;  %v2070_v41 = vpop.eup %2069 }
 0x9ec   : > { %1833 = vmatmul.mubr.msk.bf16.vlgmr.msra.gmra.mrb[8].mxu0 %vm903_vm6, %v1270_v56  ;;  %1395 = vadd.xlane.f32.xlu1 %v1394_v60  ;;  %v2072_v42 = vpop.eup %2071 }
 0x9ed   : > { %1843 = vmatpush3.bf16.msra.mxu0 %v1414_v58  ;;  %1844 = vmatprep.mubr.msk.bf16.mxu0 %vm2391_vm7, %v2390_v27  ;;  %v2074_v2 = vpop.eup %2073  ;;  %v974_v27 = vmul.f32 %v2070_v41, %v973_v6  ;;  %v1116_v12 = vmul.f32 %v2072_v42, %v1115_v11 }
 0x9ee   : > { %v2076_v1 = vpop.eup %2075  ;;  %v1393_v22 = vmul.f32 %v2074_v2, %v1392_v20 }
 0x9ef   : > { %v1256_v16 = vmul.f32 %v2076_v1, %v1255_v15 }
 0x9f4   : > { %1845 = vmatmul.mubr.msk.bf16.vlgmr.msra.gmra.mrb[12].mxu0 %vm903_vm6, %v1407_v0 }
 0x9fa   : > { %984 = vperm.xlu0 %2059, %v2070_v41  }
 0x9fd   : > { %1126 = vperm.xlu1 %2060, %v2072_v42  }
 0x9fe   : > { %1403 = vperm.xlu0 %2059, %v2074_v2  }
 0xa01   : > { %1266 = vperm.xlu1 %2060, %v2076_v1  }
 0xa19   : > { %v977_v7 = vpop.xlane.xlu1 %976 }
 0xa1a   : > { %v978_v8 = vadd.f32 %v977_v7, %v974_v27 }
 0xa1c   : > { %980 = vst.msk [vmem:[#allocation3] sm:$0xff] %vm979_vm9, %v978_v8 }
 0xa23   : > { %v1460_v9 = vld [vmem:[#allocation3] sm:$0xff] }
 0xa24   : > { %2077 = vrcp.f32 %v1460_v9 }
 0xa2e   : > { %v2078_v10 = vpop.eup %2077 }
 0xa2f   : > { %1464 = vperm.xlu1 %2060, %v2078_v10  }
 0xa69   : > { %v1119_v13 = vpop.xlane.xlu0 %1118 }
 0xa6a   : > { %v1120_v14 = vadd.f32 %v1119_v13, %v1116_v12 }
 0xa6c   : > { %1121 = vst.msk [vmem:[#allocation3 + $0x8] sm:$0xff] %vm979_vm9, %v1120_v14 }
 0xa71   : > { %v1259_v17 = vpop.xlane.xlu0 %1258 }
 0xa72   : > { %v1260_v18 = vadd.f32 %v1259_v17, %v1256_v16 }
 0xa73   : > { %v1469_v19 = vld [vmem:[#allocation3 + $0x8] sm:$0xff] }
 0xa74   : > { %1261 = vst.msk [vmem:[#allocation3 + $0x10] sm:$0xff] %vm979_vm9, %v1260_v18  ;;  %2079 = vrcp.f32 %v1469_v19 }
 0xa79   : > { %v1396_v23 = vpop.xlane.xlu1 %1395  ;;  %v985_v24 = vpop.permute.xlu0 %984 }
 0xa7a   : > { %v1397_v25 = vadd.f32 %v1396_v23, %v1393_v22  ;;  %v987_v28 = vmul.f32 %v985_v24, %v981_v21 }
 0xa7b   : > { %v1478_v26 = vld [vmem:[#allocation3 + $0x10] sm:$0xff] }
 0xa7c   : > { %1398 = vst.msk [vmem:[#allocation3 + $0x18] sm:$0xff] %vm979_vm9, %v1397_v25  ;;  %v1036_v31 = vadd.f32 %v3033_v57, %v987_v28  ;;  %2081 = vrcp.f32 %v1478_v26 }
 0xa7d   : > { %v1127_v36 = vpop.permute.xlu1 %1126  ;;  %v1404_v50 = vpop.permute.xlu0 %1403 }
 0xa7e   : > { %v2080_v32 = vpop.eup %2079  ;;  %1037 = vst.msk [vmem:[#allocation4] sm:$0xff] %vm903_vm6, %v1036_v31  ;;  %v1129_v37 = vmul.f32 %v1127_v36, %v1123_v34  ;;  %v1406_v51 = vmul.f32 %v1404_v50, %v1400_v49 }
 0xa7f   : > { %1473 = vperm.xlu0 %2059, %v2080_v32  }
 0xa81   : > { %v1267_v43 = vpop.permute.xlu1 %1266 }
 0xa82   : > { %v1269_v44 = vmul.f32 %v1267_v43, %v1263_v3 }
 0xa83   : > { %v1487_v29 = vld [vmem:[#allocation3 + $0x18] sm:$0xff] }
 0xa84   : > { %2083 = vrcp.f32 %v1487_v29 }
 0xa85   : > { %v1459_v2 = vld [vmem:[#allocation4] sm:$0xff] }
 0xa86   : > { %v2082_v30 = vpop.eup %2081 }
 0xa87   : > { %1482 = vperm.xlu1 %2060, %v2082_v30  }
 0xa8e   : > { %v2084_v33 = vpop.eup %2083 }
 0xa8f   : > { %1491 = vperm.xlu0 %2059, %v2084_v33  }
 0xaae   : > { %v1465_v60 = vpop.permute.xlu1 %1464 }
 0xaaf   : > { %v1467_v6 = vmul.f32 %v1465_v60, %v1459_v2 }
 0xab7   : > { %v1176_v35 = vpop.f32.mrb[4].mxu0 }
 0xab8   : > { %v1182_v38 = vadd.f32 %v1176_v35, %v1129_v37  ;;  %v1822_v39 = vpop.f32.mrb[5].mxu0 }
 0xab9   : > { %v1179_v40 = vpop.f32.mrb[6].mxu0 }
 0xaba   : > { %1183 = vst.msk [vmem:[#allocation4 + $0x8] sm:$0xff] %vm903_vm6, %v1182_v38  ;;  %v1823_v57 = vpop.f32.mrb[7].mxu0 }
 0xabf   : > { %v1313_v4 = vpop.f32.mrb[8].mxu0 }
 0xac0   : > { %v1319_v45 = vadd.f32 %v1313_v4, %v1269_v44  ;;  %v1834_v46 = vpop.f32.mrb[9].mxu0 }
 0xac1   : > { %v1316_v47 = vpop.f32.mrb[10].mxu0  ;;  %v1468_v58 = vld [vmem:[#allocation4 + $0x8] sm:$0xff] }
 0xac2   : > { %1320 = vst.msk [vmem:[#allocation4 + $0x10] sm:$0xff] %vm903_vm6, %v1319_v45  ;;  %v1835_v48 = vpop.f32.mrb[11].mxu0 }
 0xac7   : > { %v1450_v52 = vpop.f32.mrb[12].mxu0 }
 0xac8   : > { %v1456_v53 = vadd.f32 %v1450_v52, %v1406_v51  ;;  %v1846_v54 = vpop.f32.mrb[13].mxu0 }
 0xac9   : > { %v1453_v55 = vpop.f32.mrb[14].mxu0  ;;  %v1477_v62 = vld [vmem:[#allocation4 + $0x10] sm:$0xff] }
 0xaca   : > { %1457 = vst.msk [vmem:[#allocation4 + $0x18] sm:$0xff] %vm903_vm6, %v1456_v53  ;;  %v1847_v5 = vpop.f32.mrb[15].mxu0 }
 0xad1   : > { %v1486_v41 = vld [vmem:[#allocation4 + $0x18] sm:$0xff] }
 0xafe   : > { %v1474_v56 = vpop.permute.xlu0 %1473 }
 0xaff   : > { %v1476_v59 = vmul.f32 %v1474_v56, %v1468_v58 }
 0xb01   : > { %1496 = vrot.lane.b32.xlu1 %v1476_v59, %s2396_s23 }
 0xb06   : > { %v1483_v61 = vpop.permute.xlu1 %1482 }
 0xb07   : > { %v1485_v63 = vmul.f32 %v1483_v61, %v1477_v62 }
 0xb09   : > { %1500 = vrot.lane.b32.xlu0 %v1485_v63, %s2397_s24 }
 0xb0e   : > { %v1492_v0 = vpop.permute.xlu0 %1491 }
 0xb0f   : > { %v1494_v42 = vmul.f32 %v1492_v0, %v1486_v41 }
 0xb11   : > { %1504 = vrot.lane.b32.xlu1 %v1494_v42, %s2398_s9 }
 0xb73   : > { %v1497_v1 = vpop.permute.xlu1 %1496 }
 0xb74   : > { %v1507_v7 = vsel %vm903_vm6, %v1467_v6, %v1497_v1 }
 0xb7b   : > { %v1501_v27 = vpop.permute.xlu0 %1500 }
 0xb7c   : > { %v1509_v8 = vsel %vm1508_vm11, %v1507_v7, %v1501_v27 }
 0xb83   : > { %v1505_v9 = vpop.permute.xlu1 %1504 }
 0xb84   : > { %v1511_v10 = vsel %vm1510_vm12, %v1509_v8, %v1505_v9 }
 0xb85   : > { %v1512_v11 = vpack.c.bf16 %v1511_v10, %v1511_v10 }
 0xb87   : > { %1514 = vst.msk [vmem:[%s319_s7] sm:$0xf] %vm1513_vm13, %v1512_v11 }
 0xb88 PF: > { %s3261_s6 = sld [smem:[#allocation39_spill]]  ;;  %s3263_s29 = sld [smem:[#allocation32_spill]] }
 0xb89   : > { %s3264_s15 = sld [smem:[#allocation33_spill]]  ;;  %s1533_s11 = sshll.u32 %s319_s7, 4  ;;  %s3099_s11 = int_to_ptr.vmem [resolvable:$true] %s1533_s11 }
 0xb8a   : > { %s3266_s17 = sld [smem:[#allocation43_spill]]  ;;  %s1516_s23 = scalar_lea.sflag [#allocation10], %s317_s13 }
 0xb8b   : > { %s2195_s24 = scalar_lea.vmem %s3099_s11, 64  ;;  %s2399_s26 = smov [#allocation14]  }
 0xb8c   : > { %p2196_p11 = scmp.ne.s32.totalorder %s3099_s11, %s2195_s24  ;;  %s2199_s7 = sshll.u32 %s2399_s26, 4  ;;  %s2200_s7 = int_to_ptr.vmem [resolvable:$false] %s2199_s7 }
 0xb8d   : > { %s2201_s9 = scalar_lea.vmem %s2200_s7, 128  ;;  %p2202_p13 = scmp.lt.s32.totalorder %s3099_s11, %s2200_s7 }
 0xb8e   : > { %p3262_p2 = scmp.ne.s32.totalorder %s3261_s6, 0  ;;  %p2203_p10 = scmp.lt.s32.totalorder %s2201_s9, %s2195_s24 }
 0xb8f   : > { %s1716_s10 = sshll.u32 %s3264_s15, 1 }
 0xb90   : > { %s1860_s0 = scalar_select %p3262_p2, [#allocation6], [#allocation18] }
 0xb91   : > { %s3310_s29 = smov (!%p3262_p2, %s3263_s29), 0  ;;  %s3267_s8 = smov %s3266_s17 }
 0xb92   : > { %s1523_s28 = sld [smem:[%s1860_s0 + %s3310_s29]]  ;;  %p2197_p4 = pnand %p2196_p11, %p3262_p2 }
 0xb93   : > { %p2204_p7 = por %p2203_p10, %p2202_p13 }
 0xb94   : > { %p2198_p0 = pneg %p2197_p4 }
 0xb96   : > { %p2205_p3 = pnand %p2204_p7, %p2198_p0 }
 0xb98   : > { %s1529_s20 = sadd.s32 %s1716_s10, %s1523_s28 }
 0xb99   : > { %s1717_s30 = sshll.u32 %s1529_s20, 6 }
 0xb9a   : > { %s1531_s5 = scalar_lea.hbm %s3266_s17, %s1717_s30 }
 0xb9b   : > { %2208 = shalt.err (!%p2205_p3)
}
 0xb9c   : > { %s2209_s29 = scalar_lea.hbm %s1531_s5, 64  ;;  %s2213_s14 = scalar_lea.hbm %s3267_s8, 256 }
 0xb9d   : > { %p2210_p9 = scmp.ne.s32.totalorder %s1531_s5, %s2209_s29  ;;  %p2214_p1 = scmp.lt.u32.totalorder %s1531_s5, %s3267_s8 }
 0xb9e   : > { %p2215_p8 = scmp.lt.u32.totalorder %s2213_s14, %s2209_s29  ;;  %p2217_p11 = scmp.lt.u32.totalorder %s2209_s29, %s1531_s5 }
 0xb9f   : > { %p2211_p6 = pnand %p2210_p9, %p3262_p2 }
 0xba0   : > { %p2216_p12 = por %p2215_p8, %p2214_p1 }
 0xba1   : > { %p2212_p5 = pneg %p2211_p6 }
 0xba2   : > { %p2218_p4 = por %p2217_p11, %p2216_p12 }
 0xba4   : > { %p2219_p0 = pnand %p2218_p4, %p2212_p5 }
 0xba6   : > { %2222 = shalt.err (!%p2219_p0)
}
 0xba7   : > { %1862 = dma.vmem_to_hbm [thread:$0]  (%p3262_p2), %s3099_s11, 64, %s1531_s5, %s1516_s23  }
 0xba8 PF: > { %s3268_s10 = sld [smem:[#allocation27_spill]]  ;;  %s3269_s20 = sld [smem:[#allocation40_spill]] }
 0xba9   : > { %p1885_p13 = scmp.ge.s32.totalorder %s2375_s27, 2 }
 0xbae   : > { %s1545_s30 = sand.u32 1, %s3268_s10   ;;  %p3270_p10 = scmp.ne.s32.totalorder %s3269_s20, 0 }
 0xbaf   : > { %s1546_s18 = scalar_lea.sflag [#allocation10], %s1545_s30 }
 0xbb0   : > { %p1881_p7 = pnand %p1885_p13, %p3270_p10 }
 0xbb2   : > { %2306 = dma.done.wait (!%p1881_p7), %s1546_s18, 64  }
 0xbb3   : > { %2308 = vsyncadd (!%p1881_p7), %s1546_s18, 4294967232  ;;  %s30_s27 = sadd.s32 1, %s2375_s27   ;;  %s3272_s0 = sld [smem:[#allocation28_spill]] }
 0xbb4   : > { %p3127_p3 = scmp.ge.s32.totalorder %s30_s27, 8   ;;  %s3273_s13 = sld [smem:[#allocation29_spill]] }
 0xbb5   : > { %s3274_s14 = sld [smem:[#allocation41_spill]]  ;;  %s3275_s17 = sld [smem:[#allocation30_spill]] }
 0xbb6   : > { %s3276_s18 = sld [smem:[#allocation31_spill]]  ;;  %s3277_s6 = sld [smem:[#allocation38_spill]] }
 0xbb7   : > { %s3278_s24 = sld [smem:[#allocation34_spill]]  ;;  %s3279_s11 = sld [smem:[#allocation35_spill]] }
 0xbb8   : > { %s3280_s26 = sld [smem:[#allocation36_spill]]  ;;  %s3282_s15 = smov %s2327_s16 }
 0xbb9   : > { %s3283_s16 = smov %s2331_s1  ;;  %s3284_s1 = smov %s2719_s12 }
 0xbba   : > { %s3286_s20 = smov %s2351_s21  ;;  %s3287_s21 = smov %s2355_s22 }
 0xbbb   : > { %s3288_s22 = smov %s2704_s3  ;;  %s3289_s23 = smov %s2367_s25 }
 0xbbc   : > { %s3285_s19 = smov %s3277_s6  ;;  %29 = sbr.rel (!%p3127_p3) target bundleno = 34 (0x22), region = 131 }
 0xbbd   : > { %s3290_s25 = smov %s3279_s11 }
 0xbc3   :  { %1551 = vsyncpa [#allocation9], 1 }
 0xbc4   :  { %1553 = vsyncpa [#allocation9 + $0x1], 1 }
 0xbc5   :  { %1554 = vsyncpa [#allocation12], 1 }
 0xbc6   :  { %1556 = vsyncpa [#allocation12 + $0x1], 1 }
 0xbc7   :  { %1557 = vsyncpa [#allocation10], 1 }
 0xbc8   :  { %1559 = vsyncpa [#allocation10 + $0x1], 1 }

// kernel: _lambda_.13
= control target key start
LH: loop header
LB: loop body
LE: loop exit
PB: predicated region body
PF: predicated region fallthrough
CT: control target
= control target key end

     0   :  { %s938_s0 = inlined_call_operand.hbm [shape: bf16[2,16,32], index: 0, kind: input, shape index: {}]   ;;  %s939_s1 = inlined_call_operand.hbm [shape: bf16[32,128], index: 1, kind: input, shape index: {}]   ;;  %s940_s2 = inlined_call_operand.hbm [shape: bf16[2,16,128], index: 2, kind: output, shape index: {}]  }
   0x1   :  { %947 = sst [smem:[#allocation13_spill]] %s939_s1 }
   0x2   :  { %7 = vsyncpa [#allocation3], 0 }
   0x3   :  { %9 = vsyncpa [#allocation3 + $0x1], 0 }
   0x4   :  { %10 = vsyncpa [#allocation6], 0 }
   0x5   :  { %11 = vsyncpa [#allocation4], 0 }
   0x6   :  { %13 = vsyncpa [#allocation4 + $0x1], 0  ;;  %s700_s9 = smov 0   ;;  %s702_s10 = smov 0  }
   0x7   :  { %s704_s11 = smov 0   ;;  %s706_s12 = smov 0  }
   0x8   :  { %s708_s13 = smov 0   ;;  %s710_s14 = smov 0  }
   0x9   :  { %s712_s15 = smov 0   ;;  %s714_s16 = smov 0  }
   0xa LB: > { %s390_s17 = sadd.s32 4294967295, %s676_s16   ;;  %s391_s18 = sadd.s32 4294967294, %s676_s16   ;;  %s676_s16 = sphi %s714_s16, %s19_s16   ;;  %s672_s15 = sphi %s712_s15, %s973_s15   ;;  %s668_s14 = sphi %s710_s14, %s972_s14   ;;  %s664_s13 = sphi %s708_s13, %s971_s13   ;;  %s660_s12 = sphi %s706_s12, %s970_s12   ;;  %s656_s11 = sphi %s704_s11, %s969_s11   ;;  %s652_s10 = sphi %s702_s10, %s968_s10   ;;  %s648_s9 = sphi %s700_s9, %s967_s9  }
   0xb   : > { %p60_p0 = scmp.ne.s32.totalorder %s652_s10, %s648_s9  ;;  %p744_p1 = scmp.eq.s32.totalorder %s390_s17, 0 }
   0xc   : > { %p748_p2 = scmp.eq.s32.totalorder %s390_s17, 3  ;;  %p120_p3 = scmp.eq.s32.totalorder %s391_s18, 3 }
   0xd   : > { %s948_s19 = scalar_select %p744_p1, 1, 0 }
   0xe   : > { %s949_s20 = scalar_select %p748_p2, 1, 0 }
   0xf   : > { %p754_p4 = por %p744_p1, %p60_p0  ;;  %p392_p5 = scmp.ge.s32.totalorder %s676_s16, 1 }
  0x10   : > { %p759_p6 = por %p120_p3, %p60_p0  ;;  %p127_p7 = scmp.lt.s32.totalorder %s676_s16, 5 }
  0x11   : > { %s950_s21 = scalar_select %p754_p4, 1, 0 }
  0x12   : > { %s951_s22 = scalar_select %p759_p6, 1, 0 }
  0x13   : > { %p764_p8 = pnand %p392_p5, %p127_p7  ;;  %s678_s24 = smov [#allocation5]  }
  0x14   : > { %952 = sst [smem:[#allocation11_spill]] %s951_s22  ;;  %s141_s25 = sshll.u32 %s678_s24, 4  ;;  %s142_s25 = int_to_ptr.vmem [resolvable:$true] %s141_s25 }
  0x15   : > { %s953_s23 = scalar_select %p764_p8, 1, 0 }
  0x16   : > { %p429_p9 = pneg %p764_p8  ;;  %s955_s1 = sld [smem:[#allocation13_spill]] }
  0x18   : > { %p772_p10 = pnand %p429_p9, %p744_p1 }
  0x1a   : > { %p518_p12 = pneg %p772_p10 }
  0x1c   : > { %s516_s29 = scalar_lea.hbm %s955_s1, 256 }
  0x1d   : > { %p517_p11 = scmp.ne.s32.totalorder %s955_s1, %s516_s29  ;;  %p523_p3 = scmp.lt.u32.totalorder %s516_s29, %s955_s1 }
  0x1f   : > { %p519_p13 = pnand %p518_p12, %p517_p11 }
  0x21   : > { %p520_p0 = pneg %p519_p13 }
  0x23   : > { %p525_p5 = pnand %p523_p3, %p520_p0 }
  0x25   : > { %528 = shalt.err (!%p525_p5)
}
  0x26   : > { %s529_s6 = scalar_lea.vmem %s142_s25, 256  ;;  %p537_p1 = scmp.lt.s32.totalorder %s142_s25, %s142_s25 }
  0x27   : > { %p530_p7 = scmp.ne.s32.totalorder %s142_s25, %s529_s6  ;;  %p538_p4 = scmp.lt.s32.totalorder %s529_s6, %s529_s6 }
  0x29   : > { %p532_p9 = pnand %p530_p7, %p518_p12  ;;  %p539_p8 = por %p538_p4, %p537_p1 }
  0x2b   : > { %p533_p6 = pneg %p532_p9 }
  0x2d   : > { %p540_p2 = pnand %p539_p8, %p533_p6 }
  0x2f   : > { %543 = shalt.err (!%p540_p2)
}
  0x30   : > { %s679_s7 = smov 64   ;;  %s680_s8 = smov 4  }
  0x31   : > { %432 = dma.hbm_to_vmem [thread:$0]  (!%p772_p10), %s955_s1, 256, %s142_s25, [#allocation6], %s679_s7, %s679_s7, %s680_s8  }
  0x32   : > { %s31_s24 = sadd.s32 1, %s668_s14  ;;  %s34_s27 = sadd.s32 1, %s672_s15 }
  0x33   : > { %p32_p1 = scmp.ge.s32.totalorder %s31_s24, 2  ;;  %s47_s28 = sadd.s32 1, %s656_s11 }
  0x34   : > { %p54_p2 = scmp.ne.s32.totalorder %s656_s11, %s652_s10  ;;  %p55_p4 = scmp.eq.s32.totalorder %s676_s16, 0 }
  0x35   : > { %s975_s24 = smov (%p32_p1, %s31_s24), 0  ;;  %s977_s27 = smov (!%p32_p1, %s34_s27), %s672_s15 }
  0x36   : > { %956 = sst [smem:[#allocation12_spill]] %s975_s24  ;;  %s43_s29 = ssub.s32 %s668_s14, %s975_s24 }
  0x37   : > { %p36_p6 = scmp.ge.s32.totalorder %s977_s27, 2  ;;  %p957_p8 = scmp.ne.s32.totalorder %s949_s20, 0 }
  0x38   : > { %p809_p10 = por %p55_p4, %p54_p2  ;;  %p442_p12 = scmp.lt.s32.totalorder %s676_s16, 4 }
  0x39   : > { %p805_p11 = por %p957_p8, %p54_p2  ;;  %s979_s27 = smov (%p36_p6, %s977_s27), 0 }
  0x3a   : > { %s155_s30 = sand.u32 1, %s656_s11   ;;  %s396_s3 = sshll.u32 %s672_s15, 1 }
  0x3b   : > { %s42_s4 = ssub.s32 %s672_s15, %s979_s27  ;;  %s395_s6 = sshll.u32 %s155_s30, 2 }
  0x3c   : > { %s44_s5 = sor.u32 %s43_s29, %s42_s4  ;;  %s164_s20 = sadd.s32 %s668_s14, %s396_s3 }
  0x3d   : > { %p45_p13 = scmp.eq.s32.totalorder %s44_s5, 0  ;;  %s159_s7 = scalar_lea.vmem [#allocation2], %s395_s6 }
  0x3e   : > { %s168_s8 = sshll.u32 %s159_s7, 4  ;;  %s397_s18 = sshll.u32 %s164_s20, 6  ;;  %s824_s8 = int_to_ptr.vmem [resolvable:$true] %s168_s8 }
  0x3f   : > { %s822_s17 = scalar_select %p45_p13, %s656_s11, %s47_s28  }
  0x40   : > { %s829_s22 = scalar_lea.hbm %s938_s0, %s397_s18  ;;  %p835_p0 = pnand %p442_p12, %p809_p10 }
  0x41   : > { %s156_s28 = scalar_lea.sflag [#allocation3], %s155_s30  ;;  %s544_s3 = scalar_lea.hbm %s829_s22, 64 }
  0x42   : > { %p545_p3 = scmp.ne.s32.totalorder %s829_s22, %s544_s3  ;;  %p546_p5 = pneg %p835_p0 }
  0x43   : > { %s549_s25 = scalar_lea.hbm %s938_s0, 256  ;;  %p550_p1 = scmp.lt.u32.totalorder %s829_s22, %s938_s0 }
  0x44   : > { %p547_p7 = pnand %p546_p5, %p545_p3  ;;  %p551_p2 = scmp.lt.u32.totalorder %s549_s25, %s544_s3 }
  0x45   : > { %p553_p6 = scmp.lt.u32.totalorder %s544_s3, %s829_s22 }
  0x46   : > { %p548_p9 = pneg %p547_p7  ;;  %p552_p4 = por %p551_p2, %p550_p1 }
  0x48   : > { %p554_p8 = por %p553_p6, %p552_p4 }
  0x4a   : > { %p555_p10 = pnand %p554_p8, %p548_p9 }
  0x4c   : > { %558 = shalt.err (!%p555_p10)
}
  0x4d   : > { %s559_s30 = scalar_lea.vmem %s824_s8, 64  ;;  %s681_s6 = smov [#allocation2]  }
  0x4e   : > { %p560_p12 = scmp.ne.s32.totalorder %s824_s8, %s559_s30  ;;  %s564_s20 = sshll.u32 %s681_s6, 4  ;;  %s565_s20 = int_to_ptr.vmem [resolvable:$false] %s564_s20 }
  0x4f   : > { %s566_s7 = scalar_lea.vmem %s565_s20, 128  ;;  %p567_p7 = scmp.lt.s32.totalorder %s824_s8, %s565_s20 }
  0x50   : > { %p562_p13 = pnand %p560_p12, %p546_p5  ;;  %p568_p1 = scmp.lt.s32.totalorder %s566_s7, %s559_s30 }
  0x52   : > { %p563_p3 = pneg %p562_p13  ;;  %p569_p2 = por %p568_p1, %p567_p7 }
  0x54   : > { %p570_p4 = pnand %p569_p2, %p563_p3 }
  0x56   : > { %573 = shalt.err (!%p570_p4)
}
  0x57   : > { %436 = dma.hbm_to_vmem [thread:$0]  (!%p835_p0), %s829_s22, 64, %s824_s8, %s156_s28  }
  0x58   : > { %p961_p9 = scmp.ne.s32.totalorder %s953_s23, 0 }
  0x59   : > { %s867_s18 = sand.u32 (!%p961_p9), 1, %s652_s10   ;;  %p962_p5 = scmp.ne.s32.totalorder (!%p961_p9), %s950_s21, 0 }
  0x5a   : > { %177 = sbr.rel (%p961_p9) target bundleno = 338 (0x152), region = 28  ;;  %s399_s3 = sshll.u32 (!%p961_p9), %s867_s18, 2 }
  0x5b   : > { %s180_s1 = scalar_lea.sflag (!%p961_p9), [#allocation3], %s867_s18  ;;  %s183_s24 = scalar_lea.vmem (!%p961_p9), [#allocation2], %s399_s3 }
  0x61   : > { %635 = dma.done.wait (%p962_p5), %s180_s1, 64  }
  0x62   : > { %637 = vsyncadd (%p962_p5), %s180_s1, 4294967232  ;;  %p963_p6 = scmp.ne.s32.totalorder %s948_s19, 0 }
  0x64   : > { %639 = dma.done.wait (%p963_p6), [#allocation6], 256  }
  0x65   : > { %641 = vsyncadd (%p963_p6), [#allocation6], 4294967040  ;;  %v682_v0 = vmov 0.0   ;;  %vm683_vm0 = vmmov 0   ;;  %v514_v1 = vld [vmem:[#allocation5] sm:$0xff]   ;;  %v515_v2 = vld [vmem:[#allocation5 + $0x8] sm:$0xff]  }
  0x66   : > { %413 = vmatprep.subr.bf16.mxu0 %v682_v0  ;;  %417 = vmatprep.mubr.msk.bf16.mxu0 %vm683_vm0, %v682_v0  ;;  %v209_v3 = vld [vmem:[%s183_s24] sm:$0xf]  ;;  %vm226_vm1 = vcmask 261120   ;;  %s406_s21 = sshll.u32 %s664_s13, 1  ;;  %s207_s23 = scalar_lea.vmem [#allocation7], %s399_s3 }
  0x67   : > { %414 = vmatpush3.bf16.msra.mxu0 %v514_v1  ;;  %s285_s22 = sadd.s32 %s660_s12, %s406_s21  ;;  %s289_s8 = sshll.u32 %s207_s23, 4  ;;  %s886_s8 = int_to_ptr.vmem [resolvable:$true] %s289_s8 }
  0x68   : > { %415 = vmatprep.subr.bf16.mxu0 %v682_v0  ;;  %s407_s19 = sshll.u32 %s285_s22, 6  ;;  %s273_s12 = scalar_lea.sflag [#allocation4], %s867_s18 }
  0x69   : > { %s884_s25 = scalar_lea.hbm %s940_s2, %s407_s19  ;;  %s574_s13 = scalar_lea.vmem %s886_s8, 64 }
  0x6a   : > { %p575_p0 = scmp.ne.s32.totalorder %s886_s8, %s574_s13  ;;  %s684_s4 = smov [#allocation7]  }
  0x6b   : > { %416 = vmatpush3.bf16.msra.mxu0 %v515_v2  ;;  %s578_s5 = sshll.u32 %s684_s4, 4  ;;  %s579_s5 = int_to_ptr.vmem [resolvable:$false] %s578_s5 }
  0x6c   : > { %p576_p8 = pnand %p575_p0, %p805_p11  ;;  %s580_s30 = scalar_lea.vmem %s579_s5, 128 }
  0x6d   : > { %p581_p12 = scmp.lt.s32.totalorder %s886_s8, %s579_s5  ;;  %p582_p13 = scmp.lt.s32.totalorder %s580_s30, %s574_s13 }
  0x6e   : > { %418 = vmatmul.mubr.msk.bf16.vlgmr.msra.gmra.mrb[0].mxu0 %vm226_vm1, %v209_v3  ;;  %p577_p10 = pneg %p576_p8 }
  0x6f   : > { %p583_p3 = por %p582_p13, %p581_p12 }
  0x71   : > { %p584_p7 = pnand %p583_p3, %p577_p10 }
 0x141   : > { %v264_v4 = vpop.f32.mrb[0].mxu0 }
 0x142   : > { %v270_v5 = vpack.c.bf16 %v264_v4, %v264_v4  ;;  %v419_v6 = vpop.f32.mrb[1].mxu0 }
 0x143   : > { %v267_v7 = vpop.f32.mrb[2].mxu0 }
 0x144   : > { %271 = vst [vmem:[%s207_s23] sm:$0xf] %v270_v5  ;;  %v420_v8 = vpop.f32.mrb[3].mxu0 }
 0x145   : > { %587 = shalt.err (!%p584_p7)
}
 0x146   : > { %s588_s6 = scalar_lea.hbm %s884_s25, 64  ;;  %s592_s18 = scalar_lea.hbm %s940_s2, 256 }
 0x147   : > { %p589_p1 = scmp.ne.s32.totalorder %s884_s25, %s588_s6  ;;  %p593_p9 = scmp.lt.u32.totalorder %s884_s25, %s940_s2 }
 0x148   : > { %p594_p5 = scmp.lt.u32.totalorder %s592_s18, %s588_s6  ;;  %p596_p0 = scmp.lt.u32.totalorder %s588_s6, %s884_s25 }
 0x149   : > { %p590_p2 = pnand %p589_p1, %p805_p11 }
 0x14a   : > { %p595_p6 = por %p594_p5, %p593_p9 }
 0x14b   : > { %p591_p4 = pneg %p590_p2 }
 0x14c   : > { %p597_p8 = por %p596_p0, %p595_p6 }
 0x14e   : > { %p598_p10 = pnand %p597_p8, %p591_p4 }
 0x150   : > { %601 = shalt.err (!%p598_p10)
}
 0x151   : > { %427 = dma.vmem_to_hbm [thread:$0]  (%p805_p11), %s886_s8, 64, %s884_s25, %s273_s12  }
 0x152 PF: > { %s964_s24 = sld [smem:[#allocation11_spill]]  ;;  %p444_p12 = scmp.ge.s32.totalorder %s676_s16, 2 }
 0x153   : > { %s301_s21 = sand.u32 1, %s648_s9  }
 0x154   : > { %s302_s22 = scalar_lea.sflag [#allocation4], %s301_s21 }
 0x158   : > { %p965_p13 = scmp.ne.s32.totalorder %s964_s24, 0 }
 0x15a   : > { %p438_p3 = pnand %p444_p12, %p965_p13 }
 0x15c   : > { %643 = dma.done.wait (!%p438_p3), %s302_s22, 64  }
 0x15d   : > { %645 = vsyncadd (!%p438_p3), %s302_s22, 4294967232  ;;  %s19_s16 = sadd.s32 1, %s676_s16   ;;  %s966_s26 = sld [smem:[#allocation12_spill]] }
 0x15e   : > { %p16_p7 = scmp.ge.s32.totalorder %s19_s16, 6   ;;  %s967_s9 = smov %s652_s10 }
 0x15f   : > { %s968_s10 = smov %s656_s11  ;;  %s969_s11 = smov %s822_s17 }
 0x160   : > { %s970_s12 = smov %s668_s14  ;;  %s971_s13 = smov %s672_s15 }
 0x161   : > { %s973_s15 = smov %s979_s27  ;;  %18 = sbr.rel (!%p16_p7) target bundleno = 10 (0xa), region = 78 }
 0x163   : > { %s972_s14 = smov %s966_s26 }
 0x168   :  { %307 = vsyncpa [#allocation3], 1 }
 0x169   :  { %309 = vsyncpa [#allocation3 + $0x1], 1 }
 0x16a   :  { %310 = vsyncpa [#allocation6], 1 }
 0x16b   :  { %311 = vsyncpa [#allocation4], 1 }
 0x16c   :  { %313 = vsyncpa [#allocation4 + $0x1], 1 }

</bundles_post_ra>
